<compile_context>
chip_gen: v7x
topology: tpu7x:2x2x1
jax: 0.10.0
libtpu: 0.0.40
codegen_flags: <defaults>
</compile_context>

<pallas_src>
import math
from functools import partial

import jax
import jax.numpy as jnp
import numpy as np
from jax.experimental import pallas as pl
from jax.experimental.pallas import tpu as pltpu


# ------------------------------ helpers -------------------------------------

def _round_up(x, m):
    return ((x + m - 1) // m) * m


def _pick_tile(dim, target, granule):
    """Pick a tile: a multiple of `granule`, <= target, preferring one that divides
    round_up(dim, granule) so no padding beyond granule alignment is needed.
    Falls back to padding to a multiple of the target tile only when the best
    divisor is pathologically small. Returns (tile, padded_dim)."""
    dim_p = max(_round_up(dim, granule), granule)
    t_max = max((min(target, dim_p) // granule) * granule, granule)
    best = granule
    for t in range(t_max, granule - 1, -granule):
        if dim_p % t == 0:
            best = t
            break
    if best * 2 >= t_max:
        return best, dim_p
    return t_max, _round_up(dim_p, t_max)


def _gelu(x):
    # tanh approximation of GELU (close to torch's erf GELU at bf16 tolerance)
    c = math.sqrt(2.0 / math.pi)
    return 0.5 * x * (1.0 + jnp.tanh(c * (x + 0.044715 * x * x * x)))


# ------------- tiled matmul (+fused pre-LN, +bias, +GELU, +residual) ---------

def _mm_kernel(*refs, act, has_bias, has_res, has_ln, ln_eps, k_true):
    it = iter(refs)
    a_ref = next(it)
    b_ref = next(it)
    g_ref = next(it) if has_ln else None
    be_ref = next(it) if has_ln else None
    bias_ref = next(it) if has_bias else None
    res_ref = next(it) if has_res else None
    o_ref = next(it)
    acc_ref = next(it)

    @pl.when(pl.program_id(2) == 0)
    def _():
        acc_ref[...] = jnp.zeros_like(acc_ref)

    if has_ln:
        # Pre-LayerNorm fused into the GEMM A tile (tk spans the full K so the row
        # statistics are computable). Sum-based mean/var with the *true* K keeps the
        # result exact even when K is zero-padded up to the lane granule.
        x = a_ref[...].astype(jnp.float32)
        kinv = 1.0 / k_true
        mu = jnp.sum(x, axis=-1, keepdims=True) * kinv
        var = jnp.maximum(jnp.sum(x * x, axis=-1, keepdims=True) * kinv - mu * mu, 0.0)
        a = ((x - mu) * jax.lax.rsqrt(var + ln_eps) * g_ref[...] + be_ref[...]
             ).astype(jnp.bfloat16)
    else:
        a = a_ref[...]

    acc_ref[...] += jnp.dot(a, b_ref[...], preferred_element_type=jnp.float32)

    @pl.when(pl.program_id(2) == pl.num_programs(2) - 1)
    def _():
        acc = acc_ref[...]
        if has_bias:
            acc = acc + bias_ref[...]          # (1, tn) broadcast over rows
        if act == "gelu":
            acc = _gelu(acc)
        if has_res:
            acc = acc + res_ref[...].astype(jnp.float32)   # fused residual add
        o_ref[...] = acc.astype(o_ref.dtype)


def matmul_bias_act(a, b, bias=None, act="none", residual=None, ln=None,
                    out_dtype=jnp.bfloat16, tm=256, tn=512, tk=1280):
    """y = act(LN?(a) @ b + bias) + residual?.
    a:(M,K), b:(K,N), bias:(N,), residual:(M,N), ln=(gamma, beta, eps).
    bf16 MXU operands (A stays f32 when LN is fused), f32 accumulation.
    Tiles are chosen to divide the problem dims (no dead MXU work on real Whisper
    shapes); tk/tn targets keep the 256-wide MXU full on v6e/v7x."""
    M, K = a.shape
    K2, N = b.shape
    assert K == K2

    tm, Mp = _pick_tile(M, tm, 8)
    tn, Np = _pick_tile(N, tn, 128)
    if ln is not None:
        Kp = _round_up(K, 128)
        tk = Kp                                 # LN fusion needs full K per A tile
    else:
        tk, Kp = _pick_tile(K, tk, 128)

    a_dtype = jnp.float32 if ln is not None else jnp.bfloat16
    a_p = a.astype(a_dtype)
    if (Mp, Kp) != (M, K):
        a_p = jnp.pad(a_p, ((0, Mp - M), (0, Kp - K)))
    b_p = b.astype(jnp.bfloat16)
    if (Kp, Np) != (K, N):
        b_p = jnp.pad(b_p, ((0, Kp - K), (0, Np - N)))

    inputs = [a_p, b_p]
    in_specs = [pl.BlockSpec((tm, tk), lambda i, j, k: (i, k)),
                pl.BlockSpec((tk, tn), lambda i, j, k: (k, j))]

    has_ln = ln is not None
    if has_ln:
        gamma, beta, eps = ln
        g_p = gamma.reshape(1, K).astype(jnp.float32)
        be_p = beta.reshape(1, K).astype(jnp.float32)
        if Kp != K:
            g_p = jnp.pad(g_p, ((0, 0), (0, Kp - K)))
            be_p = jnp.pad(be_p, ((0, 0), (0, Kp - K)))
        inputs += [g_p, be_p]
        in_specs += [pl.BlockSpec((1, tk), lambda i, j, k: (0, k)),
                     pl.BlockSpec((1, tk), lambda i, j, k: (0, k))]
    else:
        eps = 0.0

    has_bias = bias is not None
    if has_bias:
        bias_p = bias.astype(jnp.float32).reshape(1, N)
        if Np != N:
            bias_p = jnp.pad(bias_p, ((0, 0), (0, Np - N)))
        inputs.append(bias_p)
        in_specs.append(pl.BlockSpec((1, tn), lambda i, j, k: (0, j)))

    has_res = residual is not None
    if has_res:
        r_p = residual.astype(jnp.float32)
        if (Mp, Np) != (M, N):
            r_p = jnp.pad(r_p, ((0, Mp - M), (0, Np - N)))
        inputs.append(r_p)
        in_specs.append(pl.BlockSpec((tm, tn), lambda i, j, k: (i, j)))

    out = pl.pallas_call(
        partial(_mm_kernel, act=act, has_bias=has_bias, has_res=has_res,
                has_ln=has_ln, ln_eps=eps, k_true=K),
        out_shape=jax.ShapeDtypeStruct((Mp, Np), out_dtype),
        grid=(Mp // tm, Np // tn, Kp // tk),
        in_specs=in_specs,
        out_specs=pl.BlockSpec((tm, tn), lambda i, j, k: (i, j)),
        scratch_shapes=[pltpu.VMEM((tm, tn), jnp.float32)],
        compiler_params=pltpu.CompilerParams(
            dimension_semantics=("parallel", "parallel", "arbitrary")),
    )(*inputs)

    if (Mp, Np) != (M, N):
        out = out[:M, :N]
    return out


# ------------------------------- LayerNorm ----------------------------------
# (standalone LN is only used for ln_post; per-layer LNs are fused into the GEMMs)

def _ln_kernel(x_ref, g_ref, b_ref, o_ref, *, eps):
    x = x_ref[...].astype(jnp.float32)
    mu = jnp.mean(x, axis=-1, keepdims=True)
    var = jnp.mean(jnp.square(x - mu), axis=-1, keepdims=True)
    y = (x - mu) * jax.lax.rsqrt(var + eps)
    o_ref[...] = (y * g_ref[...] + b_ref[...]).astype(o_ref.dtype)


def layernorm(x, gamma, beta, eps=1e-5, out_dtype=jnp.bfloat16, tm=512):
    """Row-wise LayerNorm over the last axis. x: (M, D)."""
    M, D = x.shape
    tm, Mp = _pick_tile(M, tm, 8)
    x_p = x if Mp == M else jnp.pad(x, ((0, Mp - M), (0, 0)))
    g2 = gamma.reshape(1, D).astype(jnp.float32)
    b2 = beta.reshape(1, D).astype(jnp.float32)
    out = pl.pallas_call(
        partial(_ln_kernel, eps=eps),
        out_shape=jax.ShapeDtypeStruct((Mp, D), out_dtype),
        grid=(Mp // tm,),
        in_specs=[
            pl.BlockSpec((tm, D), lambda i: (i, 0)),
            pl.BlockSpec((1, D), lambda i: (0, 0)),
            pl.BlockSpec((1, D), lambda i: (0, 0)),
        ],
        out_specs=pl.BlockSpec((tm, D), lambda i: (i, 0)),
        compiler_params=pltpu.CompilerParams(dimension_semantics=("parallel",)),
    )(x_p, g2, b2)
    return out[:M] if Mp != M else out


# --------------------- flash-style multi-head attention ----------------------

def _flash_attn_kernel(q_ref, k_ref, v_ref, o_ref, m_sc, l_sc, acc_sc,
                       *, n_heads, head_dim, seq_len, tkv, masked):
    ki = pl.program_id(2)

    @pl.when(ki == 0)
    def _():
        m_sc[...] = jnp.full_like(m_sc, -jnp.inf)
        l_sc[...] = jnp.zeros_like(l_sc)
        acc_sc[...] = jnp.zeros_like(acc_sc)

    q = q_ref[0]          # (tq, D) bf16 — softmax scale pre-folded into wq/bq
    k = k_ref[0]          # (tkv, D) bf16
    v = v_ref[0]          # (tkv, D) bf16

    # Per-head QK^T — only MXU work lives in this loop. Stacking on the leading axis
    # is layout-free, so the whole online-softmax update below runs once for all heads.
    scores = []
    for h in range(n_heads):
        sl = slice(h * head_dim, (h + 1) * head_dim)
        scores.append(jax.lax.dot_general(
            q[:, sl], k[:, sl], (((1,), (1,)), ((), ())),
            preferred_element_type=jnp.float32))
    s = jnp.stack(scores, axis=0)                        # (H, tq, tkv) f32

    if masked:
        # single additive KV-padding bias shared by all heads / query rows
        kv_pos = ki * tkv + jax.lax.broadcasted_iota(jnp.int32, (1, 1, tkv), 2)
        s = s + jnp.where(kv_pos < seq_len, 0.0, -1e30)

    # Online softmax state update, batched over heads.
    m_prev = m_sc[...]                                    # (H, tq, 1)
    m_new = jnp.maximum(m_prev, jnp.max(s, axis=-1, keepdims=True))
    alpha = jnp.exp(m_prev - m_new)
    p = jnp.exp(s - m_new)                                # (H, tq, tkv)
    l_sc[...] = alpha * l_sc[...] + jnp.sum(p, axis=-1, keepdims=True)
    m_sc[...] = m_new
    acc_sc[...] = alpha * acc_sc[...]                     # one batched rescale

    p_bf = p.astype(v.dtype)
    for h in range(n_heads):
        sl = slice(h * head_dim, (h + 1) * head_dim)
        acc_sc[h] += jnp.dot(p_bf[h], v[:, sl], preferred_element_type=jnp.float32)

    @pl.when(ki == pl.num_programs(2) - 1)
    def _():
        inv = pl.reciprocal(l_sc[...], approx=True)       # (H, tq, 1)
        for h in range(n_heads):                          # direct per-head stores,
            sl = slice(h * head_dim, (h + 1) * head_dim)  # no lane-concat epilogue
            o_ref[0, :, sl] = (acc_sc[h] * inv[h]).astype(o_ref.dtype)


def flash_mha(qkv, n_heads, seq_len, tile):
    """Multi-head softmax attention over a fused QKV tensor.
    qkv: (B, Sp, 3*D) bf16 with the softmax scale already folded into the Q
    projection; Sp is a multiple of `tile`. Q/K/V are selected via BlockSpec column
    blocks (no XLA split / copies). Returns (B, Sp, D) bf16."""
    B, Sp, D3 = qkv.shape
    D = D3 // 3
    Dh = D // n_heads
    t = tile
    assert Sp % t == 0

    kernel = partial(_flash_attn_kernel, n_heads=n_heads, head_dim=Dh,
                     seq_len=seq_len, tkv=t, masked=(seq_len != Sp))
    scratch = [pltpu.VMEM((n_heads, t, 1), jnp.float32),    # running max
               pltpu.VMEM((n_heads, t, 1), jnp.float32),    # running sum
               pltpu.VMEM((n_heads, t, Dh), jnp.float32)]   # per-head output acc
    # (H, t, 1) scratches are lane-padded to 128 wide — accounted for here; raise the
    # scoped VMEM limit with headroom (fits v7x's 64 MiB physical).
    cp = pltpu.CompilerParams(
        dimension_semantics=("parallel", "parallel", "arbitrary"),
        vmem_limit_bytes=48 * 1024 * 1024)
    out_spec = pl.BlockSpec((1, t, D), lambda b, qi, ki: (b, qi, 0))

    if D % 128 == 0:
        # Column-block selection on the fused (B, Sp, 3D) tensor: q/k/v never
        # materialize as separate HBM copies.
        in_specs = [pl.BlockSpec((1, t, D), lambda b, qi, ki: (b, qi, 0)),
                    pl.BlockSpec((1, t, D), lambda b, qi, ki: (b, ki, 1)),
                    pl.BlockSpec((1, t, D), lambda b, qi, ki: (b, ki, 2))]
        args = (qkv, qkv, qkv)
    else:
        # Fallback: block last-dim must be a multiple of 128 (or the full dim), so
        # for lane-unaligned D split in XLA instead.
        q, k, v = qkv[..., :D], qkv[..., D:2 * D], qkv[..., 2 * D:]
        spec_q = pl.BlockSpec((1, t, D), lambda b, qi, ki: (b, qi, 0))
        spec_kv = pl.BlockSpec((1, t, D), lambda b, qi, ki: (b, ki, 0))
        in_specs = [spec_q, spec_kv, spec_kv]
        args = (q, k, v)

    return pl.pallas_call(
        kernel,
        out_shape=jax.ShapeDtypeStruct((B, Sp, D), jnp.bfloat16),
        grid=(B, Sp // t, Sp // t),
        in_specs=in_specs,
        out_specs=out_spec,
        scratch_shapes=scratch,
        compiler_params=cp,
    )(*args)


# ------------------------------ conv as GEMM ---------------------------------

def im2col_1d_batched(x_btc, kernel, stride):
    """x_btc: (B, T, C). Returns bf16 patches (B*T_out, kernel*C) with
    patches[., k*C + c] = x_pad[t*stride + k, c] (same padding = kernel//2).
    B is folded into the GEMM M dimension (single GEMM for the whole batch)."""
    B, T, C = x_btc.shape
    pad = kernel // 2
    xp = jnp.pad(x_btc, ((0, 0), (pad, pad), (0, 0)))
    T_out = (T + 2 * pad - kernel) // stride + 1
    cols = [xp[:, k:k + stride * (T_out - 1) + 1:stride, :] for k in range(kernel)]
    patches = jnp.concatenate(cols, axis=2).astype(jnp.bfloat16)
    return patches.reshape(B * T_out, kernel * C)


# ------------------------------ params / glue --------------------------------

def sinusoids(length, channels, max_timescale=10000.0):
    inc = np.log(max_timescale) / (channels // 2 - 1)
    inv = np.exp(-inc * np.arange(channels // 2))
    t = np.arange(length)[:, None] * inv[None, :]
    return np.concatenate([np.sin(t), np.cos(t)], axis=1).astype(np.float32)


def init_params(key, n_mels, d_model, n_heads, n_layers, mlp_dim):
    def nrm(k, shape):
        return jax.random.normal(k, shape, dtype=jnp.float32) * 0.02

    keys = iter(jax.random.split(key, 8 + 12 * n_layers))
    p = {
        "conv1_w": nrm(next(keys), (d_model, n_mels, 3)),
        "conv1_b": jnp.zeros((d_model,), jnp.float32),
        "conv2_w": nrm(next(keys), (d_model, d_model, 3)),
        "conv2_b": jnp.zeros((d_model,), jnp.float32),
        "ln_post_g": jnp.ones((d_model,), jnp.float32),
        "ln_post_b": jnp.zeros((d_model,), jnp.float32),
        "layers": [],
    }
    for _ in range(n_layers):
        p["layers"].append({
            "ln1_g": jnp.ones((d_model,), jnp.float32),
            "ln1_b": jnp.zeros((d_model,), jnp.float32),
            "wq": nrm(next(keys), (d_model, d_model)),
            "bq": jnp.zeros((d_model,), jnp.float32),
            "wk": nrm(next(keys), (d_model, d_model)),   # Whisper: k-proj has no bias
            "wv": nrm(next(keys), (d_model, d_model)),
            "bv": jnp.zeros((d_model,), jnp.float32),
            "wo": nrm(next(keys), (d_model, d_model)),
            "bo": jnp.zeros((d_model,), jnp.float32),
            "ln2_g": jnp.ones((d_model,), jnp.float32),
            "ln2_b": jnp.zeros((d_model,), jnp.float32),
            "w_fc1": nrm(next(keys), (d_model, mlp_dim)),
            "b_fc1": jnp.zeros((mlp_dim,), jnp.float32),
            "w_fc2": nrm(next(keys), (mlp_dim, d_model)),
            "b_fc2": jnp.zeros((d_model,), jnp.float32),
        })
    return p


def prepare_params(params, n_heads):
    """One-time weight layout conversion: conv weights -> (K*C_in, C_out) GEMM form,
    Q|K|V fused into one (d, 3d) matmul with the softmax scale folded into the
    Q part, everything MXU-facing pre-cast to bf16."""
    d = params["conv1_w"].shape[0]
    scale = 1.0 / math.sqrt(d // n_heads)

    def conv_w2d(w):   # (C_out, C_in, K) -> (K*C_in, C_out)
        return w.transpose(2, 1, 0).reshape(-1, w.shape[0]).astype(jnp.bfloat16)

    prep = {
        "conv1_w2d": conv_w2d(params["conv1_w"]),
        "conv1_b": params["conv1_b"].astype(jnp.float32),
        "conv2_w2d": conv_w2d(params["conv2_w"]),
        "conv2_b": params["conv2_b"].astype(jnp.float32),
        "ln_post_g": params["ln_post_g"],
        "ln_post_b": params["ln_post_b"],
        "layers": [],
    }
    for lp in params["layers"]:
        w_qkv = jnp.concatenate(
            [lp["wq"] * scale, lp["wk"], lp["wv"]], axis=1).astype(jnp.bfloat16)
        b_qkv = jnp.concatenate(
            [lp["bq"] * scale, jnp.zeros_like(lp["bq"]), lp["bv"]]
        ).astype(jnp.float32)
        prep["layers"].append({
            "ln1_g": lp["ln1_g"], "ln1_b": lp["ln1_b"],
            "w_qkv": w_qkv, "b_qkv": b_qkv,
            "wo": lp["wo"].astype(jnp.bfloat16), "bo": lp["bo"].astype(jnp.float32),
            "ln2_g": lp["ln2_g"], "ln2_b": lp["ln2_b"],
            "w_fc1": lp["w_fc1"].astype(jnp.bfloat16),
            "b_fc1": lp["b_fc1"].astype(jnp.float32),
            "w_fc2": lp["w_fc2"].astype(jnp.bfloat16),
            "b_fc2": lp["b_fc2"].astype(jnp.float32),
        })
    return prep


def audio_encoder_forward(mel, prep, n_heads, seq_tile=256):
    """mel: (B, n_mels, T) -> audio features (B, T//2, d_model), f32."""
    B, n_mels, T = mel.shape
    d = prep["conv1_w2d"].shape[1]

    # ---- conv stem (batched: B folded into the GEMM M dimension) ----
    x_btc = jnp.transpose(mel, (0, 2, 1))                        # (B, T, n_mels)
    p1 = im2col_1d_batched(x_btc, kernel=3, stride=1)            # (B*T, 3*n_mels)
    h1 = matmul_bias_act(p1, prep["conv1_w2d"], prep["conv1_b"], act="gelu")  # bf16

    # Pad the sequence ONCE (before conv2) to the attention tile: every later op
    # runs on tile-aligned shapes with no per-call pad/slice. Padded rows are
    # masked as KV in attention and sliced off at the very end.
    S0 = (T - 1) // 2 + 1                                        # conv2 output length
    t = min(seq_tile, _round_up(S0, 8))
    Sp = _round_up(S0, t)
    h1 = h1.reshape(B, T, d)
    if 2 * Sp != T:
        h1 = jnp.pad(h1, ((0, 0), (0, 2 * Sp - T), (0, 0)))
    p2 = im2col_1d_batched(h1, kernel=3, stride=2)               # (B*Sp, 3d)
    h2 = matmul_bias_act(p2, prep["conv2_w2d"], prep["conv2_b"], act="gelu",
                         out_dtype=jnp.float32)                  # (B*Sp, d) f32

    # sinusoidal positional embedding (computed once at trace time, padded to Sp)
    pos = np.zeros((Sp, d), np.float32)
    pos[:S0] = sinusoids(S0, d)
    x = (h2.reshape(B, Sp, d) + jnp.asarray(pos)[None]).reshape(B * Sp, d)  # f32 stream

    for lp in prep["layers"]:
        # --- attention: pre-LN fused into the QKV GEMM, scale folded into Q ---
        qkv = matmul_bias_act(x, lp["w_qkv"], lp["b_qkv"],
                              ln=(lp["ln1_g"], lp["ln1_b"], 1e-5),
                              out_dtype=jnp.bfloat16)            # (B*Sp, 3d)
        a = flash_mha(qkv.reshape(B, Sp, 3 * d), n_heads, seq_len=S0, tile=t)
        x = matmul_bias_act(a.reshape(B * Sp, d), lp["wo"], lp["bo"],
                            residual=x, out_dtype=jnp.float32)   # x + attn_out fused

        # --- MLP: pre-LN fused into fc1, residual fused into fc2 ---
        m1 = matmul_bias_act(x, lp["w_fc1"], lp["b_fc1"], act="gelu",
                             ln=(lp["ln2_g"], lp["ln2_b"], 1e-5),
                             out_dtype=jnp.bfloat16)
        x = matmul_bias_act(m1, lp["w_fc2"], lp["b_fc2"],
                            residual=x, out_dtype=jnp.float32)

    out = layernorm(x, prep["ln_post_g"], prep["ln_post_b"], out_dtype=jnp.float32)
    out = out.reshape(B, Sp, d)
    return out[:, :S0, :] if Sp != S0 else out


# ----------------------------------- main ------------------------------------

if __name__ == "__main__":
    # Small deterministic config consistent with the Whisper encoder the module
    # wraps (real model: mel (1, 80, 3000), d_model 384..1280). d_model is kept a
    # multiple of 128 so the fused-QKV BlockSpec column-selection path is exercised;
    # perf should only be measured on real Whisper shapes.
    B, N_MELS, T = 2, 16, 64
    D_MODEL, N_HEADS, N_LAYERS, MLP = 128, 4, 2, 512

    key = jax.random.PRNGKey(0)
    k_mel, k_par = jax.random.split(key)
    mel = jax.random.normal(k_mel, (B, N_MELS, T), dtype=jnp.float32)
    params = init_params(k_par, N_MELS, D_MODEL, N_HEADS, N_LAYERS, MLP)
    prep = prepare_params(params, N_HEADS)   # weight layout/cast done once

    encoder = jax.jit(partial(audio_encoder_forward, n_heads=N_HEADS))
    audio_features = encoder(mel, prep)
    jax.block_until_ready(audio_features)

    S_OUT = (T - 1) // 2 + 1
    assert audio_features.shape == (B, S_OUT, D_MODEL)
    assert bool(jnp.all(jnp.isfinite(audio_features)))
    # TODO(synk): the OpenVINO runtime plumbing (core.read_model / compile_model) has
    # no Pallas equivalent; the wrapped Whisper encoder network itself is implemented above.
    print("KERNEL_OK")
</pallas_src>

<mosaic_0001>
module attributes {stable_mosaic.version = 11 : i64} {
  func.func @_mm_kernel(%arg0: i32, %arg1: i32, %arg2: i32, %arg3: memref<128x128xbf16, #tpu.memory_space<vmem>>, %arg4: memref<128x128xbf16, #tpu.memory_space<vmem>>, %arg5: memref<1x128xf32, #tpu.memory_space<vmem>>, %arg6: memref<128x128xbf16, #tpu.memory_space<vmem>>, %arg7: memref<128x128xf32, #tpu.memory_space<vmem>>) attributes {dimension_semantics = [#tpu.dimension_semantics<parallel>, #tpu.dimension_semantics<parallel>, #tpu.dimension_semantics<arbitrary>], iteration_bounds = array<i64: 1, 1, 1>, scalar_prefetch = 0 : i64, scratch_operands = 1 : i64, tpu.core_type = #tpu.core_type<tc>, window_params = [{transform_indices = @transform_0, window_bounds = array<i64: 128, 128>}, {transform_indices = @transform_1, window_bounds = array<i64: 128, 128>}, {transform_indices = @transform_2, window_bounds = array<i64: 1, 128>}, {transform_indices = @transform_3, window_bounds = array<i64: 128, 128>}]} {
    %c0_i32 = arith.constant 0 : i32
    %0 = arith.cmpi eq, %arg2, %c0_i32 : i32
    %1 = arith.extui %0 : i1 to i32
    %c0_i32_0 = arith.constant 0 : i32
    %2 = arith.cmpi ne, %1, %c0_i32_0 : i32
    scf.if %2 {
      %cst_10 = arith.constant 0.000000e+00 : f32
      %12 = vector.broadcast %cst_10 : f32 to vector<128x128xf32>
      %c0_11 = arith.constant 0 : index
      %c0_12 = arith.constant 0 : index
      %13 = vector.load %arg7[%c0_11, %c0_12] : memref<128x128xf32, #tpu.memory_space<vmem>>, vector<128x128xf32>
      tpu.vector_store %arg7[%c0_11, %c0_12], %12 {strides = array<i32>} : memref<128x128xf32, #tpu.memory_space<vmem>>, vector<128x128xf32>,
    } else {
    }
    %c0 = arith.constant 0 : index
    %c0_1 = arith.constant 0 : index
    %3 = vector.load %arg3[%c0, %c0_1] : memref<128x128xbf16, #tpu.memory_space<vmem>>, vector<128x128xbf16>
    %c0_2 = arith.constant 0 : index
    %c0_3 = arith.constant 0 : index
    %4 = vector.load %arg7[%c0_2, %c0_3] : memref<128x128xf32, #tpu.memory_space<vmem>>, vector<128x128xf32>
    %c0_4 = arith.constant 0 : index
    %c0_5 = arith.constant 0 : index
    %5 = vector.load %arg4[%c0_4, %c0_5] : memref<128x128xbf16, #tpu.memory_space<vmem>>, vector<128x128xbf16>
    %cst = arith.constant dense<0.000000e+00> : vector<128x128xf32>
    %6 = tpu.matmul %3, %5, %cst {dimension_numbers = #tpu.dot_dimension_numbers<[1], [0], [0], [1], [0, 0, 1, 1], [], []>} : vector<128x128xbf16>, vector<128x128xbf16>, vector<128x128xf32> -> vector<128x128xf32>
    %7 = arith.addf %4, %6 : vector<128x128xf32>
    %c0_6 = arith.constant 0 : index
    %c0_7 = arith.constant 0 : index
    %8 = vector.load %arg7[%c0_6, %c0_7] : memref<128x128xf32, #tpu.memory_space<vmem>>, vector<128x128xf32>
    tpu.vector_store %arg7[%c0_6, %c0_7], %7 {strides = array<i32>} : memref<128x128xf32, #tpu.memory_space<vmem>>, vector<128x128xf32>,
    %c0_i32_8 = arith.constant 0 : i32
    %9 = arith.cmpi eq, %arg2, %c0_i32_8 : i32
    %10 = arith.extui %9 : i1 to i32
    %c0_i32_9 = arith.constant 0 : i32
    %11 = arith.cmpi ne, %10, %c0_i32_9 : i32
    scf.if %11 {
      %c0_10 = arith.constant 0 : index
      %c0_11 = arith.constant 0 : index
      %12 = vector.load %arg7[%c0_10, %c0_11] : memref<128x128xf32, #tpu.memory_space<vmem>>, vector<128x128xf32>
      %c0_12 = arith.constant 0 : index
      %c0_13 = arith.constant 0 : index
      %13 = vector.load %arg5[%c0_12, %c0_13] : memref<1x128xf32, #tpu.memory_space<vmem>>, vector<1x128xf32>
      %14 = vector.broadcast %13 : vector<1x128xf32> to vector<128x128xf32>
      %15 = arith.addf %12, %14 : vector<128x128xf32>
      %cst_14 = arith.constant 5.000000e-01 : f32
      %16 = vector.broadcast %cst_14 : f32 to vector<128x128xf32>
      %17 = arith.mulf %16, %15 : vector<128x128xf32>
      %cst_15 = arith.constant 4.471500e-02 : f32
      %18 = vector.broadcast %cst_15 : f32 to vector<128x128xf32>
      %19 = arith.mulf %18, %15 : vector<128x128xf32>
      %20 = arith.mulf %19, %15 : vector<128x128xf32>
      %21 = arith.mulf %20, %15 : vector<128x128xf32>
      %22 = arith.addf %15, %21 : vector<128x128xf32>
      %cst_16 = arith.constant 0.797884583 : f32
      %23 = vector.broadcast %cst_16 : f32 to vector<128x128xf32>
      %24 = arith.mulf %23, %22 : vector<128x128xf32>
      %25 = math.tanh %24 : vector<128x128xf32>
      %cst_17 = arith.constant 1.000000e+00 : f32
      %26 = vector.broadcast %cst_17 : f32 to vector<128x128xf32>
      %27 = arith.addf %26, %25 : vector<128x128xf32>
      %28 = arith.mulf %17, %27 : vector<128x128xf32>
      %29 = arith.truncf %28 : vector<128x128xf32> to vector<128x128xbf16>
      %c0_18 = arith.constant 0 : index
      %c0_19 = arith.constant 0 : index
      %30 = vector.load %arg6[%c0_18, %c0_19] : memref<128x128xbf16, #tpu.memory_space<vmem>>, vector<128x128xbf16>
      tpu.vector_store %arg6[%c0_18, %c0_19], %29 {strides = array<i32>} : memref<128x128xbf16, #tpu.memory_space<vmem>>, vector<128x128xbf16>,
    } else {
    }
    return
  }
  func.func @transform_0(%arg0: i32, %arg1: i32, %arg2: i32) -> (i32, i32) {
    %c0_i32 = arith.constant 0 : i32
    return %arg0, %arg2 : i32, i32
  }
  func.func @transform_1(%arg0: i32, %arg1: i32, %arg2: i32) -> (i32, i32) {
    %c0_i32 = arith.constant 0 : i32
    return %arg2, %arg1 : i32, i32
  }
  func.func @transform_2(%arg0: i32, %arg1: i32, %arg2: i32) -> (i32, i32) {
    %c0_i32 = arith.constant 0 : i32
    %c0_i32_0 = arith.constant 0 : i32
    return %c0_i32, %arg1 : i32, i32
  }
  func.func @transform_3(%arg0: i32, %arg1: i32, %arg2: i32) -> (i32, i32) {
    %c0_i32 = arith.constant 0 : i32
    return %arg0, %arg1 : i32, i32
  }
}

module attributes {stable_mosaic.version = 11 : i64} {
  func.func @_mm_kernel(%arg0: i32, %arg1: i32, %arg2: i32, %arg3: memref<64x384xbf16, #tpu.memory_space<vmem>>, %arg4: memref<384x128xbf16, #tpu.memory_space<vmem>>, %arg5: memref<1x128xf32, #tpu.memory_space<vmem>>, %arg6: memref<64x128xf32, #tpu.memory_space<vmem>>, %arg7: memref<64x128xf32, #tpu.memory_space<vmem>>) attributes {dimension_semantics = [#tpu.dimension_semantics<parallel>, #tpu.dimension_semantics<parallel>, #tpu.dimension_semantics<arbitrary>], iteration_bounds = array<i64: 1, 1, 1>, scalar_prefetch = 0 : i64, scratch_operands = 1 : i64, tpu.core_type = #tpu.core_type<tc>, window_params = [{transform_indices = @transform_0, window_bounds = array<i64: 64, 384>}, {transform_indices = @transform_1, window_bounds = array<i64: 384, 128>}, {transform_indices = @transform_2, window_bounds = array<i64: 1, 128>}, {transform_indices = @transform_3, window_bounds = array<i64: 64, 128>}]} {
    %c0_i32 = arith.constant 0 : i32
    %0 = arith.cmpi eq, %arg2, %c0_i32 : i32
    %1 = arith.extui %0 : i1 to i32
    %c0_i32_0 = arith.constant 0 : i32
    %2 = arith.cmpi ne, %1, %c0_i32_0 : i32
    scf.if %2 {
      %cst_10 = arith.constant 0.000000e+00 : f32
      %12 = vector.broadcast %cst_10 : f32 to vector<64x128xf32>
      %c0_11 = arith.constant 0 : index
      %c0_12 = arith.constant 0 : index
      %13 = vector.load %arg7[%c0_11, %c0_12] : memref<64x128xf32, #tpu.memory_space<vmem>>, vector<64x128xf32>
      tpu.vector_store %arg7[%c0_11, %c0_12], %12 {strides = array<i32>} : memref<64x128xf32, #tpu.memory_space<vmem>>, vector<64x128xf32>,
    } else {
    }
    %c0 = arith.constant 0 : index
    %c0_1 = arith.constant 0 : index
    %3 = vector.load %arg3[%c0, %c0_1] : memref<64x384xbf16, #tpu.memory_space<vmem>>, vector<64x384xbf16>
    %c0_2 = arith.constant 0 : index
    %c0_3 = arith.constant 0 : index
    %4 = vector.load %arg7[%c0_2, %c0_3] : memref<64x128xf32, #tpu.memory_space<vmem>>, vector<64x128xf32>
    %c0_4 = arith.constant 0 : index
    %c0_5 = arith.constant 0 : index
    %5 = vector.load %arg4[%c0_4, %c0_5] : memref<384x128xbf16, #tpu.memory_space<vmem>>, vector<384x128xbf16>
    %cst = arith.constant dense<0.000000e+00> : vector<64x128xf32>
    %6 = tpu.matmul %3, %5, %cst {dimension_numbers = #tpu.dot_dimension_numbers<[1], [0], [0], [1], [0, 0, 1, 1], [], []>} : vector<64x384xbf16>, vector<384x128xbf16>, vector<64x128xf32> -> vector<64x128xf32>
    %7 = arith.addf %4, %6 : vector<64x128xf32>
    %c0_6 = arith.constant 0 : index
    %c0_7 = arith.constant 0 : index
    %8 = vector.load %arg7[%c0_6, %c0_7] : memref<64x128xf32, #tpu.memory_space<vmem>>, vector<64x128xf32>
    tpu.vector_store %arg7[%c0_6, %c0_7], %7 {strides = array<i32>} : memref<64x128xf32, #tpu.memory_space<vmem>>, vector<64x128xf32>,
    %c0_i32_8 = arith.constant 0 : i32
    %9 = arith.cmpi eq, %arg2, %c0_i32_8 : i32
    %10 = arith.extui %9 : i1 to i32
    %c0_i32_9 = arith.constant 0 : i32
    %11 = arith.cmpi ne, %10, %c0_i32_9 : i32
    scf.if %11 {
      %c0_10 = arith.constant 0 : index
      %c0_11 = arith.constant 0 : index
      %12 = vector.load %arg7[%c0_10, %c0_11] : memref<64x128xf32, #tpu.memory_space<vmem>>, vector<64x128xf32>
      %c0_12 = arith.constant 0 : index
      %c0_13 = arith.constant 0 : index
      %13 = vector.load %arg5[%c0_12, %c0_13] : memref<1x128xf32, #tpu.memory_space<vmem>>, vector<1x128xf32>
      %14 = vector.broadcast %13 : vector<1x128xf32> to vector<64x128xf32>
      %15 = arith.addf %12, %14 : vector<64x128xf32>
      %cst_14 = arith.constant 5.000000e-01 : f32
      %16 = vector.broadcast %cst_14 : f32 to vector<64x128xf32>
      %17 = arith.mulf %16, %15 : vector<64x128xf32>
      %cst_15 = arith.constant 4.471500e-02 : f32
      %18 = vector.broadcast %cst_15 : f32 to vector<64x128xf32>
      %19 = arith.mulf %18, %15 : vector<64x128xf32>
      %20 = arith.mulf %19, %15 : vector<64x128xf32>
      %21 = arith.mulf %20, %15 : vector<64x128xf32>
      %22 = arith.addf %15, %21 : vector<64x128xf32>
      %cst_16 = arith.constant 0.797884583 : f32
      %23 = vector.broadcast %cst_16 : f32 to vector<64x128xf32>
      %24 = arith.mulf %23, %22 : vector<64x128xf32>
      %25 = math.tanh %24 : vector<64x128xf32>
      %cst_17 = arith.constant 1.000000e+00 : f32
      %26 = vector.broadcast %cst_17 : f32 to vector<64x128xf32>
      %27 = arith.addf %26, %25 : vector<64x128xf32>
      %28 = arith.mulf %17, %27 : vector<64x128xf32>
      %c0_18 = arith.constant 0 : index
      %c0_19 = arith.constant 0 : index
      %29 = vector.load %arg6[%c0_18, %c0_19] : memref<64x128xf32, #tpu.memory_space<vmem>>, vector<64x128xf32>
      tpu.vector_store %arg6[%c0_18, %c0_19], %28 {strides = array<i32>} : memref<64x128xf32, #tpu.memory_space<vmem>>, vector<64x128xf32>,
    } else {
    }
    return
  }
  func.func @transform_0(%arg0: i32, %arg1: i32, %arg2: i32) -> (i32, i32) {
    %c0_i32 = arith.constant 0 : i32
    return %arg0, %arg2 : i32, i32
  }
  func.func @transform_1(%arg0: i32, %arg1: i32, %arg2: i32) -> (i32, i32) {
    %c0_i32 = arith.constant 0 : i32
    return %arg2, %arg1 : i32, i32
  }
  func.func @transform_2(%arg0: i32, %arg1: i32, %arg2: i32) -> (i32, i32) {
    %c0_i32 = arith.constant 0 : i32
    %c0_i32_0 = arith.constant 0 : i32
    return %c0_i32, %arg1 : i32, i32
  }
  func.func @transform_3(%arg0: i32, %arg1: i32, %arg2: i32) -> (i32, i32) {
    %c0_i32 = arith.constant 0 : i32
    return %arg0, %arg1 : i32, i32
  }
}

module attributes {stable_mosaic.version = 11 : i64} {
  func.func @_mm_kernel(%arg0: i32, %arg1: i32, %arg2: i32, %arg3: memref<64x128xf32, #tpu.memory_space<vmem>>, %arg4: memref<128x384xbf16, #tpu.memory_space<vmem>>, %arg5: memref<1x128xf32, #tpu.memory_space<vmem>>, %arg6: memref<1x128xf32, #tpu.memory_space<vmem>>, %arg7: memref<1x384xf32, #tpu.memory_space<vmem>>, %arg8: memref<64x384xbf16, #tpu.memory_space<vmem>>, %arg9: memref<64x384xf32, #tpu.memory_space<vmem>>) attributes {dimension_semantics = [#tpu.dimension_semantics<parallel>, #tpu.dimension_semantics<parallel>, #tpu.dimension_semantics<arbitrary>], iteration_bounds = array<i64: 1, 1, 1>, scalar_prefetch = 0 : i64, scratch_operands = 1 : i64, tpu.core_type = #tpu.core_type<tc>, window_params = [{transform_indices = @transform_0, window_bounds = array<i64: 64, 128>}, {transform_indices = @transform_1, window_bounds = array<i64: 128, 384>}, {transform_indices = @transform_2, window_bounds = array<i64: 1, 128>}, {transform_indices = @transform_3, window_bounds = array<i64: 1, 128>}, {transform_indices = @transform_4, window_bounds = array<i64: 1, 384>}, {transform_indices = @transform_5, window_bounds = array<i64: 64, 384>}]} {
    %c0_i32 = arith.constant 0 : i32
    %0 = arith.cmpi eq, %arg2, %c0_i32 : i32
    %1 = arith.extui %0 : i1 to i32
    %c0_i32_0 = arith.constant 0 : i32
    %2 = arith.cmpi ne, %1, %c0_i32_0 : i32
    scf.if %2 {
      %cst_20 = arith.constant 0.000000e+00 : f32
      %39 = vector.broadcast %cst_20 : f32 to vector<64x384xf32>
      %c0_21 = arith.constant 0 : index
      %c0_22 = arith.constant 0 : index
      %40 = vector.load %arg9[%c0_21, %c0_22] : memref<64x384xf32, #tpu.memory_space<vmem>>, vector<64x384xf32>
      tpu.vector_store %arg9[%c0_21, %c0_22], %39 {strides = array<i32>} : memref<64x384xf32, #tpu.memory_space<vmem>>, vector<64x384xf32>,
    } else {
    }
    %c0 = arith.constant 0 : index
    %c0_1 = arith.constant 0 : index
    %3 = vector.load %arg3[%c0, %c0_1] : memref<64x128xf32, #tpu.memory_space<vmem>>, vector<64x128xf32>
    %cst = arith.constant dense<0.000000e+00> : vector<64xf32>
    %4 = vector.multi_reduction <add>, %3, %cst [1] : vector<64x128xf32> to vector<64xf32>
    %5 = vector.shape_cast %4 : vector<64xf32> to vector<64x1xf32>
    %cst_2 = arith.constant 7.812500e-03 : f32
    %6 = vector.broadcast %cst_2 : f32 to vector<64x1xf32>
    %7 = arith.mulf %5, %6 : vector<64x1xf32>
    %8 = arith.mulf %3, %3 : vector<64x128xf32>
    %cst_3 = arith.constant dense<0.000000e+00> : vector<64xf32>
    %9 = vector.multi_reduction <add>, %8, %cst_3 [1] : vector<64x128xf32> to vector<64xf32>
    %10 = vector.shape_cast %9 : vector<64xf32> to vector<64x1xf32>
    %cst_4 = arith.constant 7.812500e-03 : f32
    %11 = vector.broadcast %cst_4 : f32 to vector<64x1xf32>
    %12 = arith.mulf %10, %11 : vector<64x1xf32>
    %13 = arith.mulf %7, %7 : vector<64x1xf32>
    %14 = arith.subf %12, %13 : vector<64x1xf32>
    %cst_5 = arith.constant 0.000000e+00 : f32
    %15 = vector.broadcast %cst_5 : f32 to vector<64x1xf32>
    %16 = arith.maximumf %14, %15 : vector<64x1xf32>
    %17 = vector.broadcast %7 : vector<64x1xf32> to vector<64x128xf32>
    %18 = arith.subf %3, %17 : vector<64x128xf32>
    %cst_6 = arith.constant 9.99999974E-6 : f32
    %19 = vector.broadcast %cst_6 : f32 to vector<64x1xf32>
    %20 = arith.addf %16, %19 : vector<64x1xf32>
    %21 = math.rsqrt %20 : vector<64x1xf32>
    %22 = vector.broadcast %21 : vector<64x1xf32> to vector<64x128xf32>
    %23 = arith.mulf %18, %22 : vector<64x128xf32>
    %c0_7 = arith.constant 0 : index
    %c0_8 = arith.constant 0 : index
    %24 = vector.load %arg5[%c0_7, %c0_8] : memref<1x128xf32, #tpu.memory_space<vmem>>, vector<1x128xf32>
    %25 = vector.broadcast %24 : vector<1x128xf32> to vector<64x128xf32>
    %26 = arith.mulf %23, %25 : vector<64x128xf32>
    %c0_9 = arith.constant 0 : index
    %c0_10 = arith.constant 0 : index
    %27 = vector.load %arg6[%c0_9, %c0_10] : memref<1x128xf32, #tpu.memory_space<vmem>>, vector<1x128xf32>
    %28 = vector.broadcast %27 : vector<1x128xf32> to vector<64x128xf32>
    %29 = arith.addf %26, %28 : vector<64x128xf32>
    %30 = arith.truncf %29 : vector<64x128xf32> to vector<64x128xbf16>
    %c0_11 = arith.constant 0 : index
    %c0_12 = arith.constant 0 : index
    %31 = vector.load %arg9[%c0_11, %c0_12] : memref<64x384xf32, #tpu.memory_space<vmem>>, vector<64x384xf32>
    %c0_13 = arith.constant 0 : index
    %c0_14 = arith.constant 0 : index
    %32 = vector.load %arg4[%c0_13, %c0_14] : memref<128x384xbf16, #tpu.memory_space<vmem>>, vector<128x384xbf16>
    %cst_15 = arith.constant dense<0.000000e+00> : vector<64x384xf32>
    %33 = tpu.matmul %30, %32, %cst_15 {dimension_numbers = #tpu.dot_dimension_numbers<[1], [0], [0], [1], [0, 0, 1, 1], [], []>} : vector<64x128xbf16>, vector<128x384xbf16>, vector<64x384xf32> -> vector<64x384xf32>
    %34 = arith.addf %31, %33 : vector<64x384xf32>
    %c0_16 = arith.constant 0 : index
    %c0_17 = arith.constant 0 : index
    %35 = vector.load %arg9[%c0_16, %c0_17] : memref<64x384xf32, #tpu.memory_space<vmem>>, vector<64x384xf32>
    tpu.vector_store %arg9[%c0_16, %c0_17], %34 {strides = array<i32>} : memref<64x384xf32, #tpu.memory_space<vmem>>, vector<64x384xf32>,
    %c0_i32_18 = arith.constant 0 : i32
    %36 = arith.cmpi eq, %arg2, %c0_i32_18 : i32
    %37 = arith.extui %36 : i1 to i32
    %c0_i32_19 = arith.constant 0 : i32
    %38 = arith.cmpi ne, %37, %c0_i32_19 : i32
    scf.if %38 {
      %c0_20 = arith.constant 0 : index
      %c0_21 = arith.constant 0 : index
      %39 = vector.load %arg9[%c0_20, %c0_21] : memref<64x384xf32, #tpu.memory_space<vmem>>, vector<64x384xf32>
      %c0_22 = arith.constant 0 : index
      %c0_23 = arith.constant 0 : index
      %40 = vector.load %arg7[%c0_22, %c0_23] : memref<1x384xf32, #tpu.memory_space<vmem>>, vector<1x384xf32>
      %41 = vector.broadcast %40 : vector<1x384xf32> to vector<64x384xf32>
      %42 = arith.addf %39, %41 : vector<64x384xf32>
      %43 = arith.truncf %42 : vector<64x384xf32> to vector<64x384xbf16>
      %c0_24 = arith.constant 0 : index
      %c0_25 = arith.constant 0 : index
      %44 = vector.load %arg8[%c0_24, %c0_25] : memref<64x384xbf16, #tpu.memory_space<vmem>>, vector<64x384xbf16>
      tpu.vector_store %arg8[%c0_24, %c0_25], %43 {strides = array<i32>} : memref<64x384xbf16, #tpu.memory_space<vmem>>, vector<64x384xbf16>,
    } else {
    }
    return
  }
  func.func @transform_0(%arg0: i32, %arg1: i32, %arg2: i32) -> (i32, i32) {
    %c0_i32 = arith.constant 0 : i32
    return %arg0, %arg2 : i32, i32
  }
  func.func @transform_1(%arg0: i32, %arg1: i32, %arg2: i32) -> (i32, i32) {
    %c0_i32 = arith.constant 0 : i32
    return %arg2, %arg1 : i32, i32
  }
  func.func @transform_2(%arg0: i32, %arg1: i32, %arg2: i32) -> (i32, i32) {
    %c0_i32 = arith.constant 0 : i32
    %c0_i32_0 = arith.constant 0 : i32
    return %c0_i32, %arg2 : i32, i32
  }
  func.func @transform_3(%arg0: i32, %arg1: i32, %arg2: i32) -> (i32, i32) {
    %c0_i32 = arith.constant 0 : i32
    %c0_i32_0 = arith.constant 0 : i32
    return %c0_i32, %arg2 : i32, i32
  }
  func.func @transform_4(%arg0: i32, %arg1: i32, %arg2: i32) -> (i32, i32) {
    %c0_i32 = arith.constant 0 : i32
    %c0_i32_0 = arith.constant 0 : i32
    return %c0_i32, %arg1 : i32, i32
  }
  func.func @transform_5(%arg0: i32, %arg1: i32, %arg2: i32) -> (i32, i32) {
    %c0_i32 = arith.constant 0 : i32
    return %arg0, %arg1 : i32, i32
  }
}

module attributes {stable_mosaic.version = 11 : i64} {
  func.func @_flash_attn_kernel(%arg0: i32, %arg1: i32, %arg2: i32, %arg3: memref<1x32x128xbf16, #tpu.memory_space<vmem>>, %arg4: memref<1x32x128xbf16, #tpu.memory_space<vmem>>, %arg5: memref<1x32x128xbf16, #tpu.memory_space<vmem>>, %arg6: memref<1x32x128xbf16, #tpu.memory_space<vmem>>, %arg7: memref<4x32x1xf32, #tpu.memory_space<vmem>>, %arg8: memref<4x32x1xf32, #tpu.memory_space<vmem>>, %arg9: memref<4x32x32xf32, #tpu.memory_space<vmem>>) attributes {dimension_semantics = [#tpu.dimension_semantics<parallel>, #tpu.dimension_semantics<parallel>, #tpu.dimension_semantics<arbitrary>], iteration_bounds = array<i64: 2, 1, 1>, scalar_prefetch = 0 : i64, scratch_operands = 3 : i64, tpu.core_type = #tpu.core_type<tc>, window_params = [{transform_indices = @transform_0, window_bounds = array<i64: 1, 32, 128>}, {transform_indices = @transform_1, window_bounds = array<i64: 1, 32, 128>}, {transform_indices = @transform_2, window_bounds = array<i64: 1, 32, 128>}, {transform_indices = @transform_3, window_bounds = array<i64: 1, 32, 128>}]} {
    %c0_i32 = arith.constant 0 : i32
    %0 = arith.cmpi eq, %arg2, %c0_i32 : i32
    %1 = arith.extui %0 : i1 to i32
    %c0_i32_0 = arith.constant 0 : i32
    %2 = arith.cmpi ne, %1, %c0_i32_0 : i32
    scf.if %2 {
      %cst_59 = arith.constant 0xFF800000 : f32
      %90 = vector.broadcast %cst_59 : f32 to vector<4x32x1xf32>
      %c0_60 = arith.constant 0 : index
      %c0_61 = arith.constant 0 : index
      %c0_62 = arith.constant 0 : index
      %91 = vector.load %arg7[%c0_60, %c0_61, %c0_62] : memref<4x32x1xf32, #tpu.memory_space<vmem>>, vector<4x32x1xf32>
      tpu.vector_store %arg7[%c0_60, %c0_61, %c0_62], %90 {strides = array<i32>} : memref<4x32x1xf32, #tpu.memory_space<vmem>>, vector<4x32x1xf32>,
      %cst_63 = arith.constant 0.000000e+00 : f32
      %92 = vector.broadcast %cst_63 : f32 to vector<4x32x1xf32>
      %c0_64 = arith.constant 0 : index
      %c0_65 = arith.constant 0 : index
      %c0_66 = arith.constant 0 : index
      %93 = vector.load %arg8[%c0_64, %c0_65, %c0_66] : memref<4x32x1xf32, #tpu.memory_space<vmem>>, vector<4x32x1xf32>
      tpu.vector_store %arg8[%c0_64, %c0_65, %c0_66], %92 {strides = array<i32>} : memref<4x32x1xf32, #tpu.memory_space<vmem>>, vector<4x32x1xf32>,
      %cst_67 = arith.constant 0.000000e+00 : f32
      %94 = vector.broadcast %cst_67 : f32 to vector<4x32x32xf32>
      %c0_68 = arith.constant 0 : index
      %c0_69 = arith.constant 0 : index
      %c0_70 = arith.constant 0 : index
      %95 = vector.load %arg9[%c0_68, %c0_69, %c0_70] : memref<4x32x32xf32, #tpu.memory_space<vmem>>, vector<4x32x32xf32>
      tpu.vector_store %arg9[%c0_68, %c0_69, %c0_70], %94 {strides = array<i32>} : memref<4x32x32xf32, #tpu.memory_space<vmem>>, vector<4x32x32xf32>,
    } else {
    }
    %c0 = arith.constant 0 : index
    %c0_1 = arith.constant 0 : index
    %c0_2 = arith.constant 0 : index
    %3 = vector.load %arg3[%c0, %c0_1, %c0_2] : memref<1x32x128xbf16, #tpu.memory_space<vmem>>, vector<1x32x128xbf16>
    %4 = vector.shape_cast %3 : vector<1x32x128xbf16> to vector<32x128xbf16>
    %c0_3 = arith.constant 0 : index
    %c0_4 = arith.constant 0 : index
    %c0_5 = arith.constant 0 : index
    %5 = vector.load %arg4[%c0_3, %c0_4, %c0_5] : memref<1x32x128xbf16, #tpu.memory_space<vmem>>, vector<1x32x128xbf16>
    %6 = vector.shape_cast %5 : vector<1x32x128xbf16> to vector<32x128xbf16>
    %c0_6 = arith.constant 0 : index
    %c0_7 = arith.constant 0 : index
    %c0_8 = arith.constant 0 : index
    %7 = vector.load %arg5[%c0_6, %c0_7, %c0_8] : memref<1x32x128xbf16, #tpu.memory_space<vmem>>, vector<1x32x128xbf16>
    %8 = vector.shape_cast %7 : vector<1x32x128xbf16> to vector<32x128xbf16>
    %9 = vector.extract_strided_slice %4 {offsets = [0, 0], sizes = [32, 32], strides = [1, 1]} : vector<32x128xbf16> to vector<32x32xbf16>
    %10 = vector.extract_strided_slice %6 {offsets = [0, 0], sizes = [32, 32], strides = [1, 1]} : vector<32x128xbf16> to vector<32x32xbf16>
    %cst = arith.constant dense<0.000000e+00> : vector<32x32xf32>
    %11 = tpu.matmul %9, %10, %cst {dimension_numbers = #tpu.dot_dimension_numbers<[1], [1], [0], [0], [0, 0, 1, 0], [], []>} : vector<32x32xbf16>, vector<32x32xbf16>, vector<32x32xf32> -> vector<32x32xf32>
    %12 = vector.extract_strided_slice %4 {offsets = [0, 32], sizes = [32, 32], strides = [1, 1]} : vector<32x128xbf16> to vector<32x32xbf16>
    %13 = vector.extract_strided_slice %6 {offsets = [0, 32], sizes = [32, 32], strides = [1, 1]} : vector<32x128xbf16> to vector<32x32xbf16>
    %cst_9 = arith.constant dense<0.000000e+00> : vector<32x32xf32>
    %14 = tpu.matmul %12, %13, %cst_9 {dimension_numbers = #tpu.dot_dimension_numbers<[1], [1], [0], [0], [0, 0, 1, 0], [], []>} : vector<32x32xbf16>, vector<32x32xbf16>, vector<32x32xf32> -> vector<32x32xf32>
    %15 = vector.extract_strided_slice %4 {offsets = [0, 64], sizes = [32, 32], strides = [1, 1]} : vector<32x128xbf16> to vector<32x32xbf16>
    %16 = vector.extract_strided_slice %6 {offsets = [0, 64], sizes = [32, 32], strides = [1, 1]} : vector<32x128xbf16> to vector<32x32xbf16>
    %cst_10 = arith.constant dense<0.000000e+00> : vector<32x32xf32>
    %17 = tpu.matmul %15, %16, %cst_10 {dimension_numbers = #tpu.dot_dimension_numbers<[1], [1], [0], [0], [0, 0, 1, 0], [], []>} : vector<32x32xbf16>, vector<32x32xbf16>, vector<32x32xf32> -> vector<32x32xf32>
    %18 = vector.extract_strided_slice %4 {offsets = [0, 96], sizes = [32, 32], strides = [1, 1]} : vector<32x128xbf16> to vector<32x32xbf16>
    %19 = vector.extract_strided_slice %6 {offsets = [0, 96], sizes = [32, 32], strides = [1, 1]} : vector<32x128xbf16> to vector<32x32xbf16>
    %cst_11 = arith.constant dense<0.000000e+00> : vector<32x32xf32>
    %20 = tpu.matmul %18, %19, %cst_11 {dimension_numbers = #tpu.dot_dimension_numbers<[1], [1], [0], [0], [0, 0, 1, 0], [], []>} : vector<32x32xbf16>, vector<32x32xbf16>, vector<32x32xf32> -> vector<32x32xf32>
    %21 = vector.shape_cast %11 : vector<32x32xf32> to vector<1x32x32xf32>
    %22 = vector.shape_cast %14 : vector<32x32xf32> to vector<1x32x32xf32>
    %23 = vector.shape_cast %17 : vector<32x32xf32> to vector<1x32x32xf32>
    %24 = vector.shape_cast %20 : vector<32x32xf32> to vector<1x32x32xf32>
    %25 = tpu.concatenate %21, %22, %23, %24 in 0 : vector<1x32x32xf32>, vector<1x32x32xf32>, vector<1x32x32xf32>, vector<1x32x32xf32> -> vector<4x32x32xf32>
    %c0_12 = arith.constant 0 : index
    %c0_13 = arith.constant 0 : index
    %c0_14 = arith.constant 0 : index
    %26 = vector.load %arg7[%c0_12, %c0_13, %c0_14] : memref<4x32x1xf32, #tpu.memory_space<vmem>>, vector<4x32x1xf32>
    %cst_15 = arith.constant dense<0xFF800000> : vector<4x32xf32>
    %27 = vector.multi_reduction <maximumf>, %25, %cst_15 [2] : vector<4x32x32xf32> to vector<4x32xf32>
    %28 = vector.shape_cast %27 : vector<4x32xf32> to vector<4x32x1xf32>
    %29 = arith.maximumf %26, %28 : vector<4x32x1xf32>
    %30 = arith.subf %26, %29 : vector<4x32x1xf32>
    %31 = math.exp %30 : vector<4x32x1xf32>
    %32 = vector.broadcast %29 : vector<4x32x1xf32> to vector<4x32x32xf32>
    %33 = arith.subf %25, %32 : vector<4x32x32xf32>
    %34 = math.exp %33 : vector<4x32x32xf32>
    %c0_16 = arith.constant 0 : index
    %c0_17 = arith.constant 0 : index
    %c0_18 = arith.constant 0 : index
    %35 = vector.load %arg8[%c0_16, %c0_17, %c0_18] : memref<4x32x1xf32, #tpu.memory_space<vmem>>, vector<4x32x1xf32>
    %36 = arith.mulf %31, %35 : vector<4x32x1xf32>
    %cst_19 = arith.constant dense<0.000000e+00> : vector<4x32xf32>
    %37 = vector.multi_reduction <add>, %34, %cst_19 [2] : vector<4x32x32xf32> to vector<4x32xf32>
    %38 = vector.shape_cast %37 : vector<4x32xf32> to vector<4x32x1xf32>
    %39 = arith.addf %36, %38 : vector<4x32x1xf32>
    %c0_20 = arith.constant 0 : index
    %c0_21 = arith.constant 0 : index
    %c0_22 = arith.constant 0 : index
    %40 = vector.load %arg8[%c0_20, %c0_21, %c0_22] : memref<4x32x1xf32, #tpu.memory_space<vmem>>, vector<4x32x1xf32>
    tpu.vector_store %arg8[%c0_20, %c0_21, %c0_22], %39 {strides = array<i32>} : memref<4x32x1xf32, #tpu.memory_space<vmem>>, vector<4x32x1xf32>,
    %c0_23 = arith.constant 0 : index
    %c0_24 = arith.constant 0 : index
    %c0_25 = arith.constant 0 : index
    %41 = vector.load %arg7[%c0_23, %c0_24, %c0_25] : memref<4x32x1xf32, #tpu.memory_space<vmem>>, vector<4x32x1xf32>
    tpu.vector_store %arg7[%c0_23, %c0_24, %c0_25], %29 {strides = array<i32>} : memref<4x32x1xf32, #tpu.memory_space<vmem>>, vector<4x32x1xf32>,
    %c0_26 = arith.constant 0 : index
    %c0_27 = arith.constant 0 : index
    %c0_28 = arith.constant 0 : index
    %42 = vector.load %arg9[%c0_26, %c0_27, %c0_28] : memref<4x32x32xf32, #tpu.memory_space<vmem>>, vector<4x32x32xf32>
    %43 = vector.broadcast %31 : vector<4x32x1xf32> to vector<4x32x32xf32>
    %44 = arith.mulf %43, %42 : vector<4x32x32xf32>
    %c0_29 = arith.constant 0 : index
    %c0_30 = arith.constant 0 : index
    %c0_31 = arith.constant 0 : index
    %45 = vector.load %arg9[%c0_29, %c0_30, %c0_31] : memref<4x32x32xf32, #tpu.memory_space<vmem>>, vector<4x32x32xf32>
    tpu.vector_store %arg9[%c0_29, %c0_30, %c0_31], %44 {strides = array<i32>} : memref<4x32x32xf32, #tpu.memory_space<vmem>>, vector<4x32x32xf32>,
    %46 = arith.truncf %34 : vector<4x32x32xf32> to vector<4x32x32xbf16>
    %c0_32 = arith.constant 0 : index
    %c0_33 = arith.constant 0 : index
    %c0_34 = arith.constant 0 : index
    %47 = vector.load %arg9[%c0_32, %c0_33, %c0_34] : memref<4x32x32xf32, #tpu.memory_space<vmem>>, vector<1x32x32xf32>
    %48 = vector.shape_cast %47 : vector<1x32x32xf32> to vector<32x32xf32>
    %49 = vector.extract_strided_slice %46 {offsets = [0, 0, 0], sizes = [1, 32, 32], strides = [1, 1, 1]} : vector<4x32x32xbf16> to vector<1x32x32xbf16>
    %50 = vector.shape_cast %49 : vector<1x32x32xbf16> to vector<32x32xbf16>
    %51 = vector.extract_strided_slice %8 {offsets = [0, 0], sizes = [32, 32], strides = [1, 1]} : vector<32x128xbf16> to vector<32x32xbf16>
    %cst_35 = arith.constant dense<0.000000e+00> : vector<32x32xf32>
    %52 = tpu.matmul %50, %51, %cst_35 {dimension_numbers = #tpu.dot_dimension_numbers<[1], [0], [0], [1], [0, 0, 1, 1], [], []>} : vector<32x32xbf16>, vector<32x32xbf16>, vector<32x32xf32> -> vector<32x32xf32>
    %53 = arith.addf %48, %52 : vector<32x32xf32>
    %c0_36 = arith.constant 0 : index
    %c0_37 = arith.constant 0 : index
    %c0_38 = arith.constant 0 : index
    %54 = vector.load %arg9[%c0_36, %c0_37, %c0_38] : memref<4x32x32xf32, #tpu.memory_space<vmem>>, vector<1x32x32xf32>
    %55 = vector.shape_cast %54 : vector<1x32x32xf32> to vector<32x32xf32>
    %56 = vector.shape_cast %53 : vector<32x32xf32> to vector<1x32x32xf32>
    tpu.vector_store %arg9[%c0_36, %c0_37, %c0_38], %56 {strides = array<i32>} : memref<4x32x32xf32, #tpu.memory_space<vmem>>, vector<1x32x32xf32>,
    %c1 = arith.constant 1 : index
    %c0_39 = arith.constant 0 : index
    %c0_40 = arith.constant 0 : index
    %57 = vector.load %arg9[%c1, %c0_39, %c0_40] : memref<4x32x32xf32, #tpu.memory_space<vmem>>, vector<1x32x32xf32>
    %58 = vector.shape_cast %57 : vector<1x32x32xf32> to vector<32x32xf32>
    %59 = vector.extract_strided_slice %46 {offsets = [1, 0, 0], sizes = [1, 32, 32], strides = [1, 1, 1]} : vector<4x32x32xbf16> to vector<1x32x32xbf16>
    %60 = vector.shape_cast %59 : vector<1x32x32xbf16> to vector<32x32xbf16>
    %61 = vector.extract_strided_slice %8 {offsets = [0, 32], sizes = [32, 32], strides = [1, 1]} : vector<32x128xbf16> to vector<32x32xbf16>
    %cst_41 = arith.constant dense<0.000000e+00> : vector<32x32xf32>
    %62 = tpu.matmul %60, %61, %cst_41 {dimension_numbers = #tpu.dot_dimension_numbers<[1], [0], [0], [1], [0, 0, 1, 1], [], []>} : vector<32x32xbf16>, vector<32x32xbf16>, vector<32x32xf32> -> vector<32x32xf32>
    %63 = arith.addf %58, %62 : vector<32x32xf32>
    %c1_42 = arith.constant 1 : index
    %c0_43 = arith.constant 0 : index
    %c0_44 = arith.constant 0 : index
    %64 = vector.load %arg9[%c1_42, %c0_43, %c0_44] : memref<4x32x32xf32, #tpu.memory_space<vmem>>, vector<1x32x32xf32>
    %65 = vector.shape_cast %64 : vector<1x32x32xf32> to vector<32x32xf32>
    %66 = vector.shape_cast %63 : vector<32x32xf32> to vector<1x32x32xf32>
    tpu.vector_store %arg9[%c1_42, %c0_43, %c0_44], %66 {strides = array<i32>} : memref<4x32x32xf32, #tpu.memory_space<vmem>>, vector<1x32x32xf32>,
    %c2 = arith.constant 2 : index
    %c0_45 = arith.constant 0 : index
    %c0_46 = arith.constant 0 : index
    %67 = vector.load %arg9[%c2, %c0_45, %c0_46] : memref<4x32x32xf32, #tpu.memory_space<vmem>>, vector<1x32x32xf32>
    %68 = vector.shape_cast %67 : vector<1x32x32xf32> to vector<32x32xf32>
    %69 = vector.extract_strided_slice %46 {offsets = [2, 0, 0], sizes = [1, 32, 32], strides = [1, 1, 1]} : vector<4x32x32xbf16> to vector<1x32x32xbf16>
    %70 = vector.shape_cast %69 : vector<1x32x32xbf16> to vector<32x32xbf16>
    %71 = vector.extract_strided_slice %8 {offsets = [0, 64], sizes = [32, 32], strides = [1, 1]} : vector<32x128xbf16> to vector<32x32xbf16>
    %cst_47 = arith.constant dense<0.000000e+00> : vector<32x32xf32>
    %72 = tpu.matmul %70, %71, %cst_47 {dimension_numbers = #tpu.dot_dimension_numbers<[1], [0], [0], [1], [0, 0, 1, 1], [], []>} : vector<32x32xbf16>, vector<32x32xbf16>, vector<32x32xf32> -> vector<32x32xf32>
    %73 = arith.addf %68, %72 : vector<32x32xf32>
    %c2_48 = arith.constant 2 : index
    %c0_49 = arith.constant 0 : index
    %c0_50 = arith.constant 0 : index
    %74 = vector.load %arg9[%c2_48, %c0_49, %c0_50] : memref<4x32x32xf32, #tpu.memory_space<vmem>>, vector<1x32x32xf32>
    %75 = vector.shape_cast %74 : vector<1x32x32xf32> to vector<32x32xf32>
    %76 = vector.shape_cast %73 : vector<32x32xf32> to vector<1x32x32xf32>
    tpu.vector_store %arg9[%c2_48, %c0_49, %c0_50], %76 {strides = array<i32>} : memref<4x32x32xf32, #tpu.memory_space<vmem>>, vector<1x32x32xf32>,
    %c3 = arith.constant 3 : index
    %c0_51 = arith.constant 0 : index
    %c0_52 = arith.constant 0 : index
    %77 = vector.load %arg9[%c3, %c0_51, %c0_52] : memref<4x32x32xf32, #tpu.memory_space<vmem>>, vector<1x32x32xf32>
    %78 = vector.shape_cast %77 : vector<1x32x32xf32> to vector<32x32xf32>
    %79 = vector.extract_strided_slice %46 {offsets = [3, 0, 0], sizes = [1, 32, 32], strides = [1, 1, 1]} : vector<4x32x32xbf16> to vector<1x32x32xbf16>
    %80 = vector.shape_cast %79 : vector<1x32x32xbf16> to vector<32x32xbf16>
    %81 = vector.extract_strided_slice %8 {offsets = [0, 96], sizes = [32, 32], strides = [1, 1]} : vector<32x128xbf16> to vector<32x32xbf16>
    %cst_53 = arith.constant dense<0.000000e+00> : vector<32x32xf32>
    %82 = tpu.matmul %80, %81, %cst_53 {dimension_numbers = #tpu.dot_dimension_numbers<[1], [0], [0], [1], [0, 0, 1, 1], [], []>} : vector<32x32xbf16>, vector<32x32xbf16>, vector<32x32xf32> -> vector<32x32xf32>
    %83 = arith.addf %78, %82 : vector<32x32xf32>
    %c3_54 = arith.constant 3 : index
    %c0_55 = arith.constant 0 : index
    %c0_56 = arith.constant 0 : index
    %84 = vector.load %arg9[%c3_54, %c0_55, %c0_56] : memref<4x32x32xf32, #tpu.memory_space<vmem>>, vector<1x32x32xf32>
    %85 = vector.shape_cast %84 : vector<1x32x32xf32> to vector<32x32xf32>
    %86 = vector.shape_cast %83 : vector<32x32xf32> to vector<1x32x32xf32>
    tpu.vector_store %arg9[%c3_54, %c0_55, %c0_56], %86 {strides = array<i32>} : memref<4x32x32xf32, #tpu.memory_space<vmem>>, vector<1x32x32xf32>,
    %c0_i32_57 = arith.constant 0 : i32
    %87 = arith.cmpi eq, %arg2, %c0_i32_57 : i32
    %88 = arith.extui %87 : i1 to i32
    %c0_i32_58 = arith.constant 0 : i32
    %89 = arith.cmpi ne, %88, %c0_i32_58 : i32
    scf.if %89 {
      %c0_59 = arith.constant 0 : index
      %c0_60 = arith.constant 0 : index
      %c0_61 = arith.constant 0 : index
      %90 = vector.load %arg8[%c0_59, %c0_60, %c0_61] : memref<4x32x1xf32, #tpu.memory_space<vmem>>, vector<4x32x1xf32>
      %91 = tpu.reciprocal %90 {approx = true} : vector<4x32x1xf32> -> vector<4x32x1xf32>
      %c0_62 = arith.constant 0 : index
      %c0_63 = arith.constant 0 : index
      %c0_64 = arith.constant 0 : index
      %92 = vector.load %arg9[%c0_62, %c0_63, %c0_64] : memref<4x32x32xf32, #tpu.memory_space<vmem>>, vector<1x32x32xf32>
      %93 = vector.shape_cast %92 : vector<1x32x32xf32> to vector<32x32xf32>
      %94 = vector.extract_strided_slice %91 {offsets = [0, 0, 0], sizes = [1, 32, 1], strides = [1, 1, 1]} : vector<4x32x1xf32> to vector<1x32x1xf32>
      %95 = vector.shape_cast %94 : vector<1x32x1xf32> to vector<32x1xf32>
      %96 = vector.broadcast %95 : vector<32x1xf32> to vector<32x32xf32>
      %97 = arith.mulf %93, %96 : vector<32x32xf32>
      %98 = arith.truncf %97 : vector<32x32xf32> to vector<32x32xbf16>
      %c0_65 = arith.constant 0 : index
      %c0_66 = arith.constant 0 : index
      %c0_67 = arith.constant 0 : index
      %99 = vector.load %arg6[%c0_65, %c0_66, %c0_67] : memref<1x32x128xbf16, #tpu.memory_space<vmem>>, vector<1x32x32xbf16>
      %100 = vector.shape_cast %99 : vector<1x32x32xbf16> to vector<32x32xbf16>
      %101 = vector.shape_cast %98 : vector<32x32xbf16> to vector<1x32x32xbf16>
      tpu.vector_store %arg6[%c0_65, %c0_66, %c0_67], %101 {strides = array<i32>} : memref<1x32x128xbf16, #tpu.memory_space<vmem>>, vector<1x32x32xbf16>,
      %c1_68 = arith.constant 1 : index
      %c0_69 = arith.constant 0 : index
      %c0_70 = arith.constant 0 : index
      %102 = vector.load %arg9[%c1_68, %c0_69, %c0_70] : memref<4x32x32xf32, #tpu.memory_space<vmem>>, vector<1x32x32xf32>
      %103 = vector.shape_cast %102 : vector<1x32x32xf32> to vector<32x32xf32>
      %104 = vector.extract_strided_slice %91 {offsets = [1, 0, 0], sizes = [1, 32, 1], strides = [1, 1, 1]} : vector<4x32x1xf32> to vector<1x32x1xf32>
      %105 = vector.shape_cast %104 : vector<1x32x1xf32> to vector<32x1xf32>
      %106 = vector.broadcast %105 : vector<32x1xf32> to vector<32x32xf32>
      %107 = arith.mulf %103, %106 : vector<32x32xf32>
      %108 = arith.truncf %107 : vector<32x32xf32> to vector<32x32xbf16>
      %c0_71 = arith.constant 0 : index
      %c0_72 = arith.constant 0 : index
      %c32 = arith.constant 32 : index
      %109 = vector.load %arg6[%c0_71, %c0_72, %c32] : memref<1x32x128xbf16, #tpu.memory_space<vmem>>, vector<1x32x32xbf16>
      %110 = vector.shape_cast %109 : vector<1x32x32xbf16> to vector<32x32xbf16>
      %111 = vector.shape_cast %108 : vector<32x32xbf16> to vector<1x32x32xbf16>
      tpu.vector_store %arg6[%c0_71, %c0_72, %c32], %111 {strides = array<i32>} : memref<1x32x128xbf16, #tpu.memory_space<vmem>>, vector<1x32x32xbf16>,
      %c2_73 = arith.constant 2 : index
      %c0_74 = arith.constant 0 : index
      %c0_75 = arith.constant 0 : index
      %112 = vector.load %arg9[%c2_73, %c0_74, %c0_75] : memref<4x32x32xf32, #tpu.memory_space<vmem>>, vector<1x32x32xf32>
      %113 = vector.shape_cast %112 : vector<1x32x32xf32> to vector<32x32xf32>
      %114 = vector.extract_strided_slice %91 {offsets = [2, 0, 0], sizes = [1, 32, 1], strides = [1, 1, 1]} : vector<4x32x1xf32> to vector<1x32x1xf32>
      %115 = vector.shape_cast %114 : vector<1x32x1xf32> to vector<32x1xf32>
      %116 = vector.broadcast %115 : vector<32x1xf32> to vector<32x32xf32>
      %117 = arith.mulf %113, %116 : vector<32x32xf32>
      %118 = arith.truncf %117 : vector<32x32xf32> to vector<32x32xbf16>
      %c0_76 = arith.constant 0 : index
      %c0_77 = arith.constant 0 : index
      %c64 = arith.constant 64 : index
      %119 = vector.load %arg6[%c0_76, %c0_77, %c64] : memref<1x32x128xbf16, #tpu.memory_space<vmem>>, vector<1x32x32xbf16>
      %120 = vector.shape_cast %119 : vector<1x32x32xbf16> to vector<32x32xbf16>
      %121 = vector.shape_cast %118 : vector<32x32xbf16> to vector<1x32x32xbf16>
      tpu.vector_store %arg6[%c0_76, %c0_77, %c64], %121 {strides = array<i32>} : memref<1x32x128xbf16, #tpu.memory_space<vmem>>, vector<1x32x32xbf16>,
      %c3_78 = arith.constant 3 : index
      %c0_79 = arith.constant 0 : index
      %c0_80 = arith.constant 0 : index
      %122 = vector.load %arg9[%c3_78, %c0_79, %c0_80] : memref<4x32x32xf32, #tpu.memory_space<vmem>>, vector<1x32x32xf32>
      %123 = vector.shape_cast %122 : vector<1x32x32xf32> to vector<32x32xf32>
      %124 = vector.extract_strided_slice %91 {offsets = [3, 0, 0], sizes = [1, 32, 1], strides = [1, 1, 1]} : vector<4x32x1xf32> to vector<1x32x1xf32>
      %125 = vector.shape_cast %124 : vector<1x32x1xf32> to vector<32x1xf32>
      %126 = vector.broadcast %125 : vector<32x1xf32> to vector<32x32xf32>
      %127 = arith.mulf %123, %126 : vector<32x32xf32>
      %128 = arith.truncf %127 : vector<32x32xf32> to vector<32x32xbf16>
      %c0_81 = arith.constant 0 : index
      %c0_82 = arith.constant 0 : index
      %c96 = arith.constant 96 : index
      %129 = vector.load %arg6[%c0_81, %c0_82, %c96] : memref<1x32x128xbf16, #tpu.memory_space<vmem>>, vector<1x32x32xbf16>
      %130 = vector.shape_cast %129 : vector<1x32x32xbf16> to vector<32x32xbf16>
      %131 = vector.shape_cast %128 : vector<32x32xbf16> to vector<1x32x32xbf16>
      tpu.vector_store %arg6[%c0_81, %c0_82, %c96], %131 {strides = array<i32>} : memref<1x32x128xbf16, #tpu.memory_space<vmem>>, vector<1x32x32xbf16>,
    } else {
    }
    return
  }
  func.func @transform_0(%arg0: i32, %arg1: i32, %arg2: i32) -> (i32, i32, i32) {
    %c0_i32 = arith.constant 0 : i32
    %c0_i32_0 = arith.constant 0 : i32
    return %arg0, %arg1, %c0_i32 : i32, i32, i32
  }
  func.func @transform_1(%arg0: i32, %arg1: i32, %arg2: i32) -> (i32, i32, i32) {
    %c1_i32 = arith.constant 1 : i32
    %c0_i32 = arith.constant 0 : i32
    return %arg0, %arg2, %c1_i32 : i32, i32, i32
  }
  func.func @transform_2(%arg0: i32, %arg1: i32, %arg2: i32) -> (i32, i32, i32) {
    %c2_i32 = arith.constant 2 : i32
    %c0_i32 = arith.constant 0 : i32
    return %arg0, %arg2, %c2_i32 : i32, i32, i32
  }
  func.func @transform_3(%arg0: i32, %arg1: i32, %arg2: i32) -> (i32, i32, i32) {
    %c0_i32 = arith.constant 0 : i32
    %c0_i32_0 = arith.constant 0 : i32
    return %arg0, %arg1, %c0_i32 : i32, i32, i32
  }
}

module attributes {stable_mosaic.version = 11 : i64} {
  func.func @_mm_kernel(%arg0: i32, %arg1: i32, %arg2: i32, %arg3: memref<64x128xbf16, #tpu.memory_space<vmem>>, %arg4: memref<128x128xbf16, #tpu.memory_space<vmem>>, %arg5: memref<1x128xf32, #tpu.memory_space<vmem>>, %arg6: memref<64x128xf32, #tpu.memory_space<vmem>>, %arg7: memref<64x128xf32, #tpu.memory_space<vmem>>, %arg8: memref<64x128xf32, #tpu.memory_space<vmem>>) attributes {dimension_semantics = [#tpu.dimension_semantics<parallel>, #tpu.dimension_semantics<parallel>, #tpu.dimension_semantics<arbitrary>], iteration_bounds = array<i64: 1, 1, 1>, scalar_prefetch = 0 : i64, scratch_operands = 1 : i64, tpu.core_type = #tpu.core_type<tc>, window_params = [{transform_indices = @transform_0, window_bounds = array<i64: 64, 128>}, {transform_indices = @transform_1, window_bounds = array<i64: 128, 128>}, {transform_indices = @transform_2, window_bounds = array<i64: 1, 128>}, {transform_indices = @transform_3, window_bounds = array<i64: 64, 128>}, {transform_indices = @transform_4, window_bounds = array<i64: 64, 128>}]} {
    %c0_i32 = arith.constant 0 : i32
    %0 = arith.cmpi eq, %arg2, %c0_i32 : i32
    %1 = arith.extui %0 : i1 to i32
    %c0_i32_0 = arith.constant 0 : i32
    %2 = arith.cmpi ne, %1, %c0_i32_0 : i32
    scf.if %2 {
      %cst_10 = arith.constant 0.000000e+00 : f32
      %12 = vector.broadcast %cst_10 : f32 to vector<64x128xf32>
      %c0_11 = arith.constant 0 : index
      %c0_12 = arith.constant 0 : index
      %13 = vector.load %arg8[%c0_11, %c0_12] : memref<64x128xf32, #tpu.memory_space<vmem>>, vector<64x128xf32>
      tpu.vector_store %arg8[%c0_11, %c0_12], %12 {strides = array<i32>} : memref<64x128xf32, #tpu.memory_space<vmem>>, vector<64x128xf32>,
    } else {
    }
    %c0 = arith.constant 0 : index
    %c0_1 = arith.constant 0 : index
    %3 = vector.load %arg3[%c0, %c0_1] : memref<64x128xbf16, #tpu.memory_space<vmem>>, vector<64x128xbf16>
    %c0_2 = arith.constant 0 : index
    %c0_3 = arith.constant 0 : index
    %4 = vector.load %arg8[%c0_2, %c0_3] : memref<64x128xf32, #tpu.memory_space<vmem>>, vector<64x128xf32>
    %c0_4 = arith.constant 0 : index
    %c0_5 = arith.constant 0 : index
    %5 = vector.load %arg4[%c0_4, %c0_5] : memref<128x128xbf16, #tpu.memory_space<vmem>>, vector<128x128xbf16>
    %cst = arith.constant dense<0.000000e+00> : vector<64x128xf32>
    %6 = tpu.matmul %3, %5, %cst {dimension_numbers = #tpu.dot_dimension_numbers<[1], [0], [0], [1], [0, 0, 1, 1], [], []>} : vector<64x128xbf16>, vector<128x128xbf16>, vector<64x128xf32> -> vector<64x128xf32>
    %7 = arith.addf %4, %6 : vector<64x128xf32>
    %c0_6 = arith.constant 0 : index
    %c0_7 = arith.constant 0 : index
    %8 = vector.load %arg8[%c0_6, %c0_7] : memref<64x128xf32, #tpu.memory_space<vmem>>, vector<64x128xf32>
    tpu.vector_store %arg8[%c0_6, %c0_7], %7 {strides = array<i32>} : memref<64x128xf32, #tpu.memory_space<vmem>>, vector<64x128xf32>,
    %c0_i32_8 = arith.constant 0 : i32
    %9 = arith.cmpi eq, %arg2, %c0_i32_8 : i32
    %10 = arith.extui %9 : i1 to i32
    %c0_i32_9 = arith.constant 0 : i32
    %11 = arith.cmpi ne, %10, %c0_i32_9 : i32
    scf.if %11 {
      %c0_10 = arith.constant 0 : index
      %c0_11 = arith.constant 0 : index
      %12 = vector.load %arg8[%c0_10, %c0_11] : memref<64x128xf32, #tpu.memory_space<vmem>>, vector<64x128xf32>
      %c0_12 = arith.constant 0 : index
      %c0_13 = arith.constant 0 : index
      %13 = vector.load %arg5[%c0_12, %c0_13] : memref<1x128xf32, #tpu.memory_space<vmem>>, vector<1x128xf32>
      %14 = vector.broadcast %13 : vector<1x128xf32> to vector<64x128xf32>
      %15 = arith.addf %12, %14 : vector<64x128xf32>
      %c0_14 = arith.constant 0 : index
      %c0_15 = arith.constant 0 : index
      %16 = vector.load %arg6[%c0_14, %c0_15] : memref<64x128xf32, #tpu.memory_space<vmem>>, vector<64x128xf32>
      %17 = arith.addf %15, %16 : vector<64x128xf32>
      %c0_16 = arith.constant 0 : index
      %c0_17 = arith.constant 0 : index
      %18 = vector.load %arg7[%c0_16, %c0_17] : memref<64x128xf32, #tpu.memory_space<vmem>>, vector<64x128xf32>
      tpu.vector_store %arg7[%c0_16, %c0_17], %17 {strides = array<i32>} : memref<64x128xf32, #tpu.memory_space<vmem>>, vector<64x128xf32>,
    } else {
    }
    return
  }
  func.func @transform_0(%arg0: i32, %arg1: i32, %arg2: i32) -> (i32, i32) {
    %c0_i32 = arith.constant 0 : i32
    return %arg0, %arg2 : i32, i32
  }
  func.func @transform_1(%arg0: i32, %arg1: i32, %arg2: i32) -> (i32, i32) {
    %c0_i32 = arith.constant 0 : i32
    return %arg2, %arg1 : i32, i32
  }
  func.func @transform_2(%arg0: i32, %arg1: i32, %arg2: i32) -> (i32, i32) {
    %c0_i32 = arith.constant 0 : i32
    %c0_i32_0 = arith.constant 0 : i32
    return %c0_i32, %arg1 : i32, i32
  }
  func.func @transform_3(%arg0: i32, %arg1: i32, %arg2: i32) -> (i32, i32) {
    %c0_i32 = arith.constant 0 : i32
    return %arg0, %arg1 : i32, i32
  }
  func.func @transform_4(%arg0: i32, %arg1: i32, %arg2: i32) -> (i32, i32) {
    %c0_i32 = arith.constant 0 : i32
    return %arg0, %arg1 : i32, i32
  }
}

module attributes {stable_mosaic.version = 11 : i64} {
  func.func @_mm_kernel(%arg0: i32, %arg1: i32, %arg2: i32, %arg3: memref<64x128xf32, #tpu.memory_space<vmem>>, %arg4: memref<128x512xbf16, #tpu.memory_space<vmem>>, %arg5: memref<1x128xf32, #tpu.memory_space<vmem>>, %arg6: memref<1x128xf32, #tpu.memory_space<vmem>>, %arg7: memref<1x512xf32, #tpu.memory_space<vmem>>, %arg8: memref<64x512xbf16, #tpu.memory_space<vmem>>, %arg9: memref<64x512xf32, #tpu.memory_space<vmem>>) attributes {dimension_semantics = [#tpu.dimension_semantics<parallel>, #tpu.dimension_semantics<parallel>, #tpu.dimension_semantics<arbitrary>], iteration_bounds = array<i64: 1, 1, 1>, scalar_prefetch = 0 : i64, scratch_operands = 1 : i64, tpu.core_type = #tpu.core_type<tc>, window_params = [{transform_indices = @transform_0, window_bounds = array<i64: 64, 128>}, {transform_indices = @transform_1, window_bounds = array<i64: 128, 512>}, {transform_indices = @transform_2, window_bounds = array<i64: 1, 128>}, {transform_indices = @transform_3, window_bounds = array<i64: 1, 128>}, {transform_indices = @transform_4, window_bounds = array<i64: 1, 512>}, {transform_indices = @transform_5, window_bounds = array<i64: 64, 512>}]} {
    %c0_i32 = arith.constant 0 : i32
    %0 = arith.cmpi eq, %arg2, %c0_i32 : i32
    %1 = arith.extui %0 : i1 to i32
    %c0_i32_0 = arith.constant 0 : i32
    %2 = arith.cmpi ne, %1, %c0_i32_0 : i32
    scf.if %2 {
      %cst_20 = arith.constant 0.000000e+00 : f32
      %39 = vector.broadcast %cst_20 : f32 to vector<64x512xf32>
      %c0_21 = arith.constant 0 : index
      %c0_22 = arith.constant 0 : index
      %40 = vector.load %arg9[%c0_21, %c0_22] : memref<64x512xf32, #tpu.memory_space<vmem>>, vector<64x512xf32>
      tpu.vector_store %arg9[%c0_21, %c0_22], %39 {strides = array<i32>} : memref<64x512xf32, #tpu.memory_space<vmem>>, vector<64x512xf32>,
    } else {
    }
    %c0 = arith.constant 0 : index
    %c0_1 = arith.constant 0 : index
    %3 = vector.load %arg3[%c0, %c0_1] : memref<64x128xf32, #tpu.memory_space<vmem>>, vector<64x128xf32>
    %cst = arith.constant dense<0.000000e+00> : vector<64xf32>
    %4 = vector.multi_reduction <add>, %3, %cst [1] : vector<64x128xf32> to vector<64xf32>
    %5 = vector.shape_cast %4 : vector<64xf32> to vector<64x1xf32>
    %cst_2 = arith.constant 7.812500e-03 : f32
    %6 = vector.broadcast %cst_2 : f32 to vector<64x1xf32>
    %7 = arith.mulf %5, %6 : vector<64x1xf32>
    %8 = arith.mulf %3, %3 : vector<64x128xf32>
    %cst_3 = arith.constant dense<0.000000e+00> : vector<64xf32>
    %9 = vector.multi_reduction <add>, %8, %cst_3 [1] : vector<64x128xf32> to vector<64xf32>
    %10 = vector.shape_cast %9 : vector<64xf32> to vector<64x1xf32>
    %cst_4 = arith.constant 7.812500e-03 : f32
    %11 = vector.broadcast %cst_4 : f32 to vector<64x1xf32>
    %12 = arith.mulf %10, %11 : vector<64x1xf32>
    %13 = arith.mulf %7, %7 : vector<64x1xf32>
    %14 = arith.subf %12, %13 : vector<64x1xf32>
    %cst_5 = arith.constant 0.000000e+00 : f32
    %15 = vector.broadcast %cst_5 : f32 to vector<64x1xf32>
    %16 = arith.maximumf %14, %15 : vector<64x1xf32>
    %17 = vector.broadcast %7 : vector<64x1xf32> to vector<64x128xf32>
    %18 = arith.subf %3, %17 : vector<64x128xf32>
    %cst_6 = arith.constant 9.99999974E-6 : f32
    %19 = vector.broadcast %cst_6 : f32 to vector<64x1xf32>
    %20 = arith.addf %16, %19 : vector<64x1xf32>
    %21 = math.rsqrt %20 : vector<64x1xf32>
    %22 = vector.broadcast %21 : vector<64x1xf32> to vector<64x128xf32>
    %23 = arith.mulf %18, %22 : vector<64x128xf32>
    %c0_7 = arith.constant 0 : index
    %c0_8 = arith.constant 0 : index
    %24 = vector.load %arg5[%c0_7, %c0_8] : memref<1x128xf32, #tpu.memory_space<vmem>>, vector<1x128xf32>
    %25 = vector.broadcast %24 : vector<1x128xf32> to vector<64x128xf32>
    %26 = arith.mulf %23, %25 : vector<64x128xf32>
    %c0_9 = arith.constant 0 : index
    %c0_10 = arith.constant 0 : index
    %27 = vector.load %arg6[%c0_9, %c0_10] : memref<1x128xf32, #tpu.memory_space<vmem>>, vector<1x128xf32>
    %28 = vector.broadcast %27 : vector<1x128xf32> to vector<64x128xf32>
    %29 = arith.addf %26, %28 : vector<64x128xf32>
    %30 = arith.truncf %29 : vector<64x128xf32> to vector<64x128xbf16>
    %c0_11 = arith.constant 0 : index
    %c0_12 = arith.constant 0 : index
    %31 = vector.load %arg9[%c0_11, %c0_12] : memref<64x512xf32, #tpu.memory_space<vmem>>, vector<64x512xf32>
    %c0_13 = arith.constant 0 : index
    %c0_14 = arith.constant 0 : index
    %32 = vector.load %arg4[%c0_13, %c0_14] : memref<128x512xbf16, #tpu.memory_space<vmem>>, vector<128x512xbf16>
    %cst_15 = arith.constant dense<0.000000e+00> : vector<64x512xf32>
    %33 = tpu.matmul %30, %32, %cst_15 {dimension_numbers = #tpu.dot_dimension_numbers<[1], [0], [0], [1], [0, 0, 1, 1], [], []>} : vector<64x128xbf16>, vector<128x512xbf16>, vector<64x512xf32> -> vector<64x512xf32>
    %34 = arith.addf %31, %33 : vector<64x512xf32>
    %c0_16 = arith.constant 0 : index
    %c0_17 = arith.constant 0 : index
    %35 = vector.load %arg9[%c0_16, %c0_17] : memref<64x512xf32, #tpu.memory_space<vmem>>, vector<64x512xf32>
    tpu.vector_store %arg9[%c0_16, %c0_17], %34 {strides = array<i32>} : memref<64x512xf32, #tpu.memory_space<vmem>>, vector<64x512xf32>,
    %c0_i32_18 = arith.constant 0 : i32
    %36 = arith.cmpi eq, %arg2, %c0_i32_18 : i32
    %37 = arith.extui %36 : i1 to i32
    %c0_i32_19 = arith.constant 0 : i32
    %38 = arith.cmpi ne, %37, %c0_i32_19 : i32
    scf.if %38 {
      %c0_20 = arith.constant 0 : index
      %c0_21 = arith.constant 0 : index
      %39 = vector.load %arg9[%c0_20, %c0_21] : memref<64x512xf32, #tpu.memory_space<vmem>>, vector<64x512xf32>
      %c0_22 = arith.constant 0 : index
      %c0_23 = arith.constant 0 : index
      %40 = vector.load %arg7[%c0_22, %c0_23] : memref<1x512xf32, #tpu.memory_space<vmem>>, vector<1x512xf32>
      %41 = vector.broadcast %40 : vector<1x512xf32> to vector<64x512xf32>
      %42 = arith.addf %39, %41 : vector<64x512xf32>
      %cst_24 = arith.constant 5.000000e-01 : f32
      %43 = vector.broadcast %cst_24 : f32 to vector<64x512xf32>
      %44 = arith.mulf %43, %42 : vector<64x512xf32>
      %cst_25 = arith.constant 4.471500e-02 : f32
      %45 = vector.broadcast %cst_25 : f32 to vector<64x512xf32>
      %46 = arith.mulf %45, %42 : vector<64x512xf32>
      %47 = arith.mulf %46, %42 : vector<64x512xf32>
      %48 = arith.mulf %47, %42 : vector<64x512xf32>
      %49 = arith.addf %42, %48 : vector<64x512xf32>
      %cst_26 = arith.constant 0.797884583 : f32
      %50 = vector.broadcast %cst_26 : f32 to vector<64x512xf32>
      %51 = arith.mulf %50, %49 : vector<64x512xf32>
      %52 = math.tanh %51 : vector<64x512xf32>
      %cst_27 = arith.constant 1.000000e+00 : f32
      %53 = vector.broadcast %cst_27 : f32 to vector<64x512xf32>
      %54 = arith.addf %53, %52 : vector<64x512xf32>
      %55 = arith.mulf %44, %54 : vector<64x512xf32>
      %56 = arith.truncf %55 : vector<64x512xf32> to vector<64x512xbf16>
      %c0_28 = arith.constant 0 : index
      %c0_29 = arith.constant 0 : index
      %57 = vector.load %arg8[%c0_28, %c0_29] : memref<64x512xbf16, #tpu.memory_space<vmem>>, vector<64x512xbf16>
      tpu.vector_store %arg8[%c0_28, %c0_29], %56 {strides = array<i32>} : memref<64x512xbf16, #tpu.memory_space<vmem>>, vector<64x512xbf16>,
    } else {
    }
    return
  }
  func.func @transform_0(%arg0: i32, %arg1: i32, %arg2: i32) -> (i32, i32) {
    %c0_i32 = arith.constant 0 : i32
    return %arg0, %arg2 : i32, i32
  }
  func.func @transform_1(%arg0: i32, %arg1: i32, %arg2: i32) -> (i32, i32) {
    %c0_i32 = arith.constant 0 : i32
    return %arg2, %arg1 : i32, i32
  }
  func.func @transform_2(%arg0: i32, %arg1: i32, %arg2: i32) -> (i32, i32) {
    %c0_i32 = arith.constant 0 : i32
    %c0_i32_0 = arith.constant 0 : i32
    return %c0_i32, %arg2 : i32, i32
  }
  func.func @transform_3(%arg0: i32, %arg1: i32, %arg2: i32) -> (i32, i32) {
    %c0_i32 = arith.constant 0 : i32
    %c0_i32_0 = arith.constant 0 : i32
    return %c0_i32, %arg2 : i32, i32
  }
  func.func @transform_4(%arg0: i32, %arg1: i32, %arg2: i32) -> (i32, i32) {
    %c0_i32 = arith.constant 0 : i32
    %c0_i32_0 = arith.constant 0 : i32
    return %c0_i32, %arg1 : i32, i32
  }
  func.func @transform_5(%arg0: i32, %arg1: i32, %arg2: i32) -> (i32, i32) {
    %c0_i32 = arith.constant 0 : i32
    return %arg0, %arg1 : i32, i32
  }
}

module attributes {stable_mosaic.version = 11 : i64} {
  func.func @_mm_kernel(%arg0: i32, %arg1: i32, %arg2: i32, %arg3: memref<64x512xbf16, #tpu.memory_space<vmem>>, %arg4: memref<512x128xbf16, #tpu.memory_space<vmem>>, %arg5: memref<1x128xf32, #tpu.memory_space<vmem>>, %arg6: memref<64x128xf32, #tpu.memory_space<vmem>>, %arg7: memref<64x128xf32, #tpu.memory_space<vmem>>, %arg8: memref<64x128xf32, #tpu.memory_space<vmem>>) attributes {dimension_semantics = [#tpu.dimension_semantics<parallel>, #tpu.dimension_semantics<parallel>, #tpu.dimension_semantics<arbitrary>], iteration_bounds = array<i64: 1, 1, 1>, scalar_prefetch = 0 : i64, scratch_operands = 1 : i64, tpu.core_type = #tpu.core_type<tc>, window_params = [{transform_indices = @transform_0, window_bounds = array<i64: 64, 512>}, {transform_indices = @transform_1, window_bounds = array<i64: 512, 128>}, {transform_indices = @transform_2, window_bounds = array<i64: 1, 128>}, {transform_indices = @transform_3, window_bounds = array<i64: 64, 128>}, {transform_indices = @transform_4, window_bounds = array<i64: 64, 128>}]} {
    %c0_i32 = arith.constant 0 : i32
    %0 = arith.cmpi eq, %arg2, %c0_i32 : i32
    %1 = arith.extui %0 : i1 to i32
    %c0_i32_0 = arith.constant 0 : i32
    %2 = arith.cmpi ne, %1, %c0_i32_0 : i32
    scf.if %2 {
      %cst_10 = arith.constant 0.000000e+00 : f32
      %12 = vector.broadcast %cst_10 : f32 to vector<64x128xf32>
      %c0_11 = arith.constant 0 : index
      %c0_12 = arith.constant 0 : index
      %13 = vector.load %arg8[%c0_11, %c0_12] : memref<64x128xf32, #tpu.memory_space<vmem>>, vector<64x128xf32>
      tpu.vector_store %arg8[%c0_11, %c0_12], %12 {strides = array<i32>} : memref<64x128xf32, #tpu.memory_space<vmem>>, vector<64x128xf32>,
    } else {
    }
    %c0 = arith.constant 0 : index
    %c0_1 = arith.constant 0 : index
    %3 = vector.load %arg3[%c0, %c0_1] : memref<64x512xbf16, #tpu.memory_space<vmem>>, vector<64x512xbf16>
    %c0_2 = arith.constant 0 : index
    %c0_3 = arith.constant 0 : index
    %4 = vector.load %arg8[%c0_2, %c0_3] : memref<64x128xf32, #tpu.memory_space<vmem>>, vector<64x128xf32>
    %c0_4 = arith.constant 0 : index
    %c0_5 = arith.constant 0 : index
    %5 = vector.load %arg4[%c0_4, %c0_5] : memref<512x128xbf16, #tpu.memory_space<vmem>>, vector<512x128xbf16>
    %cst = arith.constant dense<0.000000e+00> : vector<64x128xf32>
    %6 = tpu.matmul %3, %5, %cst {dimension_numbers = #tpu.dot_dimension_numbers<[1], [0], [0], [1], [0, 0, 1, 1], [], []>} : vector<64x512xbf16>, vector<512x128xbf16>, vector<64x128xf32> -> vector<64x128xf32>
    %7 = arith.addf %4, %6 : vector<64x128xf32>
    %c0_6 = arith.constant 0 : index
    %c0_7 = arith.constant 0 : index
    %8 = vector.load %arg8[%c0_6, %c0_7] : memref<64x128xf32, #tpu.memory_space<vmem>>, vector<64x128xf32>
    tpu.vector_store %arg8[%c0_6, %c0_7], %7 {strides = array<i32>} : memref<64x128xf32, #tpu.memory_space<vmem>>, vector<64x128xf32>,
    %c0_i32_8 = arith.constant 0 : i32
    %9 = arith.cmpi eq, %arg2, %c0_i32_8 : i32
    %10 = arith.extui %9 : i1 to i32
    %c0_i32_9 = arith.constant 0 : i32
    %11 = arith.cmpi ne, %10, %c0_i32_9 : i32
    scf.if %11 {
      %c0_10 = arith.constant 0 : index
      %c0_11 = arith.constant 0 : index
      %12 = vector.load %arg8[%c0_10, %c0_11] : memref<64x128xf32, #tpu.memory_space<vmem>>, vector<64x128xf32>
      %c0_12 = arith.constant 0 : index
      %c0_13 = arith.constant 0 : index
      %13 = vector.load %arg5[%c0_12, %c0_13] : memref<1x128xf32, #tpu.memory_space<vmem>>, vector<1x128xf32>
      %14 = vector.broadcast %13 : vector<1x128xf32> to vector<64x128xf32>
      %15 = arith.addf %12, %14 : vector<64x128xf32>
      %c0_14 = arith.constant 0 : index
      %c0_15 = arith.constant 0 : index
      %16 = vector.load %arg6[%c0_14, %c0_15] : memref<64x128xf32, #tpu.memory_space<vmem>>, vector<64x128xf32>
      %17 = arith.addf %15, %16 : vector<64x128xf32>
      %c0_16 = arith.constant 0 : index
      %c0_17 = arith.constant 0 : index
      %18 = vector.load %arg7[%c0_16, %c0_17] : memref<64x128xf32, #tpu.memory_space<vmem>>, vector<64x128xf32>
      tpu.vector_store %arg7[%c0_16, %c0_17], %17 {strides = array<i32>} : memref<64x128xf32, #tpu.memory_space<vmem>>, vector<64x128xf32>,
    } else {
    }
    return
  }
  func.func @transform_0(%arg0: i32, %arg1: i32, %arg2: i32) -> (i32, i32) {
    %c0_i32 = arith.constant 0 : i32
    return %arg0, %arg2 : i32, i32
  }
  func.func @transform_1(%arg0: i32, %arg1: i32, %arg2: i32) -> (i32, i32) {
    %c0_i32 = arith.constant 0 : i32
    return %arg2, %arg1 : i32, i32
  }
  func.func @transform_2(%arg0: i32, %arg1: i32, %arg2: i32) -> (i32, i32) {
    %c0_i32 = arith.constant 0 : i32
    %c0_i32_0 = arith.constant 0 : i32
    return %c0_i32, %arg1 : i32, i32
  }
  func.func @transform_3(%arg0: i32, %arg1: i32, %arg2: i32) -> (i32, i32) {
    %c0_i32 = arith.constant 0 : i32
    return %arg0, %arg1 : i32, i32
  }
  func.func @transform_4(%arg0: i32, %arg1: i32, %arg2: i32) -> (i32, i32) {
    %c0_i32 = arith.constant 0 : i32
    return %arg0, %arg1 : i32, i32
  }
}

module attributes {stable_mosaic.version = 11 : i64} {
  func.func @_ln_kernel(%arg0: i32, %arg1: memref<64x128xf32, #tpu.memory_space<vmem>>, %arg2: memref<1x128xf32, #tpu.memory_space<vmem>>, %arg3: memref<1x128xf32, #tpu.memory_space<vmem>>, %arg4: memref<64x128xf32, #tpu.memory_space<vmem>>) attributes {dimension_semantics = [#tpu.dimension_semantics<parallel>], iteration_bounds = array<i64: 1>, scalar_prefetch = 0 : i64, scratch_operands = 0 : i64, tpu.core_type = #tpu.core_type<tc>, window_params = [{transform_indices = @transform_0, window_bounds = array<i64: 64, 128>}, {pipeline_mode = #tpu.pipeline_mode<synchronous>, transform_indices = @transform_1, window_bounds = array<i64: 1, 128>}, {pipeline_mode = #tpu.pipeline_mode<synchronous>, transform_indices = @transform_2, window_bounds = array<i64: 1, 128>}, {transform_indices = @transform_3, window_bounds = array<i64: 64, 128>}]} {
    %c0 = arith.constant 0 : index
    %c0_0 = arith.constant 0 : index
    %0 = vector.load %arg1[%c0, %c0_0] : memref<64x128xf32, #tpu.memory_space<vmem>>, vector<64x128xf32>
    %cst = arith.constant dense<0.000000e+00> : vector<64xf32>
    %1 = vector.multi_reduction <add>, %0, %cst [1] : vector<64x128xf32> to vector<64xf32>
    %2 = vector.shape_cast %1 : vector<64xf32> to vector<64x1xf32>
    %cst_1 = arith.constant 1.280000e+02 : f32
    %3 = vector.broadcast %cst_1 : f32 to vector<64x1xf32>
    %4 = arith.divf %2, %3 : vector<64x1xf32>
    %5 = vector.broadcast %4 : vector<64x1xf32> to vector<64x128xf32>
    %6 = arith.subf %0, %5 : vector<64x128xf32>
    %7 = arith.mulf %6, %6 : vector<64x128xf32>
    %cst_2 = arith.constant dense<0.000000e+00> : vector<64xf32>
    %8 = vector.multi_reduction <add>, %7, %cst_2 [1] : vector<64x128xf32> to vector<64xf32>
    %9 = vector.shape_cast %8 : vector<64xf32> to vector<64x1xf32>
    %cst_3 = arith.constant 1.280000e+02 : f32
    %10 = vector.broadcast %cst_3 : f32 to vector<64x1xf32>
    %11 = arith.divf %9, %10 : vector<64x1xf32>
    %12 = vector.broadcast %4 : vector<64x1xf32> to vector<64x128xf32>
    %13 = arith.subf %0, %12 : vector<64x128xf32>
    %cst_4 = arith.constant 9.99999974E-6 : f32
    %14 = vector.broadcast %cst_4 : f32 to vector<64x1xf32>
    %15 = arith.addf %11, %14 : vector<64x1xf32>
    %16 = math.rsqrt %15 : vector<64x1xf32>
    %17 = vector.broadcast %16 : vector<64x1xf32> to vector<64x128xf32>
    %18 = arith.mulf %13, %17 : vector<64x128xf32>
    %c0_5 = arith.constant 0 : index
    %c0_6 = arith.constant 0 : index
    %19 = vector.load %arg2[%c0_5, %c0_6] : memref<1x128xf32, #tpu.memory_space<vmem>>, vector<1x128xf32>
    %20 = vector.broadcast %19 : vector<1x128xf32> to vector<64x128xf32>
    %21 = arith.mulf %18, %20 : vector<64x128xf32>
    %c0_7 = arith.constant 0 : index
    %c0_8 = arith.constant 0 : index
    %22 = vector.load %arg3[%c0_7, %c0_8] : memref<1x128xf32, #tpu.memory_space<vmem>>, vector<1x128xf32>
    %23 = vector.broadcast %22 : vector<1x128xf32> to vector<64x128xf32>
    %24 = arith.addf %21, %23 : vector<64x128xf32>
    %c0_9 = arith.constant 0 : index
    %c0_10 = arith.constant 0 : index
    %25 = vector.load %arg4[%c0_9, %c0_10] : memref<64x128xf32, #tpu.memory_space<vmem>>, vector<64x128xf32>
    tpu.vector_store %arg4[%c0_9, %c0_10], %24 {strides = array<i32>} : memref<64x128xf32, #tpu.memory_space<vmem>>, vector<64x128xf32>,
    return
  }
  func.func @transform_0(%arg0: i32) -> (i32, i32) {
    %c0_i32 = arith.constant 0 : i32
    %c0_i32_0 = arith.constant 0 : i32
    return %arg0, %c0_i32 : i32, i32
  }
  func.func @transform_1(%arg0: i32) -> (i32, i32) {
    %c0_i32 = arith.constant 0 : i32
    %c0_i32_0 = arith.constant 0 : i32
    %c0_i32_1 = arith.constant 0 : i32
    return %c0_i32, %c0_i32_0 : i32, i32
  }
  func.func @transform_2(%arg0: i32) -> (i32, i32) {
    %c0_i32 = arith.constant 0 : i32
    %c0_i32_0 = arith.constant 0 : i32
    %c0_i32_1 = arith.constant 0 : i32
    return %c0_i32, %c0_i32_0 : i32, i32
  }
  func.func @transform_3(%arg0: i32) -> (i32, i32) {
    %c0_i32 = arith.constant 0 : i32
    %c0_i32_0 = arith.constant 0 : i32
    return %arg0, %c0_i32 : i32, i32
  }
}

</mosaic_0001>

<bundles_post_ra>
// kernel: audio_encoder_forward.14
= control target key start
LH: loop header
LB: loop body
LE: loop exit
PB: predicated region body
PF: predicated region fallthrough
CT: control target
= control target key end

     0   :  { %s932_s1 = inlined_call_operand.vmem [shape: bf16[384,128], index: 1, kind: input, shape index: {}]   ;;  %s933_s0 = inlined_call_operand.vmem [shape: bf16[64,384], index: 0, kind: input, shape index: {}]   ;;  %s934_s2 = inlined_call_operand.vmem [shape: f32[1,128], index: 2, kind: input, shape index: {}]   ;;  %s935_s3 = inlined_call_operand.vmem [shape: f32[64,128], index: 3, kind: output, shape index: {}]  }
   0x1   :  { %v676_v0 = vld [vmem:[%s932_s1 + $0x40] sm:$0xff]   ;;  %v679_v3 = vld [vmem:[%s932_s1 + $0x48] sm:$0xff]   ;;  %v682_v6 = vld [vmem:[%s932_s1 + $0x50] sm:$0xff]  }
   0x2   :  { %v677_v1 = vld [vmem:[%s932_s1] sm:$0xff]   ;;  %600 = vmatprep.subr.bf16.mxu0 %v676_v0  ;;  %v680_v4 = vld [vmem:[%s932_s1 + $0x8] sm:$0xff]   ;;  %v683_v7 = vld [vmem:[%s932_s1 + $0x10] sm:$0xff]  }
   0x3   :  { %v678_v2 = vld [vmem:[%s932_s1 + $0x80] sm:$0xff]   ;;  %601 = vmatpush3.bf16.msra.mxu0 %v677_v1  ;;  %v681_v5 = vld [vmem:[%s932_s1 + $0x88] sm:$0xff]   ;;  %v684_v8 = vld [vmem:[%s932_s1 + $0x90] sm:$0xff]  }
   0x4   :  { %652 = vmatprep.subr.bf16.mxu1 %v678_v2  ;;  %602 = vmatprep.subr.bf16.mxu0 %v679_v3  ;;  %v685_v9 = vld [vmem:[%s932_s1 + $0x58] sm:$0xff]   ;;  %v688_v12 = vld [vmem:[%s932_s1 + $0x60] sm:$0xff]   ;;  %v691_v15 = vld [vmem:[%s932_s1 + $0x68] sm:$0xff]  }
   0x5   :  { %653 = vmatpush3.bf16.msra.mxu1 %v678_v2  ;;  %v686_v10 = vld [vmem:[%s932_s1 + $0x18] sm:$0xff]   ;;  %v690_v13 = vld [vmem:[%s932_s1 + $0xa0] sm:$0xff]   ;;  %v693_v16 = vld [vmem:[%s932_s1 + $0xa8] sm:$0xff]  }
   0x6   :  { %654 = vmatprep.subr.bf16.mxu1 %v681_v5  ;;  %v687_v11 = vld [vmem:[%s932_s1 + $0x98] sm:$0xff]   ;;  %v689_v14 = vld [vmem:[%s932_s1 + $0x20] sm:$0xff]   ;;  %v692_v17 = vld [vmem:[%s932_s1 + $0x28] sm:$0xff]  }
   0x7   :  { %603 = vmatpush3.bf16.msra.mxu0 %v680_v4  ;;  %v694_v18 = vld [vmem:[%s932_s1 + $0x70] sm:$0xff]   ;;  %v697_v21 = vld [vmem:[%s932_s1 + $0x78] sm:$0xff]   ;;  %v700_v26 = vld [vmem:[%s933_s0] ss:$12 sps:$4 sm:$0xff]  }
   0x8   :  { %604 = vmatprep.subr.bf16.mxu0 %v682_v6  ;;  %v695_v19 = vld [vmem:[%s932_s1 + $0x30] sm:$0xff]   ;;  %v699_v22 = vld [vmem:[%s932_s1 + $0xb8] sm:$0xff]   ;;  %v704_v28 = vld [vmem:[%s933_s0 + $0x20] ss:$12 sps:$4 sm:$0xff]  }
   0x9   :  { %655 = vmatpush3.bf16.msra.mxu1 %v681_v5  ;;  %v696_v20 = vld [vmem:[%s932_s1 + $0xb0] sm:$0xff]   ;;  %v698_v25 = vld [vmem:[%s932_s1 + $0x38] sm:$0xff]   ;;  %v863_v43 = vld [vmem:[%s934_s2] ss:$0 sm:$0xff] }
   0xa   :  { %656 = vmatprep.subr.bf16.mxu1 %v684_v8  ;;  %v702_v23 = vld [vmem:[%s933_s0 + $0x4] ss:$12 sps:$4 sm:$0xff]   ;;  %v703_v24 = vld [vmem:[%s933_s0 + $0x8] ss:$12 sps:$4 sm:$0xff]   ;;  %v713_v34 = vld [vmem:[%s933_s0 + $0x4c] ss:$12 sps:$4 sm:$0xff]  }
   0xb   :  { %605 = vmatpush3.bf16.msra.mxu0 %v683_v7  ;;  %339 = vmatprep.mubr.bf16.mxu0 %v702_v23  ;;  %v705_v27 = vld [vmem:[%s933_s0 + $0x1c] ss:$12 sps:$4 sm:$0xff]   ;;  %v711_v29 = vld [vmem:[%s933_s0 + $0x38] ss:$12 sps:$4 sm:$0xff]   ;;  %v708_v31 = vld [vmem:[%s933_s0 + $0x34] ss:$12 sps:$4 sm:$0xff]  }
   0xc   :  { %606 = vmatprep.subr.bf16.mxu0 %v685_v9  ;;  %668 = vmatprep.mubr.bf16.mxu1 %v703_v24  ;;  %v707_v30 = vld [vmem:[%s933_s0 + $0x18] ss:$12 sps:$4 sm:$0xff]   ;;  %v712_v32 = vld [vmem:[%s933_s0 + $0x50] ss:$12 sps:$4 sm:$0xff]   ;;  %v715_v35 = vld [vmem:[%s933_s0 + $0x48] ss:$12 sps:$4 sm:$0xff]  }
   0xd   :  { %657 = vmatpush3.bf16.msra.mxu1 %v684_v8  ;;  %v710_v33 = vld [vmem:[%s933_s0 + $0x30] ss:$12 sps:$4 sm:$0xff]  }
   0xe   :  { %658 = vmatprep.subr.bf16.mxu1 %v687_v11 }
   0xf   :  { %607 = vmatpush3.bf16.msra.mxu0 %v686_v10 }
  0x10   :  { %608 = vmatprep.subr.bf16.mxu0 %v688_v12 }
  0x11   :  { %659 = vmatpush3.bf16.msra.mxu1 %v687_v11 }
  0x12   :  { %660 = vmatprep.subr.bf16.mxu1 %v690_v13 }
  0x13   :  { %609 = vmatpush3.bf16.msra.mxu0 %v689_v14 }
  0x14   :  { %610 = vmatprep.subr.bf16.mxu0 %v691_v15 }
  0x15   :  { %661 = vmatpush3.bf16.msra.mxu1 %v690_v13 }
  0x16   :  { %662 = vmatprep.subr.bf16.mxu1 %v693_v16 }
  0x17   :  { %611 = vmatpush3.bf16.msra.mxu0 %v692_v17 }
  0x18   :  { %612 = vmatprep.subr.bf16.mxu0 %v694_v18 }
  0x19   :  { %663 = vmatpush3.bf16.msra.mxu1 %v693_v16 }
  0x1a   :  { %664 = vmatprep.subr.bf16.mxu1 %v696_v20 }
  0x1b   :  { %613 = vmatpush3.bf16.msra.mxu0 %v695_v19 }
  0x1c   :  { %614 = vmatprep.subr.bf16.mxu0 %v697_v21 }
  0x1d   :  { %665 = vmatpush3.bf16.msra.mxu1 %v696_v20 }
  0x1e   :  { %666 = vmatprep.subr.bf16.mxu1 %v699_v22 }
  0x1f   :  { %615 = vmatpush3.bf16.msra.mxu0 %v698_v25 }
  0x21   :  { %667 = vmatpush3.bf16.msra.mxu1 %v699_v22 }
  0x22   :  { %340 = vmatmul.mubr.bf16.vlgmr.msra.gmra.mrb[0].mxu0 %v700_v26 }
  0x23   :  { %347 = vmatprep.mubr.bf16.mxu0 %v705_v27 }
  0x24   :  { %669 = vmatmul.mubr.bf16.vlgmr.msra.gmra.mrb[0].mxu1 %v704_v28 }
  0x25   :  { %672 = vmatprep.mubr.bf16.mxu1 %v711_v29 }
  0x2a   :  { %348 = vmatmul.mubr.bf16.gmra.mrb[4].mxu0 %v707_v30 }
  0x2b   :  { %355 = vmatprep.mubr.bf16.mxu0 %v708_v31 }
  0x2c   :  { %673 = vmatmul.mubr.bf16.gmra.mrb[4].mxu1 %v712_v32 }
  0x32   :  { %356 = vmatmul.mubr.bf16.gmra.mrb[8].mxu0 %v710_v33 }
  0x33   :  { %363 = vmatprep.mubr.bf16.mxu0 %v713_v34 }
  0x3a   :  { %364 = vmatmul.mubr.bf16.gmra.mrb[12].mxu0 %v715_v35 }
  0xf5   :  { %v616_v36 = vpop.f32.mrb[0].mxu0 }
  0xf6   :  { %v617_v37 = vpop.f32.mrb[1].mxu0 }
  0xf7   :  { %v618_v38 = vadd.f32 %v617_v37, %v616_v36  ;;  %v619_v39 = vpop.f32.mrb[2].mxu0  ;;  %v670_v40 = vpop.f32.mrb[0].mxu1 }
  0xf8   :  { %v620_v41 = vpop.f32.mrb[3].mxu0  ;;  %v406_v42 = vpop.f32.mrb[1].mxu1 }
  0xf9   :  { %v621_v44 = vadd.f32 %v620_v41, %v619_v39  ;;  %v407_v45 = vadd.f32 %v618_v38, %v406_v42  ;;  %v671_v46 = vpop.f32.mrb[2].mxu1 }
  0xfa   :  { %v409_v47 = vpop.f32.mrb[3].mxu1 }
  0xfb   :  { %v471_v48 = vadd.f32 %v863_v43, %v407_v45  ;;  %v410_v49 = vadd.f32 %v621_v44, %v409_v47 }
  0xfd   :  { %v487_v50 = vmul.f32 0.044715, %v471_v48  ;;  %v867_v51 = vadd.f32 %v863_v43, %v410_v49  ;;  %v622_v52 = vpop.f32.mrb[4].mxu0  ;;  %v479_v44 = vmul.f32 0.5, %v471_v48 }
  0xfe   :  { %v623_v53 = vpop.f32.mrb[5].mxu0 }
  0xff   :  { %v495_v54 = vmul.f32 %v487_v50, %v471_v48  ;;  %v488_v55 = vmul.f32 0.044715, %v867_v51  ;;  %v624_v56 = vadd.f32 %v623_v53, %v622_v52  ;;  %v625_v57 = vpop.f32.mrb[6].mxu0  ;;  %v674_v58 = vpop.f32.mrb[4].mxu1 }
 0x100   :  { %v626_v59 = vpop.f32.mrb[7].mxu0  ;;  %v422_v60 = vpop.f32.mrb[5].mxu1 }
 0x101   :  { %v503_v61 = vmul.f32 %v495_v54, %v471_v48  ;;  %v496_v62 = vmul.f32 %v488_v55, %v867_v51  ;;  %v415_v63 = vadd.f32 %v670_v40, %v624_v56  ;;  %v627_v0 = vadd.f32 %v626_v59, %v625_v57  ;;  %v675_v1 = vpop.f32.mrb[6].mxu1 }
 0x102   :  { %v425_v2 = vpop.f32.mrb[7].mxu1  ;;  %v480_v54 = vmul.f32 0.5, %v867_v51 }
 0x103   :  { %v511_v3 = vadd.f32 %v503_v61, %v471_v48  ;;  %v504_v4 = vmul.f32 %v496_v62, %v867_v51  ;;  %v873_v5 = vadd.f32 %v863_v43, %v415_v63  ;;  %v418_v6 = vadd.f32 %v671_v46, %v627_v0 }
 0x105   :  { %v519_v7 = vmul.f32 0.7978846, %v511_v3  ;;  %v512_v8 = vadd.f32 %v504_v4, %v867_v51  ;;  %v489_v9 = vmul.f32 0.044715, %v873_v5  ;;  %v628_v10 = vpop.f32.mrb[8].mxu0  ;;  %v878_v11 = vadd.f32 %v863_v43, %v418_v6 }
 0x106   :  { %v629_v12 = vpop.f32.mrb[9].mxu0 }
 0x107   :  { %716 = vtanh.f32 %v519_v7  ;;  %v520_v13 = vmul.f32 0.7978846, %v512_v8  ;;  %v497_v14 = vmul.f32 %v489_v9, %v873_v5  ;;  %v630_v15 = vadd.f32 %v629_v12, %v628_v10  ;;  %v631_v16 = vpop.f32.mrb[10].mxu0 }
 0x108   :  { %v490_v17 = vmul.f32 0.044715, %v878_v11  ;;  %v632_v18 = vpop.f32.mrb[11].mxu0  ;;  %v482_v8 = vmul.f32 0.5, %v878_v11 }
 0x109   :  { %718 = vtanh.f32 %v520_v13  ;;  %v505_v19 = vmul.f32 %v497_v14, %v873_v5  ;;  %v633_v20 = vadd.f32 %v632_v18, %v631_v16  ;;  %v423_v21 = vadd.f32 %v630_v15, %v422_v60 }
 0x10a   :  { %v498_v22 = vmul.f32 %v490_v17, %v878_v11 }
 0x10b   :  { %v513_v23 = vadd.f32 %v505_v19, %v873_v5  ;;  %v886_v24 = vadd.f32 %v863_v43, %v423_v21  ;;  %v426_v25 = vadd.f32 %v633_v20, %v425_v2 }
 0x10c   :  { %v506_v26 = vmul.f32 %v498_v22, %v878_v11 }
 0x10d   :  { %v521_v27 = vmul.f32 0.7978846, %v513_v23  ;;  %v491_v28 = vmul.f32 0.044715, %v886_v24  ;;  %v891_v29 = vadd.f32 %v863_v43, %v426_v25  ;;  %v634_v30 = vpop.f32.mrb[12].mxu0 }
 0x10e   :  { %v514_v31 = vadd.f32 %v506_v26, %v878_v11  ;;  %v635_v32 = vpop.f32.mrb[13].mxu0 }
 0x10f   :  { %720 = vtanh.f32 %v521_v27  ;;  %v499_v33 = vmul.f32 %v491_v28, %v886_v24  ;;  %v492_v34 = vmul.f32 0.044715, %v891_v29  ;;  %v637_v35 = vpop.f32.mrb[14].mxu0  ;;  %v636_v37 = vadd.f32 %v635_v32, %v634_v30 }
 0x110   :  { %v522_v36 = vmul.f32 0.7978846, %v514_v31  ;;  %v638_v38 = vpop.f32.mrb[15].mxu0  ;;  %v484_v18 = vmul.f32 0.5, %v891_v29 }
 0x111   :  { %v717_v39 = vpop.eup %716  ;;  %v507_v40 = vmul.f32 %v499_v33, %v886_v24  ;;  %v500_v41 = vmul.f32 %v492_v34, %v891_v29  ;;  %v639_v42 = vadd.f32 %v638_v38, %v637_v35  ;;  %v431_v46 = vadd.f32 %v674_v58, %v636_v37 }
 0x112   :  { %v535_v45 = vadd.f32 1.0, %v717_v39  ;;  %722 = vtanh.f32 %v522_v36 }
 0x113   :  { %v719_v47 = vpop.eup %718  ;;  %v515_v49 = vadd.f32 %v507_v40, %v886_v24  ;;  %v508_v50 = vmul.f32 %v500_v41, %v891_v29  ;;  %v434_v52 = vadd.f32 %v675_v1, %v639_v42  ;;  %v477_v56 = vadd.f32 %v863_v43, %v431_v46 }
 0x114   :  { %v543_v53 = vmul.f32 %v535_v45, %v479_v44  ;;  %v536_v55 = vadd.f32 1.0, %v719_v47  ;;  %v481_v1 = vmul.f32 0.5, %v873_v5  ;;  %v483_v5 = vmul.f32 0.5, %v886_v24 }
 0x115   :  { %v523_v57 = vmul.f32 0.7978846, %v515_v49  ;;  %v516_v59 = vadd.f32 %v508_v50, %v891_v29  ;;  %v478_v48 = vadd.f32 %v863_v43, %v434_v52  ;;  %v493_v60 = vmul.f32 0.044715, %v477_v56 }
 0x116   :  { %551 = vst [vmem:[%s935_s3] sm:$0xff] %v543_v53  ;;  %v544_v58 = vmul.f32 %v536_v55, %v480_v54  ;;  %v485_v23 = vmul.f32 0.5, %v477_v56 }
 0x117   :  { %724 = vtanh.f32 %v523_v57  ;;  %v524_v61 = vmul.f32 0.7978846, %v516_v59  ;;  %v494_v62 = vmul.f32 0.044715, %v478_v48  ;;  %v501_v51 = vmul.f32 %v493_v60, %v477_v56 }
 0x118   :  { %552 = vst [vmem:[%s935_s3 + $0x8] sm:$0xff] %v544_v58  ;;  %v486_v24 = vmul.f32 0.5, %v478_v48 }
 0x119   :  { %v721_v63 = vpop.eup %720  ;;  %726 = vtanh.f32 %v524_v61  ;;  %v502_v0 = vmul.f32 %v494_v62, %v478_v48  ;;  %v509_v2 = vmul.f32 %v501_v51, %v477_v56 }
 0x11a   :  { %v537_v43 = vadd.f32 1.0, %v721_v63 }
 0x11b   :  { %v510_v3 = vmul.f32 %v502_v0, %v478_v48  ;;  %v517_v7 = vadd.f32 %v509_v2, %v477_v56 }
 0x11c   :  { %v723_v4 = vpop.eup %722  ;;  %v545_v6 = vmul.f32 %v537_v43, %v481_v1 }
 0x11d   :  { %v538_v9 = vadd.f32 1.0, %v723_v4  ;;  %v518_v10 = vadd.f32 %v510_v3, %v478_v48  ;;  %v525_v12 = vmul.f32 0.7978846, %v517_v7 }
 0x11e   :  { %553 = vst [vmem:[%s935_s3 + $0x10] sm:$0xff] %v545_v6 }
 0x11f   :  { %v546_v13 = vmul.f32 %v538_v9, %v482_v8  ;;  %v526_v14 = vmul.f32 0.7978846, %v518_v10  ;;  %728 = vtanh.f32 %v525_v12 }
 0x121   :  { %v725_v15 = vpop.eup %724  ;;  %554 = vst [vmem:[%s935_s3 + $0x18] sm:$0xff] %v546_v13  ;;  %730 = vtanh.f32 %v526_v14 }
 0x122   :  { %v539_v16 = vadd.f32 1.0, %v725_v15 }
 0x123   :  { %v727_v11 = vpop.eup %726 }
 0x124   :  { %v547_v17 = vmul.f32 %v539_v16, %v483_v5  ;;  %v540_v19 = vadd.f32 1.0, %v727_v11 }
 0x126   :  { %555 = vst [vmem:[%s935_s3 + $0x20] sm:$0xff] %v547_v17  ;;  %v548_v20 = vmul.f32 %v540_v19, %v484_v18 }
 0x128   :  { %556 = vst [vmem:[%s935_s3 + $0x28] sm:$0xff] %v548_v20 }
 0x129   :  { %v729_v21 = vpop.eup %728 }
 0x12a   :  { %v541_v25 = vadd.f32 1.0, %v729_v21 }
 0x12b   :  { %v731_v22 = vpop.eup %730 }
 0x12c   :  { %v542_v26 = vadd.f32 1.0, %v731_v22  ;;  %v549_v27 = vmul.f32 %v541_v25, %v485_v23 }
 0x12e   :  { %v550_v28 = vmul.f32 %v542_v26, %v486_v24  ;;  %557 = vst [vmem:[%s935_s3 + $0x30] sm:$0xff] %v549_v27 }
 0x130   :  { %558 = vst [vmem:[%s935_s3 + $0x38] sm:$0xff] %v550_v28 }

// kernel: audio_encoder_forward.13
= control target key start
LH: loop header
LB: loop body
LE: loop exit
PB: predicated region body
PF: predicated region fallthrough
CT: control target
= control target key end

     0   :  { %s1010_s1 = inlined_call_operand.vmem [shape: bf16[128,128], index: 1, kind: input, shape index: {}]   ;;  %s1011_s0 = inlined_call_operand.vmem [shape: bf16[128,128], index: 0, kind: input, shape index: {}]   ;;  %s1012_s2 = inlined_call_operand.vmem [shape: f32[1,128], index: 2, kind: input, shape index: {}]   ;;  %s1013_s3 = inlined_call_operand.vmem [shape: bf16[128,128], index: 3, kind: output, shape index: {}]  }
   0x1   :  { %v738_v0 = vld [vmem:[%s1010_s1] sm:$0xff]   ;;  %v739_v1 = vld [vmem:[%s1010_s1 + $0x8] sm:$0xff]   ;;  %v740_v2 = vld [vmem:[%s1010_s1 + $0x10] sm:$0xff]  }
   0x2   :  { %690 = vmatprep.subr.bf16.mxu0 %v738_v0  ;;  %722 = vmatprep.subr.bf16.mxu1 %v738_v0  ;;  %v741_v3 = vld [vmem:[%s1010_s1 + $0x18] sm:$0xff]   ;;  %v746_v4 = vld [vmem:[%s1011_s0] sm:$0xff]   ;;  %v743_v7 = vld [vmem:[%s1010_s1 + $0x28] sm:$0xff]  }
   0x3   :  { %691 = vmatpush3.bf16.msra.mxu0 %v738_v0  ;;  %730 = vmatpush3.bf16.msra.mxu1 %v738_v0  ;;  %v747_v5 = vld [vmem:[%s1011_s0 + $0x20] sm:$0xff]   ;;  %v744_v8 = vld [vmem:[%s1010_s1 + $0x30] sm:$0xff]   ;;  %v745_v9 = vld [vmem:[%s1010_s1 + $0x38] sm:$0xff]  }
   0x4   :  { %692 = vmatprep.subr.bf16.mxu0 %v739_v1  ;;  %723 = vmatprep.subr.bf16.mxu1 %v739_v1  ;;  %v742_v6 = vld [vmem:[%s1010_s1 + $0x20] sm:$0xff]   ;;  %v748_v10 = vld [vmem:[%s1011_s0 + $0x8] sm:$0xff]   ;;  %v750_v12 = vld [vmem:[%s1011_s0 + $0x10] sm:$0xff]  }
   0x5   :  { %706 = vmatprep.mubr.bf16.mxu0 %v746_v4  ;;  %714 = vmatprep.mubr.bf16.mxu1 %v747_v5  ;;  %v749_v11 = vld [vmem:[%s1011_s0 + $0x28] sm:$0xff]   ;;  %v751_v13 = vld [vmem:[%s1011_s0 + $0x30] sm:$0xff]   ;;  %v752_v14 = vld [vmem:[%s1011_s0 + $0x18] sm:$0xff]  }
   0x6   :  { %v753_v15 = vld [vmem:[%s1011_s0 + $0x38] sm:$0xff]   ;;  %v857_v16 = vld [vmem:[%s1012_s2] ss:$0 sm:$0xff] }
   0x7   :  { %693 = vmatpush3.bf16.msra.mxu0 %v739_v1  ;;  %731 = vmatpush3.bf16.msra.mxu1 %v739_v1 }
   0x8   :  { %694 = vmatprep.subr.bf16.mxu0 %v740_v2  ;;  %724 = vmatprep.subr.bf16.mxu1 %v740_v2 }
   0xb   :  { %695 = vmatpush3.bf16.msra.mxu0 %v740_v2  ;;  %732 = vmatpush3.bf16.msra.mxu1 %v740_v2 }
   0xc   :  { %696 = vmatprep.subr.bf16.mxu0 %v741_v3  ;;  %725 = vmatprep.subr.bf16.mxu1 %v741_v3 }
   0xf   :  { %697 = vmatpush3.bf16.msra.mxu0 %v741_v3  ;;  %733 = vmatpush3.bf16.msra.mxu1 %v741_v3 }
  0x10   :  { %698 = vmatprep.subr.bf16.mxu0 %v742_v6  ;;  %726 = vmatprep.subr.bf16.mxu1 %v742_v6 }
  0x13   :  { %699 = vmatpush3.bf16.msra.mxu0 %v742_v6  ;;  %734 = vmatpush3.bf16.msra.mxu1 %v742_v6 }
  0x14   :  { %700 = vmatprep.subr.bf16.mxu0 %v743_v7  ;;  %727 = vmatprep.subr.bf16.mxu1 %v743_v7 }
  0x17   :  { %701 = vmatpush3.bf16.msra.mxu0 %v743_v7  ;;  %735 = vmatpush3.bf16.msra.mxu1 %v743_v7 }
  0x18   :  { %702 = vmatprep.subr.bf16.mxu0 %v744_v8  ;;  %728 = vmatprep.subr.bf16.mxu1 %v744_v8 }
  0x1b   :  { %703 = vmatpush3.bf16.msra.mxu0 %v744_v8  ;;  %736 = vmatpush3.bf16.msra.mxu1 %v744_v8 }
  0x1c   :  { %704 = vmatprep.subr.bf16.mxu0 %v745_v9  ;;  %729 = vmatprep.subr.bf16.mxu1 %v745_v9 }
  0x1f   :  { %705 = vmatpush3.bf16.msra.mxu0 %v745_v9  ;;  %737 = vmatpush3.bf16.msra.mxu1 %v745_v9 }
  0x22   :  { %707 = vmatmul.mubr.bf16.vlgmr.msra.gmra.mrb[0].mxu0 %v748_v10  ;;  %715 = vmatmul.mubr.bf16.vlgmr.msra.gmra.mrb[0].mxu1 %v749_v11 }
  0x23   :  { %710 = vmatprep.mubr.bf16.mxu0 %v750_v12  ;;  %718 = vmatprep.mubr.bf16.mxu1 %v751_v13 }
  0x2a   :  { %711 = vmatmul.mubr.bf16.gmra.mrb[4].mxu0 %v752_v14  ;;  %719 = vmatmul.mubr.bf16.gmra.mrb[4].mxu1 %v753_v15 }
  0xf5   :  { %v708_v17 = vpop.f32.mrb[0].mxu0  ;;  %v716_v18 = vpop.f32.mrb[0].mxu1 }
  0xf6   :  { %v860_v19 = vadd.f32 %v708_v17, %v857_v16  ;;  %v863_v20 = vadd.f32 %v716_v18, %v857_v16  ;;  %v213_v21 = vpop.f32.mrb[1].mxu0  ;;  %v245_v22 = vpop.f32.mrb[1].mxu1 }
  0xf7   :  { %v866_v23 = vadd.f32 %v857_v16, %v213_v21  ;;  %v869_v24 = vadd.f32 %v857_v16, %v245_v22  ;;  %v709_v25 = vpop.f32.mrb[2].mxu0  ;;  %v717_v26 = vpop.f32.mrb[2].mxu1 }
  0xf8   :  { %v368_v27 = vmul.f32 0.044715, %v860_v19  ;;  %v376_v28 = vmul.f32 0.044715, %v863_v20  ;;  %v878_v33 = vadd.f32 %v709_v25, %v857_v16  ;;  %v881_v34 = vadd.f32 %v717_v26, %v857_v16  ;;  %v216_v35 = vpop.f32.mrb[3].mxu0  ;;  %v248_v36 = vpop.f32.mrb[3].mxu1 }
  0xf9   :  { %v366_v29 = vmul.f32 0.044715, %v866_v23  ;;  %v374_v30 = vmul.f32 0.044715, %v869_v24  ;;  %v886_v39 = vadd.f32 %v857_v16, %v216_v35  ;;  %v898_v51 = vadd.f32 %v857_v16, %v248_v36 }
  0xfa   :  { %v384_v31 = vmul.f32 %v368_v27, %v860_v19  ;;  %v392_v32 = vmul.f32 %v376_v28, %v863_v20  ;;  %v369_v42 = vmul.f32 0.044715, %v878_v33  ;;  %v377_v45 = vmul.f32 0.044715, %v881_v34 }
  0xfb   :  { %v382_v37 = vmul.f32 %v366_v29, %v866_v23  ;;  %v390_v38 = vmul.f32 %v374_v30, %v869_v24  ;;  %v367_v57 = vmul.f32 0.044715, %v886_v39  ;;  %v375_v6 = vmul.f32 0.044715, %v898_v51 }
  0xfc   :  { %v400_v40 = vmul.f32 %v384_v31, %v860_v19  ;;  %v408_v41 = vmul.f32 %v392_v32, %v863_v20  ;;  %v385_v50 = vmul.f32 %v369_v42, %v878_v33  ;;  %v393_v56 = vmul.f32 %v377_v45, %v881_v34 }
  0xfd   :  { %v398_v43 = vmul.f32 %v382_v37, %v866_v23  ;;  %v406_v44 = vmul.f32 %v390_v38, %v869_v24  ;;  %v712_v46 = vpop.f32.mrb[4].mxu0  ;;  %v720_v47 = vpop.f32.mrb[4].mxu1  ;;  %v383_v3 = vmul.f32 %v367_v57, %v886_v39  ;;  %v391_v12 = vmul.f32 %v375_v6, %v898_v51 }
  0xfe   :  { %v416_v48 = vadd.f32 %v400_v40, %v860_v19  ;;  %v424_v49 = vadd.f32 %v408_v41, %v863_v20  ;;  %v229_v52 = vpop.f32.mrb[5].mxu0  ;;  %v261_v53 = vpop.f32.mrb[5].mxu1  ;;  %v401_v62 = vmul.f32 %v385_v50, %v878_v33  ;;  %v409_v2 = vmul.f32 %v393_v56, %v881_v34 }
  0xff   :  { %v414_v54 = vadd.f32 %v398_v43, %v866_v23  ;;  %v422_v55 = vadd.f32 %v406_v44, %v869_v24  ;;  %v713_v58 = vpop.f32.mrb[6].mxu0  ;;  %v721_v59 = vpop.f32.mrb[6].mxu1  ;;  %v914_v7 = vadd.f32 %v712_v46, %v857_v16  ;;  %v399_v9 = vmul.f32 %v383_v3, %v886_v39 }
 0x100   :  { %v432_v60 = vmul.f32 0.7978846, %v416_v48  ;;  %v440_v61 = vmul.f32 0.7978846, %v424_v49  ;;  %v905_v63 = vpop.f32.mrb[7].mxu0  ;;  %v909_v4 = vpop.f32.mrb[7].mxu1  ;;  %v417_v5 = vadd.f32 %v401_v62, %v878_v33  ;;  %v425_v8 = vadd.f32 %v409_v2, %v881_v34 }
 0x101   :  { %v430_v0 = vmul.f32 0.7978846, %v414_v54  ;;  %v438_v1 = vmul.f32 0.7978846, %v422_v55  ;;  %v919_v10 = vadd.f32 %v720_v47, %v857_v16  ;;  %v415_v14 = vadd.f32 %v399_v9, %v886_v39 }
 0x102   :  { %754 = vtanh.f32 %v432_v60  ;;  %v433_v11 = vmul.f32 0.7978846, %v417_v5  ;;  %v441_v13 = vmul.f32 0.7978846, %v425_v8  ;;  %v372_v15 = vmul.f32 0.044715, %v914_v7 }
 0x103   :  { %756 = vtanh.f32 %v440_v61  ;;  %v407_v17 = vmul.f32 %v391_v12, %v898_v51  ;;  %v380_v18 = vmul.f32 0.044715, %v919_v10  ;;  %v431_v21 = vmul.f32 0.7978846, %v415_v14 }
 0x104   :  { %758 = vtanh.f32 %v430_v0  ;;  %v388_v22 = vmul.f32 %v372_v15, %v914_v7  ;;  %v928_v25 = vadd.f32 %v857_v16, %v229_v52  ;;  %v933_v28 = vadd.f32 %v857_v16, %v261_v53 }
 0x105   :  { %760 = vtanh.f32 %v438_v1  ;;  %v423_v26 = vadd.f32 %v407_v17, %v898_v51  ;;  %v396_v27 = vmul.f32 %v380_v18, %v919_v10  ;;  %v936_v29 = vadd.f32 %v713_v58, %v857_v16 }
 0x106   :  { %762 = vtanh.f32 %v433_v11  ;;  %v404_v30 = vmul.f32 %v388_v22, %v914_v7  ;;  %v370_v31 = vmul.f32 0.044715, %v928_v25  ;;  %v378_v36 = vmul.f32 0.044715, %v933_v28 }
 0x107   :  { %764 = vtanh.f32 %v441_v13  ;;  %v439_v32 = vmul.f32 0.7978846, %v423_v26  ;;  %v412_v35 = vmul.f32 %v396_v27, %v919_v10  ;;  %v373_v40 = vmul.f32 0.044715, %v936_v29 }
 0x108   :  { %766 = vtanh.f32 %v431_v21  ;;  %v420_v37 = vadd.f32 %v404_v30, %v914_v7  ;;  %v386_v38 = vmul.f32 %v370_v31, %v928_v25  ;;  %v352_v42 = vmul.f32 0.5, %v860_v19 }
 0x109   :  { %768 = vtanh.f32 %v439_v32  ;;  %v428_v43 = vadd.f32 %v412_v35, %v919_v10  ;;  %v394_v44 = vmul.f32 %v378_v36, %v933_v28  ;;  %v360_v47 = vmul.f32 0.5, %v863_v20 }
 0x10a   :  { %v436_v48 = vmul.f32 0.7978846, %v420_v37  ;;  %v389_v49 = vmul.f32 %v373_v40, %v936_v29  ;;  %v350_v53 = vmul.f32 0.5, %v866_v23  ;;  %v402_v54 = vmul.f32 %v386_v38, %v928_v25 }
 0x10b   :  { %v953_v19 = vadd.f32 %v721_v59, %v857_v16  ;;  %v358_v56 = vmul.f32 0.5, %v869_v24  ;;  %v353_v57 = vmul.f32 0.5, %v878_v33  ;;  %v361_v58 = vmul.f32 0.5, %v881_v34 }
 0x10c   :  { %v755_v41 = vpop.eup %754  ;;  %v351_v20 = vmul.f32 0.5, %v886_v39  ;;  %v359_v62 = vmul.f32 0.5, %v898_v51  ;;  %v444_v0 = vmul.f32 0.7978846, %v428_v43  ;;  %v410_v23 = vmul.f32 %v394_v44, %v933_v28 }
 0x10d   :  { %v757_v45 = vpop.eup %756  ;;  %v464_v46 = vadd.f32 1.0, %v755_v41  ;;  %770 = vtanh.f32 %v436_v48  ;;  %v405_v3 = vmul.f32 %v389_v49, %v936_v29  ;;  %v418_v33 = vadd.f32 %v402_v54, %v928_v25 }
 0x10e   :  { %v759_v50 = vpop.eup %758  ;;  %v472_v52 = vadd.f32 1.0, %v757_v45  ;;  %v381_v34 = vmul.f32 0.044715, %v953_v19  ;;  %v967_v9 = vadd.f32 %v857_v16, %v905_v63  ;;  %v426_v13 = vadd.f32 %v410_v23, %v933_v28 }
 0x10f   :  { %v761_v55 = vpop.eup %760  ;;  %v480_v61 = vmul.f32 %v464_v46, %v352_v42  ;;  %v462_v2 = vadd.f32 1.0, %v759_v50  ;;  %v421_v51 = vadd.f32 %v405_v3, %v936_v29  ;;  %v347_v63 = vadd.f32 %v857_v16, %v909_v4 }
 0x110   :  { %v763_v60 = vpop.eup %762  ;;  %v488_v24 = vmul.f32 %v472_v52, %v360_v47  ;;  %v470_v6 = vadd.f32 1.0, %v761_v55  ;;  %v397_v14 = vmul.f32 %v381_v34, %v953_v19  ;;  %v371_v21 = vmul.f32 0.044715, %v967_v9 }
 0x111   :  { %v765_v1 = vpop.eup %764  ;;  %v465_v59 = vadd.f32 1.0, %v763_v60  ;;  %v478_v15 = vmul.f32 %v462_v2, %v350_v53  ;;  %v437_v18 = vmul.f32 0.7978846, %v421_v51  ;;  %v434_v32 = vmul.f32 0.7978846, %v418_v33 }
 0x112   :  { %v473_v5 = vadd.f32 1.0, %v765_v1  ;;  %v767_v39 = vpop.eup %766  ;;  %v413_v30 = vmul.f32 %v397_v14, %v953_v19  ;;  %v387_v35 = vmul.f32 %v371_v21, %v967_v9  ;;  %v379_v38 = vmul.f32 0.044715, %v347_v63 }
 0x113   :  { %v481_v8 = vmul.f32 %v465_v59, %v353_v57  ;;  %v463_v12 = vadd.f32 1.0, %v767_v39  ;;  %v769_v22 = vpop.eup %768  ;;  %772 = vtanh.f32 %v437_v18  ;;  %v486_v40 = vmul.f32 %v470_v6, %v358_v56 }
 0x114   :  { %v489_v11 = vmul.f32 %v473_v5, %v361_v58  ;;  %v471_v31 = vadd.f32 1.0, %v769_v22  ;;  %774 = vtanh.f32 %v444_v0  ;;  %v429_v37 = vadd.f32 %v413_v30, %v953_v19 }
 0x115   :  { %v635_v17 = vpack.c.bf16 %v481_v8, %v480_v61  ;;  %v479_v27 = vmul.f32 %v463_v12, %v351_v20  ;;  %v403_v4 = vmul.f32 %v387_v35, %v967_v9  ;;  %v442_v41 = vmul.f32 0.7978846, %v426_v13 }
 0x116   :  { %v655_v26 = vpack.c.bf16 %v489_v11, %v488_v24  ;;  %v487_v16 = vmul.f32 %v471_v31, %v359_v62  ;;  %v445_v42 = vmul.f32 0.7978846, %v429_v37  ;;  %v395_v43 = vmul.f32 %v379_v38, %v347_v63 }
 0x117   :  { %667 = vst [vmem:[%s1013_s3 + $0x8] sm:$0xff] %v635_v17   ;;  %v630_v36 = vpack.c.bf16 %v479_v27, %v478_v15  ;;  %v771_v44 = vpop.eup %770  ;;  %776 = vtanh.f32 %v434_v32  ;;  %v419_v46 = vadd.f32 %v403_v4, %v967_v9  ;;  %v356_v55 = vmul.f32 0.5, %v914_v7 }
 0x118   :  { %671 = vst [vmem:[%s1013_s3 + $0x28] sm:$0xff] %v655_v26   ;;  %v650_v45 = vpack.c.bf16 %v487_v16, %v486_v40  ;;  %778 = vtanh.f32 %v445_v42  ;;  %v411_v47 = vmul.f32 %v395_v43, %v347_v63  ;;  %v468_v50 = vadd.f32 1.0, %v771_v44 }
 0x119   :  { %631 = vst [vmem:[%s1013_s3] sm:$0xff] %v630_v36   ;;  %v435_v48 = vmul.f32 0.7978846, %v419_v46  ;;  %780 = vtanh.f32 %v442_v41  ;;  %v357_v56 = vmul.f32 0.5, %v936_v29  ;;  %v364_v23 = vmul.f32 0.5, %v919_v10 }
 0x11a   :  { %670 = vst [vmem:[%s1013_s3 + $0x20] sm:$0xff] %v650_v45   ;;  %v427_v49 = vadd.f32 %v411_v47, %v347_v63  ;;  %v484_v58 = vmul.f32 %v468_v50, %v356_v55  ;;  %v365_v1 = vmul.f32 0.5, %v953_v19  ;;  %v354_v5 = vmul.f32 0.5, %v928_v25 }
 0x11b   :  { %782 = vtanh.f32 %v435_v48  ;;  %v355_v33 = vmul.f32 0.5, %v967_v9  ;;  %v362_v51 = vmul.f32 0.5, %v933_v28  ;;  %v363_v11 = vmul.f32 0.5, %v347_v63 }
 0x11c   :  { %v443_v52 = vmul.f32 0.7978846, %v427_v49 }
 0x11d   :  { %v773_v53 = vpop.eup %772 }
 0x11e   :  { %v775_v54 = vpop.eup %774  ;;  %v469_v57 = vadd.f32 1.0, %v773_v53  ;;  %784 = vtanh.f32 %v443_v52 }
 0x11f   :  { %v476_v61 = vadd.f32 1.0, %v775_v54 }
 0x120   :  { %v485_v20 = vmul.f32 %v469_v57, %v357_v56 }
 0x121   :  { %v777_v60 = vpop.eup %776  ;;  %v492_v29 = vmul.f32 %v476_v61, %v364_v23 }
 0x122   :  { %v779_v62 = vpop.eup %778  ;;  %v645_v0 = vpack.c.bf16 %v485_v20, %v484_v58  ;;  %v466_v3 = vadd.f32 1.0, %v777_v60 }
 0x123   :  { %v477_v2 = vadd.f32 1.0, %v779_v62  ;;  %v781_v59 = vpop.eup %780 }
 0x124   :  { %669 = vst [vmem:[%s1013_s3 + $0x18] sm:$0xff] %v645_v0   ;;  %v474_v39 = vadd.f32 1.0, %v781_v59  ;;  %v482_v8 = vmul.f32 %v466_v3, %v354_v5 }
 0x125   :  { %v783_v7 = vpop.eup %782  ;;  %v493_v24 = vmul.f32 %v477_v2, %v365_v1 }
 0x126   :  { %v467_v34 = vadd.f32 1.0, %v783_v7  ;;  %v490_v14 = vmul.f32 %v474_v39, %v362_v51 }
 0x127   :  { %v665_v6 = vpack.c.bf16 %v493_v24, %v492_v29 }
 0x128   :  { %v785_v10 = vpop.eup %784  ;;  %v483_v19 = vmul.f32 %v467_v34, %v355_v33 }
 0x129   :  { %673 = vst [vmem:[%s1013_s3 + $0x38] sm:$0xff] %v665_v6   ;;  %v475_v12 = vadd.f32 1.0, %v785_v10 }
 0x12a   :  { %v640_v13 = vpack.c.bf16 %v483_v19, %v482_v8 }
 0x12b   :  { %v491_v15 = vmul.f32 %v475_v12, %v363_v11 }
 0x12c   :  { %668 = vst [vmem:[%s1013_s3 + $0x10] sm:$0xff] %v640_v13  }
 0x12d   :  { %v660_v25 = vpack.c.bf16 %v491_v15, %v490_v14 }
 0x12f   :  { %672 = vst [vmem:[%s1013_s3 + $0x30] sm:$0xff] %v660_v25  }

// kernel: audio_encoder_forward.15
= control target key start
LH: loop header
LB: loop body
LE: loop exit
PB: predicated region body
PF: predicated region fallthrough
CT: control target
= control target key end

     0   :  { %v884_v39 = vmov 0   ;;  %s1170_s0 = inlined_call_operand.vmem [shape: f32[64,128], index: 0, kind: input, shape index: {}]   ;;  %s1171_s1 = inlined_call_operand.vmem [shape: bf16[128,384], index: 1, kind: input, shape index: {}]   ;;  %s1172_s2 = inlined_call_operand.vmem [shape: f32[1,128], index: 2, kind: input, shape index: {}]   ;;  %s1173_s3 = inlined_call_operand.vmem [shape: f32[1,128], index: 3, kind: input, shape index: {}]   ;;  %s1174_s4 = inlined_call_operand.vmem [shape: f32[1,384], index: 4, kind: input, shape index: {}]   ;;  %s1175_s5 = inlined_call_operand.vmem [shape: bf16[64,384], index: 5, kind: output, shape index: {}]  }
   0x1   :  { %v918_v0 = vld [vmem:[%s1170_s0] sm:$0xff]  ;;  %v923_v1 = vld [vmem:[%s1170_s0 + $0x8] sm:$0xff]  ;;  %v934_v4 = vld [vmem:[%s1170_s0 + $0x10] sm:$0xff]  ;;  %419 = vmatprep.mubr.bf16.mxu0 %v884_v39 }
   0x2   :  { %57 = vadd.xlane.f32.xlu0 %v918_v0  ;;  %v81_v2 = vmul.f32 %v918_v0, %v918_v0  ;;  %v82_v3 = vmul.f32 %v923_v1, %v923_v1  ;;  %v939_v5 = vld [vmem:[%s1170_s0 + $0x18] sm:$0xff]  ;;  %v83_v6 = vmul.f32 %v934_v4, %v934_v4  ;;  %v950_v8 = vld [vmem:[%s1170_s0 + $0x20] sm:$0xff]  ;;  %v955_v9 = vld [vmem:[%s1170_s0 + $0x28] sm:$0xff] }
   0x3   :  { %v84_v7 = vmul.f32 %v939_v5, %v939_v5  ;;  %v836_v10 = vld [vmem:[%s1171_s1 + $0x4] ss:$12 sps:$4 sm:$0xff]   ;;  %v838_v11 = vld [vmem:[%s1171_s1] ss:$12 sps:$4 sm:$0xff]   ;;  %v85_v12 = vmul.f32 %v950_v8, %v950_v8  ;;  %v839_v13 = vld [vmem:[%s1171_s1 + $0x1c] ss:$12 sps:$4 sm:$0xff]   ;;  %v86_v14 = vmul.f32 %v955_v9, %v955_v9 }
   0x4   :  { %89 = vadd.xlane.f32.xlu1 %v81_v2  ;;  %387 = vmatprep.subr.bf16.mxu0 %v836_v10  ;;  %v841_v15 = vld [vmem:[%s1171_s1 + $0x18] ss:$12 sps:$4 sm:$0xff]   ;;  %v978_v16 = vld [vmem:[%s1170_s0 + $0x30] sm:$0xff]  ;;  %v848_v24 = vld [vmem:[%s1171_s1 + $0x20] ss:$12 sps:$4 sm:$0xff]  }
   0x5   :  { %388 = vmatpush1.bf16.msra.mxu0 %v838_v11  ;;  %v983_v17 = vld [vmem:[%s1170_s0 + $0x38] sm:$0xff]  ;;  %v842_v18 = vld [vmem:[%s1171_s1 + $0x34] ss:$12 sps:$4 sm:$0xff]   ;;  %v87_v21 = vmul.f32 %v978_v16, %v978_v16  ;;  %v850_v26 = vld [vmem:[%s1171_s1 + $0x64] ss:$12 sps:$4 sm:$0xff]  }
   0x6   :  { %59 = vadd.xlane.f32.xlu0 %v923_v1  ;;  %389 = vmatprep.subr.bf16.mxu0 %v839_v13  ;;  %v844_v19 = vld [vmem:[%s1171_s1 + $0x8] ss:$12 sps:$4 sm:$0xff]   ;;  %v845_v20 = vld [vmem:[%s1171_s1 + $0x30] ss:$12 sps:$4 sm:$0xff]   ;;  %v88_v22 = vmul.f32 %v983_v17, %v983_v17  ;;  %v846_v23 = vld [vmem:[%s1171_s1 + $0x4c] ss:$12 sps:$4 sm:$0xff]  }
   0x7   :  { %811 = vmatprep.subr.bf16.mxu1 %v844_v19  ;;  %v849_v25 = vld [vmem:[%s1171_s1 + $0x48] ss:$12 sps:$4 sm:$0xff]   ;;  %v852_v27 = vld [vmem:[%s1171_s1 + $0x38] ss:$12 sps:$4 sm:$0xff]   ;;  %v853_v28 = vld [vmem:[%s1171_s1 + $0x60] ss:$12 sps:$4 sm:$0xff]  }
   0x8   :  { %91 = vadd.xlane.f32.xlu1 %v82_v3  ;;  %812 = vmatpush3.bf16.msra.mxu1 %v844_v19  ;;  %v854_v29 = vld [vmem:[%s1171_s1 + $0x7c] ss:$12 sps:$4 sm:$0xff]   ;;  %v857_v31 = vld [vmem:[%s1171_s1 + $0x78] ss:$12 sps:$4 sm:$0xff]   ;;  %v858_v32 = vld [vmem:[%s1171_s1 + $0x94] ss:$12 sps:$4 sm:$0xff]  }
   0x9   :  { %390 = vmatpush1.bf16.msra.mxu0 %v841_v15  ;;  %813 = vmatprep.subr.bf16.mxu1 %v848_v24  ;;  %v856_v30 = vld [vmem:[%s1171_s1 + $0x50] ss:$12 sps:$4 sm:$0xff]   ;;  %v860_v33 = vld [vmem:[%s1171_s1 + $0x68] ss:$12 sps:$4 sm:$0xff]   ;;  %v862_v35 = vld [vmem:[%s1171_s1 + $0xac] ss:$12 sps:$4 sm:$0xff]  }
   0xa   :  { %61 = vadd.xlane.f32.xlu0 %v934_v4  ;;  %391 = vmatprep.subr.bf16.mxu0 %v842_v18  ;;  %v861_v34 = vld [vmem:[%s1171_s1 + $0x90] ss:$12 sps:$4 sm:$0xff]   ;;  %v864_v36 = vld [vmem:[%s1171_s1 + $0x80] ss:$12 sps:$4 sm:$0xff]   ;;  %v865_v37 = vld [vmem:[%s1171_s1 + $0xa8] ss:$12 sps:$4 sm:$0xff]  }
   0xb   :  { %v866_v38 = vld [vmem:[%s1171_s1 + $0x98] ss:$12 sps:$4 sm:$0xff]   ;;  %v867_v40 = vld [vmem:[%s1171_s1 + $0xb0] ss:$12 sps:$4 sm:$0xff]  }
   0xc   :  { %63 = vadd.xlane.f32.xlu1 %v939_v5  ;;  %814 = vmatpush3.bf16.msra.mxu1 %v848_v24 }
   0xd   :  { %392 = vmatpush1.bf16.msra.mxu0 %v845_v20  ;;  %815 = vmatprep.subr.bf16.mxu1 %v852_v27 }
   0xe   :  { %93 = vadd.xlane.f32.xlu0 %v83_v6  ;;  %393 = vmatprep.subr.bf16.mxu0 %v846_v23 }
  0x10   :  { %95 = vadd.xlane.f32.xlu1 %v84_v7  ;;  %816 = vmatpush3.bf16.msra.mxu1 %v852_v27 }
  0x11   :  { %394 = vmatpush1.bf16.msra.mxu0 %v849_v25  ;;  %817 = vmatprep.subr.bf16.mxu1 %v856_v30 }
  0x12   :  { %65 = vadd.xlane.f32.xlu0 %v950_v8  ;;  %395 = vmatprep.subr.bf16.mxu0 %v850_v26 }
  0x14   :  { %67 = vadd.xlane.f32.xlu1 %v955_v9  ;;  %818 = vmatpush3.bf16.msra.mxu1 %v856_v30 }
  0x15   :  { %396 = vmatpush1.bf16.msra.mxu0 %v853_v28  ;;  %819 = vmatprep.subr.bf16.mxu1 %v860_v33 }
  0x16   :  { %97 = vadd.xlane.f32.xlu0 %v85_v12  ;;  %397 = vmatprep.subr.bf16.mxu0 %v854_v29 }
  0x18   :  { %99 = vadd.xlane.f32.xlu1 %v86_v14  ;;  %820 = vmatpush3.bf16.msra.mxu1 %v860_v33 }
  0x19   :  { %398 = vmatpush1.bf16.msra.mxu0 %v857_v31  ;;  %821 = vmatprep.subr.bf16.mxu1 %v864_v36  ;;  %v1072_v31 = vld [vmem:[%s1172_s2] ss:$0 sm:$0xff] }
  0x1a   :  { %69 = vadd.xlane.f32.xlu0 %v978_v16  ;;  %399 = vmatprep.subr.bf16.mxu0 %v858_v32 }
  0x1c   :  { %71 = vadd.xlane.f32.xlu1 %v983_v17  ;;  %822 = vmatpush3.bf16.msra.mxu1 %v864_v36 }
  0x1d   :  { %400 = vmatpush1.bf16.msra.mxu0 %v861_v34  ;;  %823 = vmatprep.subr.bf16.mxu1 %v866_v38 }
  0x1e   :  { %101 = vadd.xlane.f32.xlu0 %v87_v21  ;;  %401 = vmatprep.subr.bf16.mxu0 %v862_v35 }
  0x20   :  { %103 = vadd.xlane.f32.xlu1 %v88_v22  ;;  %824 = vmatpush3.bf16.msra.mxu1 %v866_v38 }
  0x21   :  { %402 = vmatpush1.bf16.msra.mxu0 %v865_v37  ;;  %825 = vmatprep.subr.bf16.mxu1 %v867_v40 }
  0x24   :  { %826 = vmatpush3.bf16.msra.mxu1 %v867_v40 }
  0x8f   :  { %v58_v41 = vpop.xlane.xlu0 %57 }
  0x90   :  { %v73_v42 = vmul.f32 0.0078125, %v58_v41 }
  0x91   :  { %v90_v43 = vpop.xlane.xlu1 %89 }
  0x92   :  { %v113_v44 = vmul.f32 %v73_v42, %v73_v42  ;;  %v105_v45 = vmul.f32 0.0078125, %v90_v43  ;;  %v137_v20 = vsub.f32 %v918_v0, %v73_v42 }
  0x93   :  { %v60_v46 = vpop.xlane.xlu0 %59 }
  0x94   :  { %v121_v47 = vsub.f32 %v105_v45, %v113_v44  ;;  %v74_v48 = vmul.f32 0.0078125, %v60_v46  ;;  %v742_v44 = vld [vmem:[%s1173_s3] ss:$0 sm:$0xff] }
  0x95   :  { %v92_v49 = vpop.xlane.xlu1 %91 }
  0x96   :  { %v129_v50 = vmax.f32 %v121_v47, 0.0  ;;  %v114_v51 = vmul.f32 %v74_v48, %v74_v48  ;;  %v106_v52 = vmul.f32 0.0078125, %v92_v49  ;;  %v138_v0 = vsub.f32 %v923_v1, %v74_v48 }
  0x97   :  { %v62_v53 = vpop.xlane.xlu0 %61 }
  0x98   :  { %v145_v54 = vadd.f32 1e-05, %v129_v50  ;;  %v122_v55 = vsub.f32 %v106_v52, %v114_v51  ;;  %v1052_v56 = vmul.f32 0.0078125, %v62_v53 }
  0x99   :  { %v64_v57 = vpop.xlane.xlu1 %63 }
  0x9a   :  { %868 = vrsqrt.f32 %v145_v54  ;;  %v130_v58 = vmax.f32 %v122_v55, 0.0  ;;  %v115_v59 = vmul.f32 %v1052_v56, %v1052_v56  ;;  %v1056_v60 = vmul.f32 0.0078125, %v64_v57 }
  0x9b   :  { %v94_v61 = vpop.xlane.xlu0 %93  ;;  %v139_v49 = vsub.f32 %v934_v4, %v1052_v56 }
  0x9c   :  { %v146_v62 = vadd.f32 1e-05, %v130_v58  ;;  %v107_v63 = vmul.f32 0.0078125, %v94_v61  ;;  %v116_v3 = vmul.f32 %v1056_v60, %v1056_v60  ;;  %v140_v58 = vsub.f32 %v939_v5, %v1056_v60 }
  0x9d   :  { %v96_v2 = vpop.xlane.xlu1 %95 }
  0x9e   :  { %870 = vrsqrt.f32 %v146_v62  ;;  %v123_v6 = vsub.f32 %v107_v63, %v115_v59  ;;  %v108_v7 = vmul.f32 0.0078125, %v96_v2 }
  0x9f   :  { %v66_v10 = vpop.xlane.xlu0 %65 }
  0xa0   :  { %v131_v11 = vmax.f32 %v123_v6, 0.0  ;;  %v124_v12 = vsub.f32 %v108_v7, %v116_v3  ;;  %v1060_v13 = vmul.f32 0.0078125, %v66_v10 }
  0xa1   :  { %v68_v14 = vpop.xlane.xlu1 %67 }
  0xa2   :  { %v147_v15 = vadd.f32 1e-05, %v131_v11  ;;  %v132_v18 = vmax.f32 %v124_v12, 0.0  ;;  %v117_v19 = vmul.f32 %v1060_v13, %v1060_v13  ;;  %v1065_v21 = vmul.f32 0.0078125, %v68_v14 }
  0xa3   :  { %v98_v22 = vpop.xlane.xlu0 %97  ;;  %v141_v5 = vsub.f32 %v950_v8, %v1060_v13 }
  0xa4   :  { %v869_v23 = vpop.eup %868  ;;  %872 = vrsqrt.f32 %v147_v15  ;;  %v148_v24 = vadd.f32 1e-05, %v132_v18  ;;  %v109_v25 = vmul.f32 0.0078125, %v98_v22  ;;  %v118_v28 = vmul.f32 %v1065_v21, %v1065_v21 }
  0xa5   :  { %v100_v26 = vpop.xlane.xlu1 %99  ;;  %v161_v27 = vmul.f32 %v869_v23, %v137_v20  ;;  %v142_v14 = vsub.f32 %v955_v9, %v1065_v21 }
  0xa6   :  { %874 = vrsqrt.f32 %v148_v24  ;;  %v125_v29 = vsub.f32 %v109_v25, %v117_v19  ;;  %v110_v30 = vmul.f32 0.0078125, %v100_v26 }
  0xa7   :  { %v70_v32 = vpop.xlane.xlu0 %69  ;;  %v176_v40 = vmul.f32 %v1072_v31, %v161_v27 }
  0xa8   :  { %v871_v33 = vpop.eup %870  ;;  %v133_v34 = vmax.f32 %v125_v29, 0.0  ;;  %v126_v35 = vsub.f32 %v110_v30, %v118_v28  ;;  %v79_v36 = vmul.f32 0.0078125, %v70_v32 }
  0xa9   :  { %v72_v37 = vpop.xlane.xlu1 %71  ;;  %v162_v38 = vmul.f32 %v871_v33, %v138_v0  ;;  %v191_v51 = vadd.f32 %v742_v44, %v176_v40  ;;  %v602_v33 = vlaneseq }
  0xaa   :  { %v149_v41 = vadd.f32 1e-05, %v133_v34  ;;  %v134_v42 = vmax.f32 %v126_v35, 0.0  ;;  %v119_v43 = vmul.f32 %v79_v36, %v79_v36  ;;  %v80_v45 = vmul.f32 0.0078125, %v72_v37  ;;  %v600_v35 = vld [vmem:[%s1174_s4] sm:$0x7] }
  0xab   :  { %v102_v46 = vpop.xlane.xlu0 %101  ;;  %v177_v1 = vmul.f32 %v1072_v31, %v162_v38  ;;  %v143_v8 = vsub.f32 %v978_v16, %v79_v36  ;;  %v603_v34 = vshrl.u32 %v602_v33, 7 }
  0xac   :  { %876 = vrsqrt.f32 %v149_v41  ;;  %v150_v47 = vadd.f32 1e-05, %v134_v42  ;;  %v111_v48 = vmul.f32 0.0078125, %v102_v46  ;;  %v120_v54 = vmul.f32 %v80_v45, %v80_v45 }
  0xad   :  { %v104_v50 = vpop.xlane.xlu1 %103  ;;  %v192_v52 = vadd.f32 %v742_v44, %v177_v1  ;;  %v144_v26 = vsub.f32 %v983_v17, %v80_v45  ;;  %v604_v17 = vsub.s32 0, %v603_v34  ;;  %v608_v36 = vsub.s32 1, %v603_v34 }
  0xae   :  { %v873_v53 = vpop.eup %872  ;;  %878 = vrsqrt.f32 %v150_v47  ;;  %v127_v55 = vsub.f32 %v111_v48, %v119_v43  ;;  %v112_v57 = vmul.f32 0.0078125, %v104_v50  ;;  %v612_v41 = vsub.s32 2, %v603_v34 }
  0xaf   :  { %v199_v59 = vpack.c.bf16 %v192_v52, %v191_v51  ;;  %v163_v61 = vmul.f32 %v873_v53, %v139_v49  ;;  %v1102_v37 = vrot.slane %v600_v35, %v604_v17  ;;  %v1104_v38 = vrot.slane %v600_v35, %v608_v36 }
  0xb0   :  { %v875_v62 = vpop.eup %874  ;;  %v135_v63 = vmax.f32 %v127_v55, 0.0  ;;  %v128_v2 = vsub.f32 %v112_v57, %v120_v54  ;;  %v613_v47 = vrot.slane %v600_v35, %v612_v41 }
  0xb1   :  { %420 = vmatmul.mubr.bf16.vlgmr.msra.gmra.mrb[0].mxu0 %v199_v59  ;;  %827 = vmatprep.mubr.bf16.mxu1 %v199_v59  ;;  %v164_v3 = vmul.f32 %v875_v62, %v140_v58  ;;  %v178_v4 = vmul.f32 %v1072_v31, %v163_v61 }
  0xb2   :  { %v151_v56 = vadd.f32 1e-05, %v135_v63  ;;  %v136_v6 = vmax.f32 %v128_v2, 0.0  ;;  %429 = vmatprep.mubr.bf16.mxu0 %v884_v39 }
  0xb3   :  { %v179_v7 = vmul.f32 %v1072_v31, %v164_v3  ;;  %v193_v60 = vadd.f32 %v742_v44, %v178_v4 }
  0xb4   :  { %880 = vrsqrt.f32 %v151_v56  ;;  %v152_v10 = vadd.f32 1e-05, %v136_v6 }
  0xb5   :  { %v194_v11 = vadd.f32 %v742_v44, %v179_v7 }
  0xb6   :  { %v877_v12 = vpop.eup %876  ;;  %882 = vrsqrt.f32 %v152_v10 }
  0xb7   :  { %v200_v15 = vpack.c.bf16 %v194_v11, %v193_v60  ;;  %v165_v18 = vmul.f32 %v877_v12, %v141_v5 }
  0xb8   :  { %v879_v19 = vpop.eup %878 }
  0xb9   :  { %430 = vmatmul.mubr.bf16.gmra.mrb[4].mxu0 %v200_v15  ;;  %828 = vmatmul.mubr.bf16.vlgmr.msra.gmra.mrb[0].mxu1 %v200_v15  ;;  %v166_v20 = vmul.f32 %v879_v19, %v142_v14  ;;  %v180_v22 = vmul.f32 %v1072_v31, %v165_v18 }
  0xba   :  { %439 = vmatprep.mubr.bf16.mxu0 %v884_v39 }
  0xbb   :  { %v181_v23 = vmul.f32 %v1072_v31, %v166_v20  ;;  %v195_v13 = vadd.f32 %v742_v44, %v180_v22 }
  0xbd   :  { %v196_v24 = vadd.f32 %v742_v44, %v181_v23 }
  0xbe   :  { %v881_v25 = vpop.eup %880 }
  0xbf   :  { %v201_v9 = vpack.c.bf16 %v196_v24, %v195_v13  ;;  %v167_v21 = vmul.f32 %v881_v25, %v143_v8 }
  0xc0   :  { %v883_v27 = vpop.eup %882 }
  0xc1   :  { %440 = vmatmul.mubr.bf16.gmra.mrb[8].mxu0 %v201_v9  ;;  %831 = vmatprep.mubr.bf16.mxu1 %v201_v9  ;;  %v168_v28 = vmul.f32 %v883_v27, %v144_v26  ;;  %v182_v29 = vmul.f32 %v1072_v31, %v167_v21 }
  0xc2   :  { %449 = vmatprep.mubr.bf16.mxu0 %v884_v39 }
  0xc3   :  { %v183_v30 = vmul.f32 %v1072_v31, %v168_v28  ;;  %v197_v0 = vadd.f32 %v742_v44, %v182_v29 }
  0xc5   :  { %v198_v32 = vadd.f32 %v742_v44, %v183_v30 }
  0xc7   :  { %v202_v16 = vpack.c.bf16 %v198_v32, %v197_v0 }
  0xc9   :  { %450 = vmatmul.mubr.bf16.gmra.mrb[12].mxu0 %v202_v16  ;;  %832 = vmatmul.mubr.bf16.gmra.mrb[4].mxu1 %v202_v16 }
 0x184   :  { %v421_v39 = vpop.f32.mrb[0].mxu0 }
 0x185   :  { %v617_v31 = vadd.f32 %v1102_v37, %v421_v39  ;;  %v423_v40 = vpop.f32.mrb[1].mxu0 }
 0x186   :  { %v618_v42 = vadd.f32 %v1104_v38, %v423_v40  ;;  %v425_v43 = vpop.f32.mrb[2].mxu0 }
 0x187   :  { %v620_v44 = vadd.f32 %v1102_v37, %v425_v43  ;;  %v427_v45 = vpop.f32.mrb[3].mxu0 }
 0x188   :  { %v783_v46 = vpack.c.bf16 %v618_v42, %v617_v31  ;;  %v621_v1 = vadd.f32 %v1104_v38, %v427_v45 }
 0x18a   :  { %721 = vst [vmem:[%s1175_s5] sm:$0xff] %v783_v46  ;;  %v785_v48 = vpack.c.bf16 %v621_v1, %v620_v44 }
 0x18c   :  { %723 = vst [vmem:[%s1175_s5 + $0xc] sm:$0xff] %v785_v48  ;;  %v431_v49 = vpop.f32.mrb[4].mxu0  ;;  %v829_v50 = vpop.f32.mrb[0].mxu1 }
 0x18d   :  { %v623_v51 = vadd.f32 %v1102_v37, %v431_v49  ;;  %v625_v52 = vadd.f32 %v829_v50, %v613_v47  ;;  %v433_v53 = vpop.f32.mrb[5].mxu0  ;;  %v494_v54 = vpop.f32.mrb[1].mxu1 }
 0x18e   :  { %v624_v55 = vadd.f32 %v1104_v38, %v433_v53  ;;  %v619_v57 = vadd.f32 %v613_v47, %v494_v54  ;;  %v435_v58 = vpop.f32.mrb[6].mxu0  ;;  %v830_v59 = vpop.f32.mrb[2].mxu1 }
 0x18f   :  { %v788_v61 = vpack.c.bf16 %v625_v52, %v625_v52  ;;  %v626_v62 = vadd.f32 %v1102_v37, %v435_v58  ;;  %v628_v63 = vadd.f32 %v830_v59, %v613_v47  ;;  %v437_v2 = vpop.f32.mrb[7].mxu0  ;;  %v497_v3 = vpop.f32.mrb[3].mxu1 }
 0x190   :  { %v787_v4 = vpack.c.bf16 %v624_v55, %v623_v51  ;;  %v784_v56 = vpack.c.bf16 %v619_v57, %v619_v57  ;;  %v627_v6 = vadd.f32 %v1104_v38, %v437_v2  ;;  %v622_v7 = vadd.f32 %v613_v47, %v497_v3 }
 0x191   :  { %726 = vst [vmem:[%s1175_s5 + $0x20] sm:$0xf] %v788_v61  ;;  %v790_v10 = vpack.c.bf16 %v628_v63, %v628_v63 }
 0x192   :  { %725 = vst [vmem:[%s1175_s5 + $0x18] sm:$0xff] %v787_v4  ;;  %722 = vst [vmem:[%s1175_s5 + $0x8] sm:$0xf] %v784_v56  ;;  %v789_v5 = vpack.c.bf16 %v627_v6, %v626_v62  ;;  %v786_v60 = vpack.c.bf16 %v622_v7, %v622_v7 }
 0x193   :  { %728 = vst [vmem:[%s1175_s5 + $0x2c] sm:$0xf] %v790_v10 }
 0x194   :  { %727 = vst [vmem:[%s1175_s5 + $0x24] sm:$0xff] %v789_v5  ;;  %724 = vst [vmem:[%s1175_s5 + $0x14] sm:$0xf] %v786_v60  ;;  %v441_v11 = vpop.f32.mrb[8].mxu0 }
 0x195   :  { %v629_v12 = vadd.f32 %v1102_v37, %v441_v11  ;;  %v443_v14 = vpop.f32.mrb[9].mxu0 }
 0x196   :  { %v630_v15 = vadd.f32 %v1104_v38, %v443_v14  ;;  %v445_v18 = vpop.f32.mrb[10].mxu0 }
 0x197   :  { %v632_v19 = vadd.f32 %v1102_v37, %v445_v18  ;;  %v447_v20 = vpop.f32.mrb[11].mxu0 }
 0x198   :  { %v791_v22 = vpack.c.bf16 %v630_v15, %v629_v12  ;;  %v633_v23 = vadd.f32 %v1104_v38, %v447_v20 }
 0x19a   :  { %729 = vst [vmem:[%s1175_s5 + $0x30] sm:$0xff] %v791_v22  ;;  %v793_v8 = vpack.c.bf16 %v633_v23, %v632_v19 }
 0x19c   :  { %731 = vst [vmem:[%s1175_s5 + $0x3c] sm:$0xff] %v793_v8  ;;  %v451_v13 = vpop.f32.mrb[12].mxu0  ;;  %v833_v24 = vpop.f32.mrb[4].mxu1 }
 0x19d   :  { %v635_v25 = vadd.f32 %v1102_v37, %v451_v13  ;;  %v637_v26 = vadd.f32 %v833_v24, %v613_v47  ;;  %v453_v9 = vpop.f32.mrb[13].mxu0  ;;  %v510_v21 = vpop.f32.mrb[5].mxu1 }
 0x19e   :  { %v636_v27 = vadd.f32 %v1104_v38, %v453_v9  ;;  %v631_v28 = vadd.f32 %v613_v47, %v510_v21  ;;  %v455_v29 = vpop.f32.mrb[14].mxu0  ;;  %v834_v30 = vpop.f32.mrb[6].mxu1 }
 0x19f   :  { %v796_v0 = vpack.c.bf16 %v637_v26, %v637_v26  ;;  %v638_v32 = vadd.f32 %v1102_v37, %v455_v29  ;;  %v640_v16 = vadd.f32 %v834_v30, %v613_v47  ;;  %v457_v33 = vpop.f32.mrb[15].mxu0  ;;  %v513_v34 = vpop.f32.mrb[7].mxu1 }
 0x1a0   :  { %v795_v17 = vpack.c.bf16 %v636_v27, %v635_v25  ;;  %v792_v35 = vpack.c.bf16 %v631_v28, %v631_v28  ;;  %v639_v36 = vadd.f32 %v1104_v38, %v457_v33  ;;  %v634_v39 = vadd.f32 %v613_v47, %v513_v34 }
 0x1a1   :  { %734 = vst [vmem:[%s1175_s5 + $0x50] sm:$0xf] %v796_v0  ;;  %v798_v31 = vpack.c.bf16 %v640_v16, %v640_v16 }
 0x1a2   :  { %733 = vst [vmem:[%s1175_s5 + $0x48] sm:$0xff] %v795_v17  ;;  %730 = vst [vmem:[%s1175_s5 + $0x38] sm:$0xf] %v792_v35  ;;  %v797_v37 = vpack.c.bf16 %v639_v36, %v638_v32  ;;  %v794_v40 = vpack.c.bf16 %v634_v39, %v634_v39 }
 0x1a3   :  { %736 = vst [vmem:[%s1175_s5 + $0x5c] sm:$0xf] %v798_v31 }
 0x1a4   :  { %735 = vst [vmem:[%s1175_s5 + $0x54] sm:$0xff] %v797_v37  ;;  %732 = vst [vmem:[%s1175_s5 + $0x44] sm:$0xf] %v794_v40 }

// kernel: audio_encoder_forward.16
= control target key start
LH: loop header
LB: loop body
LE: loop exit
PB: predicated region body
PF: predicated region fallthrough
CT: control target
= control target key end

     0   :  { %s2395_s12 = smov 0   ;;  %s2397_s13 = smov 0   ;;  %s3064_s0 = inlined_call_operand.vmem [shape: bf16[2,32,384], index: 0, kind: input, shape index: {}, may-alias: {0,1,2}]   ;;  %s3065_s1 = inlined_call_operand.vmem [shape: bf16[2,32,384], index: 1, kind: input, shape index: {}, may-alias: {0,1,2}]   ;;  %s3066_s2 = inlined_call_operand.vmem [shape: bf16[2,32,384], index: 2, kind: input, shape index: {}, may-alias: {0,1,2}]   ;;  %s3067_s3 = inlined_call_operand.vmem [shape: bf16[2,32,128], index: 3, kind: output, shape index: {}]  }
   0x1   :  { %s2399_s14 = smov 0   ;;  %s2401_s15 = smov 0  }
   0x2   :  { %s2403_s16 = smov 0  }
   0x3 LB: > { %s32_s17 = sadd.s32 1, %s2363_s15  ;;  %p48_p1 = scmp.ne.s32.totalorder %s2355_s13, %s2351_s12  ;;  %s2367_s16 = sphi %s2403_s16, %s13_s16   ;;  %s2363_s15 = sphi %s2401_s15, %s3086_s15   ;;  %s2359_s14 = sphi %s2399_s14, %s3085_s14   ;;  %s2355_s13 = sphi %s2397_s13, %s3084_s13   ;;  %s2351_s12 = sphi %s2395_s12, %s3083_s12  }
   0x4   : > { %p34_p0 = scmp.ge.s32.totalorder %s32_s17, 2  ;;  %p49_p2 = scmp.eq.s32.totalorder %s2367_s16, 0 }
   0x5   : > { %s41_s20 = sadd.s32 1, %s2355_s13  ;;  %p1996_p5 = scmp.ge.s32.totalorder %s2367_s16, 2 }
   0x6   : > { %s3088_s17 = smov (%p34_p0, %s32_s17), 0  ;;  %p2426_p3 = por %p49_p2, %p48_p1 }
   0x7   : > { %s36_s19 = ssub.s32 %s2363_s15, %s3088_s17  ;;  %158 = sbr.rel (%p1996_p5) target bundleno = 35 (0x23), region = 16 }
   0x8   : > { %p39_p4 = scmp.eq.s32.totalorder %s36_s19, 0 }
   0xa   : > { %s2434_s21 = scalar_select %p39_p4, %s2355_s13, %s41_s20  }
   0xe   : > { %161 = sbr.rel (!%p2426_p3) target bundleno = 21 (0x15), region = 20  ;;  %s163_s22 = sand.u32 (%p2426_p3), 1, %s2355_s13  }
   0xf   : > { %s2178_s23 = smul.u32 (%p2426_p3), 48, %s2363_s15  ;;  %s1997_s24 = sshll.u32 (%p2426_p3), %s163_s22, 4 }
  0x10   : > { %s165_s28 = scalar_lea.vmem (%p2426_p3), [#allocation5], %s1997_s24 }
  0x11   : > { %s171_s27 = scalar_lea.vmem (%p2426_p3), %s3064_s0, %s2178_s23 }
  0x12   : > { %v187_v0 = vld [vmem:[%s171_s27] sm:$0xf] (%p2426_p3)  ;;  %v189_v1 = vld [vmem:[%s171_s27 + $0xc] sm:$0xf] (%p2426_p3)  ;;  %v191_v2 = vld [vmem:[%s171_s27 + $0x18] sm:$0xf] (%p2426_p3) }
  0x13   : > { %188 = vst [vmem:[%s165_s28] sm:$0xf] (%p2426_p3), %v187_v0  ;;  %190 = vst [vmem:[%s165_s28 + $0x4] sm:$0xf] (%p2426_p3), %v189_v1  ;;  %v193_v3 = vld [vmem:[%s171_s27 + $0x24] sm:$0xf] (%p2426_p3) }
  0x14   : > { %192 = vst [vmem:[%s165_s28 + $0x8] sm:$0xf] (%p2426_p3), %v191_v2  ;;  %194 = vst [vmem:[%s165_s28 + $0xc] sm:$0xf] (%p2426_p3), %v193_v3 }
  0x15 PF: > { %225 = sbr.rel (!%p2426_p3) target bundleno = 28 (0x1c), region = 61  ;;  %s227_s29 = sand.u32 (%p2426_p3), 1, %s2355_s13  }
  0x16   : > { %s2000_s30 = smul.u32 (%p2426_p3), 48, %s2363_s15  ;;  %s1999_s4 = sshll.u32 (%p2426_p3), %s227_s29, 4 }
  0x17   : > { %s229_s8 = scalar_lea.vmem (%p2426_p3), [#allocation6], %s1999_s4 }
  0x18   : > { %s1899_s7 = scalar_lea.vmem (%p2426_p3), %s3065_s1, %s2000_s30 }
  0x19   : > { %v2001_v4 = vld [vmem:[%s1899_s7 + $0x4] sm:$0xf] (%p2426_p3)  ;;  %v2002_v5 = vld [vmem:[%s1899_s7 + $0x10] sm:$0xf] (%p2426_p3)  ;;  %v2003_v6 = vld [vmem:[%s1899_s7 + $0x1c] sm:$0xf] (%p2426_p3) }
  0x1a   : > { %253 = vst [vmem:[%s229_s8] sm:$0xf] (%p2426_p3), %v2001_v4  ;;  %255 = vst [vmem:[%s229_s8 + $0x4] sm:$0xf] (%p2426_p3), %v2002_v5  ;;  %v2004_v7 = vld [vmem:[%s1899_s7 + $0x28] sm:$0xf] (%p2426_p3) }
  0x1b   : > { %257 = vst [vmem:[%s229_s8 + $0x8] sm:$0xf] (%p2426_p3), %v2003_v6  ;;  %259 = vst [vmem:[%s229_s8 + $0xc] sm:$0xf] (%p2426_p3), %v2004_v7 }
  0x1c PF: > { %290 = sbr.rel (!%p2426_p3) target bundleno = 35 (0x23), region = 102  ;;  %s292_s9 = sand.u32 (%p2426_p3), 1, %s2355_s13  }
  0x1d   : > { %s2006_s10 = smul.u32 (%p2426_p3), 48, %s2363_s15  ;;  %s2005_s11 = sshll.u32 (%p2426_p3), %s292_s9, 4 }
  0x1e   : > { %s294_s23 = scalar_lea.vmem (%p2426_p3), [#allocation7], %s2005_s11 }
  0x1f   : > { %s1907_s22 = scalar_lea.vmem (%p2426_p3), %s3066_s2, %s2006_s10 }
  0x20   : > { %v2007_v8 = vld [vmem:[%s1907_s22 + $0x8] sm:$0xf] (%p2426_p3)  ;;  %v2008_v9 = vld [vmem:[%s1907_s22 + $0x14] sm:$0xf] (%p2426_p3)  ;;  %v2009_v10 = vld [vmem:[%s1907_s22 + $0x20] sm:$0xf] (%p2426_p3) }
  0x21   : > { %318 = vst [vmem:[%s294_s23] sm:$0xf] (%p2426_p3), %v2007_v8  ;;  %320 = vst [vmem:[%s294_s23 + $0x4] sm:$0xf] (%p2426_p3), %v2008_v9  ;;  %v2010_v11 = vld [vmem:[%s1907_s22 + $0x2c] sm:$0xf] (%p2426_p3) }
  0x22   : > { %322 = vst [vmem:[%s294_s23 + $0x8] sm:$0xf] (%p2426_p3), %v2009_v10  ;;  %324 = vst [vmem:[%s294_s23 + $0xc] sm:$0xf] (%p2426_p3), %v2010_v11 }
  0x23 PF: > { %p2011_p6 = scmp.ge.s32.totalorder %s2367_s16, 1  ;;  %p354_p7 = scmp.lt.s32.totalorder %s2367_s16, 3 }
  0x25   : > { %p355_p8 = pnand %p2011_p6, %p354_p7 }
  0x26   : > { %s361_s18 = sand.u32 (!%p355_p8), 1, %s2351_s12   ;;  %vm461_vm0 = vcmask (!%p355_p8), 261120   ;;  %s2369_s26 = smov (!%p355_p8), 96   ;;  %vm428_vm1 = vcmask (!%p355_p8), 7168   ;;  %v2372_v44 = vmov (!%p355_p8), -inf   ;;  %v2373_v45 = vmov (!%p355_p8), 0  }
  0x27   : > { %358 = sbr.rel (%p355_p8) target bundleno = 1122 (0x462), region = 143  ;;  %s2461_s24 = sshll.u32 (!%p355_p8), %s361_s18, 4  ;;  %431 = vst.msk [vmem:[#allocation2 + $0x10] sm:$0xff] (!%p355_p8), %vm428_vm1, %v2372_v44  ;;  %429 = vst.msk [vmem:[#allocation2] sm:$0xff] (!%p355_p8), %vm428_vm1, %v2372_v44  ;;  %2225 = vset.pattern.permute.xlu1 (!%p355_p8), %v2373_v45  ;;  %2226 = vset.pattern.permute.xlu0 (!%p355_p8), %v2373_v45  ;;  %v2374_v62 = vmov (!%p355_p8), 0.0   ;;  %vm1680_vm2 = vcmask (!%p355_p8), 257024  }
  0x28   : > { %s370_s25 = scalar_lea.vmem (!%p355_p8), [#allocation6], %s2461_s24  ;;  %s2370_s27 = smov (!%p355_p8), 64   ;;  %430 = vst.msk [vmem:[#allocation2 + $0x8] sm:$0xff] (!%p355_p8), %vm428_vm1, %v2372_v44  ;;  %432 = vst.msk [vmem:[#allocation2 + $0x18] sm:$0xff] (!%p355_p8), %vm428_vm1, %v2372_v44  ;;  %vm1737_vm3 = vcmask (!%p355_p8), 519424   ;;  %vm1794_vm4 = vcmask (!%p355_p8), 781824  }
  0x29   : > { %v2227_v12 = vld [vmem:[%s370_s25] sm:$0xff] (!%p355_p8)   ;;  %v2228_v13 = vld [vmem:[%s370_s25 + $0x8] sm:$0xff] (!%p355_p8)   ;;  %s363_s28 = scalar_lea.vmem (!%p355_p8), [#allocation5], %s2461_s24  ;;  %s2371_s12 = smov (!%p355_p8), 32   ;;  %433 = vst.msk [vmem:[#allocation2 + $0x20] sm:$0xff] (!%p355_p8), %vm428_vm1, %v2372_v44  ;;  %434 = vst.msk [vmem:[#allocation2 + $0x28] sm:$0xff] (!%p355_p8), %vm428_vm1, %v2372_v44 }
  0x2a   : > { %576 = vrot.lane.b32.xlu0 (!%p355_p8), %v2227_v12, %s2369_s26  ;;  %645 = vrot.lane.b32.xlu1 (!%p355_p8), %v2227_v12, %s2370_s27  ;;  %v518_v14 = vsel (!%p355_p8), %vm461_vm0, %v2227_v12, 0  ;;  %v2229_v15 = vld [vmem:[%s363_s28] sm:$0xff] (!%p355_p8)   ;;  %v2230_v16 = vld [vmem:[%s363_s28 + $0x8] sm:$0xff] (!%p355_p8)   ;;  %v521_v17 = vsel (!%p355_p8), %vm461_vm0, %v2228_v13, 0  ;;  %435 = vst.msk [vmem:[#allocation2 + $0x30] sm:$0xff] (!%p355_p8), %vm428_vm1, %v2372_v44  ;;  %436 = vst.msk [vmem:[#allocation2 + $0x38] sm:$0xff] (!%p355_p8), %vm428_vm1, %v2372_v44 }
  0x2b   : > { %2170 = vmatprep.subr.msk.bf16.mxu0 (!%p355_p8), %vm461_vm0, %v2227_v12  ;;  %2110 = vmatprep.mubr.msk.bf16.mxu0 (!%p355_p8), %vm461_vm0, %v2229_v15  ;;  %437 = vst.msk [vmem:[#allocation2 + $0x40] sm:$0xff] (!%p355_p8), %vm428_vm1, %v2372_v44  ;;  %438 = vst.msk [vmem:[#allocation2 + $0x48] sm:$0xff] (!%p355_p8), %vm428_vm1, %v2372_v44  ;;  %s377_s29 = scalar_lea.vmem (!%p355_p8), [#allocation7], %s2461_s24  ;;  %p414_p9 = scmp.lt.s32.totalorder (!%p355_p8), %s2359_s14, 1  ;;  %vm1851_vm5 = vcmask (!%p355_p8), 1044224  }
  0x2c   : > { %2107 = vmatpush3.bf16.xpose.msra.mxu0 (!%p355_p8), %v518_v14  ;;  %439 = vst.msk [vmem:[#allocation2 + $0x50] sm:$0xff] (!%p355_p8), %vm428_vm1, %v2372_v44  ;;  %440 = vst.msk [vmem:[#allocation2 + $0x58] sm:$0xff] (!%p355_p8), %vm428_vm1, %v2372_v44 }
  0x2d   : > { %2171 = vmatprep.subr.msk.bf16.mxu0 (!%p355_p8), %vm461_vm0, %v2228_v13  ;;  %441 = vst.msk [vmem:[#allocation2 + $0x60] sm:$0xff] (!%p355_p8), %vm428_vm1, %v2372_v44  ;;  %442 = vst.msk [vmem:[#allocation2 + $0x68] sm:$0xff] (!%p355_p8), %vm428_vm1, %v2372_v44 }
  0x2e   : > { %578 = vrot.lane.b32.xlu0 %v2228_v13, %s2369_s26  ;;  %572 = vrot.lane.b32.xlu1 %v2229_v15, %s2369_s26  ;;  %443 = vst.msk [vmem:[#allocation2 + $0x70] sm:$0xff] %vm428_vm1, %v2372_v44  ;;  %444 = vst.msk [vmem:[#allocation2 + $0x78] sm:$0xff] %vm428_vm1, %v2372_v44  ;;  %v2613_v7 = vld [vmem:[#allocation2 + $0x10] sm:$0xff]  ;;  %v2620_v11 = vld [vmem:[#allocation2] sm:$0xff]  ;;  %s3090_s14 = smov (!%p414_p9, %s2359_s14), 1 }
  0x2f   : > { %451 = vst.msk [vmem:[#allocation3 + $0x30] sm:$0xff] %vm428_vm1, %v2374_v62  ;;  %445 = vst.msk [vmem:[#allocation3] sm:$0xff] %vm428_vm1, %v2374_v62  ;;  %v2618_v10 = vld [vmem:[#allocation2 + $0x8] sm:$0xff]  ;;  %s2057_s30 = sshll.u32 %s3090_s14, 4 }
  0x30   : > { %446 = vst.msk [vmem:[#allocation3 + $0x8] sm:$0xff] %vm428_vm1, %v2374_v62  ;;  %447 = vst.msk [vmem:[#allocation3 + $0x10] sm:$0xff] %vm428_vm1, %v2374_v62  ;;  %s3018_s6 = scalar_lea.vmem %s3067_s3, %s2057_s30 }
  0x31   : > { %448 = vst.msk [vmem:[#allocation3 + $0x18] sm:$0xff] %vm428_vm1, %v2374_v62  ;;  %449 = vst.msk [vmem:[#allocation3 + $0x20] sm:$0xff] %vm428_vm1, %v2374_v62 }
  0x32   : > { %714 = vrot.lane.b32.xlu0 %v2227_v12, %s2371_s12  ;;  %574 = vrot.lane.b32.xlu1 %v2230_v16, %s2369_s26  ;;  %450 = vst.msk [vmem:[#allocation3 + $0x28] sm:$0xff] %vm428_vm1, %v2374_v62  ;;  %452 = vst.msk [vmem:[#allocation3 + $0x38] sm:$0xff] %vm428_vm1, %v2374_v62 }
  0x33   : > { %453 = vst.msk [vmem:[#allocation3 + $0x40] sm:$0xff] %vm428_vm1, %v2374_v62  ;;  %454 = vst.msk [vmem:[#allocation3 + $0x48] sm:$0xff] %vm428_vm1, %v2374_v62 }
  0x34   : > { %2109 = vmatpush3.bf16.xpose.msra.mxu0 %v521_v17  ;;  %455 = vst.msk [vmem:[#allocation3 + $0x50] sm:$0xff] %vm428_vm1, %v2374_v62  ;;  %456 = vst.msk [vmem:[#allocation3 + $0x58] sm:$0xff] %vm428_vm1, %v2374_v62 }
  0x35   : > { %457 = vst.msk [vmem:[#allocation3 + $0x60] sm:$0xff] %vm428_vm1, %v2374_v62  ;;  %458 = vst.msk [vmem:[#allocation3 + $0x68] sm:$0xff] %vm428_vm1, %v2374_v62 }
  0x36   : > { %647 = vrot.lane.b32.xlu0 %v2228_v13, %s2370_s27  ;;  %716 = vrot.lane.b32.xlu1 %v2228_v13, %s2371_s12  ;;  %459 = vst.msk [vmem:[#allocation3 + $0x70] sm:$0xff] %vm428_vm1, %v2374_v62  ;;  %460 = vst.msk [vmem:[#allocation3 + $0x78] sm:$0xff] %vm428_vm1, %v2374_v62 }
  0x37   : > { %462 = vst.msk [vmem:[#allocation4] sm:$0xff] %vm461_vm0, %v2374_v62  ;;  %463 = vst.msk [vmem:[#allocation4 + $0x8] sm:$0xff] %vm461_vm0, %v2374_v62 }
  0x38   : > { %464 = vst.msk [vmem:[#allocation4 + $0x10] sm:$0xff] %vm461_vm0, %v2374_v62  ;;  %465 = vst.msk [vmem:[#allocation4 + $0x18] sm:$0xff] %vm461_vm0, %v2374_v62 }
  0x39   : > { %466 = vst.msk [vmem:[#allocation4 + $0x20] sm:$0xff] %vm461_vm0, %v2374_v62  ;;  %467 = vst.msk [vmem:[#allocation4 + $0x28] sm:$0xff] %vm461_vm0, %v2374_v62 }
  0x3a   : > { %641 = vrot.lane.b32.xlu0 %v2229_v15, %s2370_s27  ;;  %643 = vrot.lane.b32.xlu1 %v2230_v16, %s2370_s27  ;;  %468 = vst.msk [vmem:[#allocation4 + $0x30] sm:$0xff] %vm461_vm0, %v2374_v62  ;;  %469 = vst.msk [vmem:[#allocation4 + $0x38] sm:$0xff] %vm461_vm0, %v2374_v62 }
  0x3b   : > { %2111 = vmatmul.mubr.msk.bf16.vlgmr.msra.gmra.mrb[0].mxu0 %vm461_vm0, %v2230_v16  ;;  %470 = vst.msk [vmem:[#allocation4 + $0x40] sm:$0xff] %vm461_vm0, %v2374_v62  ;;  %471 = vst.msk [vmem:[#allocation4 + $0x48] sm:$0xff] %vm461_vm0, %v2374_v62 }
  0x3c   : > { %472 = vst.msk [vmem:[#allocation4 + $0x50] sm:$0xff] %vm461_vm0, %v2374_v62  ;;  %473 = vst.msk [vmem:[#allocation4 + $0x58] sm:$0xff] %vm461_vm0, %v2374_v62 }
  0x3d   : > { %474 = vst.msk [vmem:[#allocation4 + $0x60] sm:$0xff] %vm461_vm0, %v2374_v62  ;;  %475 = vst.msk [vmem:[#allocation4 + $0x68] sm:$0xff] %vm461_vm0, %v2374_v62 }
  0x3e   : > { %710 = vrot.lane.b32.xlu0 %v2229_v15, %s2371_s12  ;;  %712 = vrot.lane.b32.xlu1 %v2230_v16, %s2371_s12  ;;  %476 = vst.msk [vmem:[#allocation4 + $0x70] sm:$0xff] %vm461_vm0, %v2374_v62  ;;  %477 = vst.msk [vmem:[#allocation4 + $0x78] sm:$0xff] %vm461_vm0, %v2374_v62  ;;  %v2717_v62 = vld [vmem:[#allocation2 + $0x48] sm:$0xff] }
  0x9c   : > { %v577_v18 = vpop.permute.xlu0 %576  ;;  %v646_v19 = vpop.permute.xlu1 %645 }
  0x9d   : > { %2172 = vmatprep.subr.msk.bf16.mxu1 %vm461_vm0, %v577_v18  ;;  %v587_v20 = vsel %vm461_vm0, %v577_v18, 0  ;;  %2174 = vmatprep.subr.msk.bf16.mxu0 %vm461_vm0, %v646_v19  ;;  %v656_v21 = vsel %vm461_vm0, %v646_v19, 0  ;;  %v2636_v18 = vld [vmem:[#allocation2 + $0x18] sm:$0xff] }
  0x9e   : > { %2115 = vmatpush3.bf16.xpose.msra.mxu1 %v587_v20  ;;  %2123 = vmatpush3.bf16.xpose.msra.mxu0 %v656_v21 }
  0xa0   : > { %v579_v22 = vpop.permute.xlu0 %578  ;;  %v573_v23 = vpop.permute.xlu1 %572 }
  0xa1   : > { %2173 = vmatprep.subr.msk.bf16.mxu1 %vm461_vm0, %v579_v22  ;;  %2118 = vmatprep.mubr.msk.bf16.mxu1 %vm461_vm0, %v573_v23  ;;  %v590_v26 = vsel %vm461_vm0, %v579_v22, 0  ;;  %v2654_v23 = vld [vmem:[%s377_s29] sm:$0xff]  }
  0xa4   : > { %v715_v24 = vpop.permute.xlu0 %714  ;;  %v575_v25 = vpop.permute.xlu1 %574 }
  0xa5   : > { %v725_v31 = vsel %vm461_vm0, %v715_v24, 0 }
  0xa6   : > { %2117 = vmatpush3.bf16.xpose.msra.mxu1 %v590_v26 }
  0xa7   : > { %2176 = vmatprep.subr.msk.bf16.mxu1 %vm461_vm0, %v715_v24  ;;  %v2656_v24 = vld [vmem:[%s377_s29 + $0x8] sm:$0xff]  }
  0xa8   : > { %v648_v27 = vpop.permute.xlu0 %647  ;;  %v717_v28 = vpop.permute.xlu1 %716 }
  0xa9   : > { %v659_v29 = vsel %vm461_vm0, %v648_v27, 0  ;;  %2175 = vmatprep.subr.msk.bf16.mxu0 %vm461_vm0, %v648_v27  ;;  %v728_v34 = vsel %vm461_vm0, %v717_v28, 0  ;;  %v2664_v27 = vld [vmem:[#allocation2 + $0x38] sm:$0xff] }
  0xaa   : > { %2125 = vmatpush3.bf16.xpose.msra.mxu0 %v659_v29 }
  0xab   : > { %2138 = vmatprep.subr.bf16.mxu0 %v2654_v23 }
  0xac   : > { %v642_v30 = vpop.permute.xlu0 %641  ;;  %v644_v32 = vpop.permute.xlu1 %643 }
  0xad   : > { %2119 = vmatmul.mubr.msk.bf16.vlgmr.msra.gmra.mrb[0].mxu1 %vm461_vm0, %v575_v25  ;;  %2126 = vmatprep.mubr.msk.bf16.mxu0 %vm461_vm0, %v642_v30  ;;  %v2662_v25 = vld [vmem:[#allocation2 + $0x30] sm:$0xff] }
  0xae   : > { %2131 = vmatpush3.bf16.xpose.msra.mxu1 %v725_v31  ;;  %v2669_v30 = vld [vmem:[#allocation2 + $0x50] sm:$0xff] }
  0xaf   : > { %2177 = vmatprep.subr.msk.bf16.mxu1 %vm461_vm0, %v717_v28 }
  0xb0   : > { %v711_v33 = vpop.permute.xlu0 %710  ;;  %v713_v35 = vpop.permute.xlu1 %712 }
  0xb1   : > { %2127 = vmatmul.mubr.msk.bf16.vlgmr.msra.gmra.mrb[4].mxu0 %vm461_vm0, %v644_v32  ;;  %2134 = vmatprep.mubr.msk.bf16.mxu1 %vm461_vm0, %v711_v33 }
  0xb2   : > { %2139 = vmatpush3.bf16.msra.mxu0 %v2654_v23 }
  0xb3   : > { %2140 = vmatprep.subr.bf16.mxu0 %v2656_v24 }
  0xb6   : > { %2133 = vmatpush3.bf16.xpose.msra.mxu1 %v728_v34  ;;  %2141 = vmatpush3.bf16.msra.mxu0 %v2656_v24  ;;  %v2679_v34 = vld [vmem:[#allocation2 + $0x58] sm:$0xff] }
  0xbd   : > { %2135 = vmatmul.mubr.msk.bf16.vlgmr.msra.gmra.mrb[4].mxu1 %vm461_vm0, %v713_v35 }
 0x10e   : > { %v2501_v36 = vpop.f32.mrb[0].mxu0 }
 0x10f   : > { %v801_v37 = vsel %vm461_vm0, %v2501_v36, -inf  ;;  %v2505_v38 = vpop.f32.mrb[1].mxu0 }
 0x110   : > { %802 = vmax.xlane.f32.xlu0 %v801_v37  ;;  %v2507_v39 = vpop.f32.mrb[2].mxu0  ;;  %v795_v40 = vsel %vm461_vm0, %v2505_v38, -inf }
 0x111   : > { %v2511_v41 = vpop.f32.mrb[3].mxu0  ;;  %v804_v43 = vsel %vm461_vm0, %v2507_v39, -inf }
 0x112   : > { %v798_v42 = vsel %vm461_vm0, %v2511_v41, -inf }
 0x113   : > { %799 = vmax.xlane.f32.xlu1 %v798_v42  ;;  %v2688_v42 = vld [vmem:[#allocation2 + $0x20] sm:$0xff] }
 0x114   : > { %796 = vmax.xlane.f32.xlu0 %v795_v40 }
 0x118   : > { %805 = vmax.xlane.f32.xlu0 %v804_v43 }
 0x180   : > { %v2533_v46 = vpop.f32.mrb[0].mxu1 }
 0x181   : > { %v2535_v47 = vpop.f32.mrb[1].mxu1  ;;  %v813_v48 = vsel %vm461_vm0, %v2533_v46, -inf }
 0x182   : > { %v2539_v49 = vpop.f32.mrb[2].mxu1  ;;  %814 = vmax.xlane.f32.xlu1 %v813_v48  ;;  %v807_v58 = vsel %vm461_vm0, %v2535_v47, -inf  ;;  %v2698_v48 = vld [vmem:[#allocation2 + $0x28] sm:$0xff] }
 0x183   : > { %v2541_v50 = vpop.f32.mrb[3].mxu1  ;;  %v816_v51 = vsel %vm461_vm0, %v2539_v49, -inf }
 0x184   : > { %817 = vmax.xlane.f32.xlu0 %v816_v51  ;;  %v2545_v52 = vpop.f32.mrb[4].mxu0  ;;  %v810_v59 = vsel %vm461_vm0, %v2541_v50, -inf }
 0x185   : > { %v2547_v53 = vpop.f32.mrb[5].mxu0  ;;  %v825_v54 = vsel %vm461_vm0, %v2545_v52, -inf }
 0x186   : > { %826 = vmax.xlane.f32.xlu1 %v825_v54  ;;  %v2551_v55 = vpop.f32.mrb[6].mxu0  ;;  %v819_v60 = vsel %vm461_vm0, %v2547_v53, -inf }
 0x187   : > { %v2553_v56 = vpop.f32.mrb[7].mxu0  ;;  %v828_v57 = vsel %vm461_vm0, %v2551_v55, -inf }
 0x188   : > { %829 = vmax.xlane.f32.xlu0 %v828_v57  ;;  %v822_v61 = vsel %vm461_vm0, %v2553_v56, -inf }
 0x18a   : > { %808 = vmax.xlane.f32.xlu1 %v807_v58  ;;  %v2707_v58 = vld [vmem:[#allocation2 + $0x40] sm:$0xff] }
 0x18c   : > { %811 = vmax.xlane.f32.xlu0 %v810_v59 }
 0x18e   : > { %820 = vmax.xlane.f32.xlu1 %v819_v60 }
 0x190   : > { %v2597_v63 = vpop.f32.mrb[4].mxu1  ;;  %823 = vmax.xlane.f32.xlu0 %v822_v61 }
 0x191   : > { %v2599_v0 = vpop.f32.mrb[5].mxu1  ;;  %v837_v1 = vsel %vm461_vm0, %v2597_v63, -inf }
 0x192   : > { %v2603_v2 = vpop.f32.mrb[6].mxu1  ;;  %838 = vmax.xlane.f32.xlu1 %v837_v1  ;;  %v831_v4 = vsel %vm461_vm0, %v2599_v0, -inf }
 0x193   : > { %v2605_v3 = vpop.f32.mrb[7].mxu1  ;;  %v840_v6 = vsel %vm461_vm0, %v2603_v2, -inf }
 0x194   : > { %v834_v5 = vsel %vm461_vm0, %v2605_v3, -inf }
 0x195   : > { %835 = vmax.xlane.f32.xlu0 %v834_v5 }
 0x196   : > { %832 = vmax.xlane.f32.xlu1 %v831_v4 }
 0x199   : > { %841 = vmax.xlane.f32.xlu0 %v840_v6  ;;  %v2726_v6 = vld [vmem:[#allocation2 + $0x70] sm:$0xff] }
 0x19d   : > { %v803_v8 = vpop.xlane.xlu0 %802 }
 0x19e   : > { %v2616_v9 = vmax.f32 %v2613_v7, %v803_v8 }
 0x1a0   : > { %1150 = vst.msk [vmem:[#allocation2 + $0x10] sm:$0xff] %vm428_vm1, %v2616_v9  ;;  %v800_v13 = vpop.xlane.xlu1 %799 }
 0x1a1   : > { %v797_v14 = vpop.xlane.xlu0 %796  ;;  %v2627_v15 = vmax.f32 %v2618_v10, %v800_v13 }
 0x1a2   : > { %v2630_v16 = vmax.f32 %v2620_v11, %v797_v14 }
 0x1a3   : > { %1149 = vst.msk [vmem:[#allocation2 + $0x8] sm:$0xff] %vm428_vm1, %v2627_v15 }
 0x1a4   : > { %v859_v19 = vsub.f32 %v2620_v11, %v2630_v16  ;;  %1148 = vst.msk [vmem:[#allocation2] sm:$0xff] %vm428_vm1, %v2630_v16 }
 0x1a5   : > { %v806_v20 = vpop.xlane.xlu0 %805 }
 0x1a6   : > { %v2643_v21 = vmax.f32 %v2636_v18, %v806_v20 }
 0x1a7   : > { %919 = vperm.xlu1 %2225, %v2616_v9  }
 0x1a8   : > { %1151 = vst.msk [vmem:[#allocation2 + $0x18] sm:$0xff] %vm428_vm1, %v2643_v21 }
 0x1ab   : > { %909 = vperm.xlu1 %2225, %v2630_v16  }
 0x1af   : > { %914 = vperm.xlu0 %2226, %v2627_v15   ;;  %924 = vperm.xlu1 %2225, %v2643_v21  }
 0x20f   : > { %v815_v26 = vpop.xlane.xlu1 %814 }
 0x210   : > { %v2667_v28 = vmax.f32 %v2662_v25, %v815_v26 }
 0x211   : > { %v818_v29 = vpop.xlane.xlu0 %817 }
 0x212   : > { %1154 = vst.msk [vmem:[#allocation2 + $0x30] sm:$0xff] %vm428_vm1, %v2667_v28  ;;  %v2676_v32 = vmax.f32 %v2664_v27, %v818_v29  ;;  %939 = vperm.xlu1 %2225, %v2667_v28   ;;  %v2743_v29 = vld [vmem:[#allocation2 + $0x68] sm:$0xff] }
 0x213   : > { %v827_v33 = vpop.xlane.xlu1 %826 }
 0x214   : > { %1155 = vst.msk [vmem:[#allocation2 + $0x38] sm:$0xff] %vm428_vm1, %v2676_v32  ;;  %v2686_v37 = vmax.f32 %v2669_v30, %v827_v33  ;;  %v2745_v33 = vld [vmem:[#allocation2 + $0x60] sm:$0xff] }
 0x215   : > { %v830_v40 = vpop.xlane.xlu0 %829 }
 0x216   : > { %1158 = vst.msk [vmem:[#allocation2 + $0x50] sm:$0xff] %vm428_vm1, %v2686_v37  ;;  %v2695_v44 = vmax.f32 %v2679_v34, %v830_v40  ;;  %959 = vperm.xlu0 %2226, %v2686_v37  }
 0x217   : > { %v809_v45 = vpop.xlane.xlu1 %808 }
 0x218   : > { %1159 = vst.msk [vmem:[#allocation2 + $0x58] sm:$0xff] %vm428_vm1, %v2695_v44  ;;  %v2705_v54 = vmax.f32 %v2688_v42, %v809_v45 }
 0x219   : > { %v812_v57 = vpop.xlane.xlu0 %811 }
 0x21a   : > { %1152 = vst.msk [vmem:[#allocation2 + $0x20] sm:$0xff] %vm428_vm1, %v2705_v54  ;;  %v2714_v60 = vmax.f32 %v2698_v48, %v812_v57  ;;  %929 = vperm.xlu1 %2225, %v2705_v54  }
 0x21b   : > { %v821_v61 = vpop.xlane.xlu1 %820 }
 0x21c   : > { %v864_v1 = vsub.f32 %v2698_v48, %v2714_v60  ;;  %1153 = vst.msk [vmem:[#allocation2 + $0x28] sm:$0xff] %vm428_vm1, %v2714_v60  ;;  %v2724_v4 = vmax.f32 %v2707_v58, %v821_v61 }
 0x21d   : > { %v824_v5 = vpop.xlane.xlu0 %823 }
 0x21e   : > { %1156 = vst.msk [vmem:[#allocation2 + $0x40] sm:$0xff] %vm428_vm1, %v2724_v4  ;;  %v2733_v13 = vmax.f32 %v2717_v62, %v824_v5  ;;  %949 = vperm.xlu1 %2225, %v2724_v4   ;;  %v3071_v11 = vsub.f32 %v2707_v58, %v2724_v4 }
 0x21f   : > { %v839_v14 = vpop.xlane.xlu1 %838 }
 0x220   : > { %1157 = vst.msk [vmem:[#allocation2 + $0x48] sm:$0xff] %vm428_vm1, %v2733_v13  ;;  %v2741_v26 = vmax.f32 %v2726_v6, %v839_v14  ;;  %v2758_v14 = vld [vmem:[#allocation2 + $0x78] sm:$0xff]  ;;  %v891_v16 = vmul.f32 1.442695, %v3071_v11 }
 0x222   : > { %1162 = vst.msk [vmem:[#allocation2 + $0x70] sm:$0xff] %vm428_vm1, %v2741_v26  ;;  %944 = vperm.xlu1 %2225, %v2676_v32   ;;  %v836_v45 = vpop.xlane.xlu0 %835 }
 0x223   : > { %v833_v57 = vpop.xlane.xlu1 %832  ;;  %v2753_v61 = vmax.f32 %v2743_v29, %v836_v45 }
 0x224   : > { %v2756_v5 = vmax.f32 %v2745_v33, %v833_v57 }
 0x225   : > { %1161 = vst.msk [vmem:[#allocation2 + $0x68] sm:$0xff] %vm428_vm1, %v2753_v61 }
 0x226   : > { %1160 = vst.msk [vmem:[#allocation2 + $0x60] sm:$0xff] %vm428_vm1, %v2756_v5  ;;  %964 = vperm.xlu1 %2225, %v2695_v44   ;;  %969 = vperm.xlu0 %2226, %v2756_v5   ;;  %v842_v45 = vpop.xlane.xlu0 %841 }
 0x227   : > { %v920_v57 = vpop.permute.xlu1 %919  ;;  %v2771_v12 = vmax.f32 %v2758_v14, %v842_v45 }
 0x228   : > { %v989_v22 = vsub.f32 %v2501_v36, %v920_v57 }
 0x229   : > { %1163 = vst.msk [vmem:[#allocation2 + $0x78] sm:$0xff] %vm428_vm1, %v2771_v12 }
 0x22a   : > { %934 = vperm.xlu1 %2225, %v2714_v60   ;;  %979 = vperm.xlu0 %2226, %v2741_v26   ;;  %v1007_v20 = vmul.f32 1.442695, %v989_v22  ;;  %v3076_v60 = vsub.f32 %v2679_v34, %v2695_v44  ;;  %v3079_v34 = vsub.f32 %v2758_v14, %v2771_v12 }
 0x22b   : > { %v910_v51 = vpop.permute.xlu1 %909 }
 0x22c   : > { %v987_v17 = vsub.f32 %v2505_v38, %v910_v51  ;;  %2233 = vpow2.f32 %v1007_v20  ;;  %v905_v44 = vmul.f32 1.442695, %v3079_v34  ;;  %v1048_v34 = vld [vmem:[#allocation3 + $0x68] sm:$0xff] }
 0x22e   : > { %v1003_v43 = vmul.f32 1.442695, %v987_v17  ;;  %954 = vperm.xlu1 %2225, %v2733_v13   ;;  %v915_v45 = vpop.permute.xlu0 %914  ;;  %1384 = vrot.lane.b32.xlu0 %v2654_v23, %s2369_s26 }
 0x22f   : > { %v988_v36 = vsub.f32 %v2511_v41, %v915_v45  ;;  %v925_v57 = vpop.permute.xlu1 %924 }
 0x230   : > { %v990_v40 = vsub.f32 %v2507_v39, %v925_v57  ;;  %2235 = vpow2.f32 %v1003_v43 }
 0x231   : > { %v1005_v35 = vmul.f32 1.442695, %v988_v36 }
 0x232   : > { %v1009_v8 = vmul.f32 1.442695, %v990_v40  ;;  %974 = vperm.xlu1 %2225, %v2753_v61   ;;  %1458 = vrot.lane.b32.xlu0 %v2654_v23, %s2370_s27 }
 0x233   : > { %2237 = vpow2.f32 %v1005_v35 }
 0x234   : > { %2239 = vpow2.f32 %v1009_v8 }
 0x236   : > { %984 = vperm.xlu1 %2225, %v2771_v12   ;;  %1460 = vrot.lane.b32.xlu0 %v2656_v24, %s2370_s27  ;;  %v2794_v38 = vpop.eup %2233 }
 0x23a   : > { %1386 = vrot.lane.b32.xlu1 %v2656_v24, %s2369_s26  ;;  %v2796_v39 = vpop.eup %2235 }
 0x23d   : > { %v2798_v41 = vpop.eup %2237 }
 0x23e   : > { %v2800_v17 = vpop.eup %2239  ;;  %v1292_v22 = vpack.c.bf16 %v2798_v41, %v2796_v39  ;;  %1532 = vrot.lane.b32.xlu1 %v2654_v23, %s2371_s12 }
 0x23f   : > { %v1293_v35 = vpack.c.bf16 %v2800_v17, %v2794_v38 }
 0x240   : > { %2142 = vmatprep.mubr.msk.bf16.mxu0 %vm461_vm0, %v1292_v22 }
 0x241   : > { %2143 = vmatmul.mubr.msk.bf16.vlgmr.msra.gmra.mrb[8].mxu0 %vm461_vm0, %v1293_v35 }
 0x242   : > { %1534 = vrot.lane.b32.xlu1 %v2656_v24, %s2371_s12 }
 0x291   : > { %v940_v43 = vpop.permute.xlu1 %939 }
 0x292   : > { %v993_v51 = vsub.f32 %v2533_v46, %v940_v43 }
 0x294   : > { %v1015_v8 = vmul.f32 1.442695, %v993_v51 }
 0x295   : > { %v960_v20 = vpop.permute.xlu0 %959 }
 0x296   : > { %2241 = vpow2.f32 %v1015_v8  ;;  %v997_v40 = vsub.f32 %v2545_v52, %v960_v20 }
 0x298   : > { %v1023_v45 = vmul.f32 1.442695, %v997_v40 }
 0x299   : > { %v930_v23 = vpop.permute.xlu1 %929 }
 0x29a   : > { %2243 = vpow2.f32 %v1023_v45  ;;  %v991_v36 = vsub.f32 %v2535_v47, %v930_v23 }
 0x29c   : > { %v1011_v57 = vmul.f32 1.442695, %v991_v36 }
 0x29d   : > { %v950_v22 = vpop.permute.xlu1 %949 }
 0x29e   : > { %2245 = vpow2.f32 %v1011_v57  ;;  %v995_v35 = vsub.f32 %v2547_v53, %v950_v22 }
 0x2a0   : > { %v2816_v59 = vpop.eup %2241  ;;  %v1019_v24 = vmul.f32 1.442695, %v995_v35 }
 0x2a1   : > { %v945_v31 = vpop.permute.xlu1 %944  ;;  %v1085_v46 = vsel %vm461_vm0, %v2816_v59, 0.0 }
 0x2a2   : > { %2247 = vpow2.f32 %v1019_v24  ;;  %v994_v52 = vsub.f32 %v2539_v49, %v945_v31  ;;  %1086 = vadd.xlane.f32.xlu0 %v1085_v46 }
 0x2a4   : > { %v2821_v43 = vpop.eup %2243  ;;  %v1017_v51 = vmul.f32 1.442695, %v994_v52 }
 0x2a5   : > { %v965_v47 = vpop.permute.xlu1 %964  ;;  %v970_v8 = vpop.permute.xlu0 %969  ;;  %v1097_v20 = vsel %vm461_vm0, %v2821_v43, 0.0 }
 0x2a6   : > { %2249 = vpow2.f32 %v1017_v51  ;;  %v998_v53 = vsub.f32 %v2551_v55, %v965_v47  ;;  %1098 = vadd.xlane.f32.xlu1 %v1097_v20  ;;  %v999_v23 = vsub.f32 %v2599_v0, %v970_v8 }
 0x2a8   : > { %v2246_v40 = vpop.eup %2245  ;;  %v1025_v45 = vmul.f32 1.442695, %v998_v53  ;;  %v1027_v35 = vmul.f32 1.442695, %v999_v23 }
 0x2a9   : > { %v935_v36 = vpop.permute.xlu1 %934  ;;  %v980_v57 = vpop.permute.xlu0 %979  ;;  %v1079_v49 = vsel %vm461_vm0, %v2246_v40, 0.0 }
 0x2aa   : > { %2251 = vpow2.f32 %v1025_v45  ;;  %v992_v31 = vsub.f32 %v2541_v50, %v935_v36  ;;  %1080 = vadd.xlane.f32.xlu0 %v1079_v49  ;;  %v1001_v46 = vsub.f32 %v2597_v63, %v980_v57 }
 0x2ac   : > { %v2248_v22 = vpop.eup %2247  ;;  %v1013_v24 = vmul.f32 1.442695, %v992_v31  ;;  %v1031_v8 = vmul.f32 1.442695, %v1001_v46 }
 0x2ad   : > { %v955_v52 = vpop.permute.xlu1 %954  ;;  %v1091_v55 = vsel %vm461_vm0, %v2248_v22, 0.0  ;;  %v1385_v51 = vpop.permute.xlu0 %1384 }
 0x2ae   : > { %2253 = vpow2.f32 %v1013_v24  ;;  %v996_v0 = vsub.f32 %v2553_v56, %v955_v52  ;;  %1092 = vadd.xlane.f32.xlu1 %v1091_v55  ;;  %2146 = vmatprep.subr.bf16.mxu1 %v1385_v51 }
 0x2af   : > { %2147 = vmatpush3.bf16.msra.mxu1 %v1385_v51  ;;  %2255 = vpow2.f32 %v1027_v35 }
 0x2b0   : > { %v2250_v47 = vpop.eup %2249  ;;  %v1021_v50 = vmul.f32 1.442695, %v996_v0 }
 0x2b1   : > { %v975_v20 = vpop.permute.xlu1 %974  ;;  %v1088_v53 = vsel %vm461_vm0, %v2250_v47, 0.0  ;;  %v1459_v45 = vpop.permute.xlu0 %1458  ;;  %v1295_v63 = vpack.c.bf16 %v2250_v47, %v2816_v59 }
 0x2b2   : > { %2257 = vpow2.f32 %v1021_v50  ;;  %v1000_v23 = vsub.f32 %v2605_v3, %v975_v20  ;;  %1089 = vadd.xlane.f32.xlu0 %v1088_v53  ;;  %2154 = vmatprep.subr.bf16.mxu0 %v1459_v45 }
 0x2b3   : > { %2155 = vmatpush3.bf16.msra.mxu0 %v1459_v45  ;;  %2259 = vpow2.f32 %v1031_v8 }
 0x2b4   : > { %v2252_v56 = vpop.eup %2251  ;;  %v1029_v36 = vmul.f32 1.442695, %v1000_v23 }
 0x2b5   : > { %v985_v57 = vpop.permute.xlu1 %984  ;;  %v1100_v49 = vsel %vm461_vm0, %v2252_v56, 0.0  ;;  %v1461_v31 = vpop.permute.xlu0 %1460  ;;  %v1297_v35 = vpack.c.bf16 %v2252_v56, %v2821_v43  ;;  %v1067_v56 = vsel %vm461_vm0, %v2796_v39, 0.0  ;;  %v1076_v39 = vsel %vm461_vm0, %v2800_v17, 0.0 }
 0x2b6   : > { %2261 = vpow2.f32 %v1029_v36  ;;  %v1002_v24 = vsub.f32 %v2603_v2, %v985_v57  ;;  %1101 = vadd.xlane.f32.xlu0 %v1100_v49  ;;  %2156 = vmatprep.subr.bf16.mxu0 %v1461_v31  ;;  %v1070_v57 = vsel %vm461_vm0, %v2798_v41, 0.0  ;;  %v1073_v49 = vsel %vm461_vm0, %v2794_v38, 0.0 }
 0x2b7   : > { %2157 = vmatpush3.bf16.msra.mxu0 %v1461_v31  ;;  %v875_v31 = vmul.f32 1.442695, %v859_v19  ;;  %v3069_v41 = vsub.f32 %v2662_v25, %v2667_v28  ;;  %v3070_v38 = vsub.f32 %v2688_v42, %v2705_v54  ;;  %v3072_v19 = vsub.f32 %v2664_v27, %v2676_v32 }
 0x2b8   : > { %v2254_v59 = vpop.eup %2253  ;;  %v1033_v3 = vmul.f32 1.442695, %v1002_v24  ;;  %v3073_v25 = vsub.f32 %v2669_v30, %v2686_v37  ;;  %v3074_v42 = vsub.f32 %v2717_v62, %v2733_v13  ;;  %v3075_v27 = vsub.f32 %v2745_v33, %v2756_v5 }
 0x2b9   : > { %v1387_v46 = vpop.permute.xlu1 %1386  ;;  %v1082_v52 = vsel %vm461_vm0, %v2254_v59, 0.0  ;;  %v1294_v55 = vpack.c.bf16 %v2254_v59, %v2246_v40  ;;  %v2256_v51 = vpop.eup %2255  ;;  %v887_v24 = vmul.f32 1.442695, %v3069_v41  ;;  %v883_v59 = vmul.f32 1.442695, %v3070_v38  ;;  %v1046_v38 = vld [vmem:[#allocation3 + $0x58] sm:$0xff] }
 0x2ba   : > { %2263 = vpow2.f32 %v1033_v3  ;;  %1083 = vadd.xlane.f32.xlu1 %v1082_v52  ;;  %2148 = vmatprep.subr.bf16.mxu1 %v1387_v46  ;;  %v1103_v47 = vsel %vm461_vm0, %v2256_v51, 0.0  ;;  %v889_v17 = vmul.f32 1.442695, %v3072_v19  ;;  %v895_v28 = vmul.f32 1.442695, %v3073_v25 }
 0x2bb   : > { %2149 = vmatpush3.bf16.msra.mxu1 %v1387_v46  ;;  %2150 = vmatprep.mubr.msk.bf16.mxu1 %vm461_vm0, %v1294_v55  ;;  %2265 = vpow2.f32 %v875_v31  ;;  %v893_v54 = vmul.f32 1.442695, %v3074_v42  ;;  %v899_v32 = vmul.f32 1.442695, %v3075_v27  ;;  %v897_v30 = vmul.f32 1.442695, %v3076_v60 }
 0x2bc   : > { %v2258_v43 = vpop.eup %2257  ;;  %v3077_v62 = vsub.f32 %v2726_v6, %v2741_v26  ;;  %v3078_v13 = vsub.f32 %v2743_v29, %v2753_v61  ;;  %v1042_v31 = vld [vmem:[#allocation3 + $0x38] sm:$0xff]  ;;  %v3081_v27 = vsub.f32 %v2618_v10, %v2627_v15 }
 0x2bd   : > { %v1094_v0 = vsel %vm461_vm0, %v2258_v43, 0.0  ;;  %v1533_v2 = vpop.permute.xlu1 %1532  ;;  %v1296_v8 = vpack.c.bf16 %v2258_v43, %v2248_v22  ;;  %v2260_v50 = vpop.eup %2259 }
 0x2be   : > { %1095 = vadd.xlane.f32.xlu0 %v1094_v0  ;;  %1104 = vadd.xlane.f32.xlu1 %v1103_v47  ;;  %v1109_v45 = vsel %vm461_vm0, %v2260_v50, 0.0  ;;  %v903_v4 = vmul.f32 1.442695, %v3077_v62  ;;  %v901_v33 = vmul.f32 1.442695, %v3078_v13  ;;  %v1041_v0 = vld [vmem:[#allocation3 + $0x30] sm:$0xff] }
 0x2bf   : > { %2151 = vmatmul.mubr.msk.bf16.vlgmr.msra.gmra.mrb[8].mxu1 %vm461_vm0, %v1295_v63  ;;  %2158 = vmatprep.mubr.msk.bf16.mxu0 %vm461_vm0, %v1296_v8  ;;  %v1045_v8 = vld [vmem:[#allocation3 + $0x50] sm:$0xff]  ;;  %v1044_v62 = vld [vmem:[#allocation3 + $0x48] sm:$0xff] }
 0x2c0   : > { %v2262_v40 = vpop.eup %2261  ;;  %2162 = vmatprep.subr.bf16.mxu1 %v1533_v2  ;;  %2159 = vmatmul.mubr.msk.bf16.vlgmr.msra.gmra.mrb[12].mxu0 %vm461_vm0, %v1297_v35  ;;  %v885_v35 = vmul.f32 1.442695, %v864_v1 }
 0x2c1   : > { %2163 = vmatpush3.bf16.msra.mxu1 %v1533_v2  ;;  %v1106_v20 = vsel %vm461_vm0, %v2262_v40, 0.0  ;;  %v1535_v53 = vpop.permute.xlu1 %1534  ;;  %v1298_v23 = vpack.c.bf16 %v2262_v40, %v2256_v51 }
 0x2c2   : > { %1107 = vadd.xlane.f32.xlu0 %v1106_v20  ;;  %1110 = vadd.xlane.f32.xlu1 %v1109_v45  ;;  %2267 = vpow2.f32 %v885_v35 }
 0x2c3   : > { %2164 = vmatprep.subr.bf16.mxu1 %v1535_v53  ;;  %2166 = vmatprep.mubr.msk.bf16.mxu1 %vm461_vm0, %v1298_v23  ;;  %2269 = vpow2.f32 %v887_v24 }
 0x2c4   : > { %v2264_v22 = vpop.eup %2263  ;;  %2271 = vpow2.f32 %v883_v59 }
 0x2c5   : > { %2165 = vmatpush3.bf16.msra.mxu1 %v1535_v53  ;;  %v1112_v63 = vsel %vm461_vm0, %v2264_v22, 0.0  ;;  %v1299_v36 = vpack.c.bf16 %v2264_v22, %v2260_v50  ;;  %v2876_v48 = vpop.eup %2265  ;;  %2273 = vpow2.f32 %v891_v16  ;;  %v1039_v53 = vld [vmem:[#allocation3 + $0x20] sm:$0xff] }
 0x2c6   : > { %1113 = vadd.xlane.f32.xlu0 %v1112_v63  ;;  %1068 = vadd.xlane.f32.xlu1 %v1067_v56  ;;  %2275 = vpow2.f32 %v889_v17  ;;  %v1043_v63 = vld [vmem:[#allocation3 + $0x40] sm:$0xff]  ;;  %v1040_v17 = vld [vmem:[#allocation3 + $0x28] sm:$0xff] }
 0x2c7   : > { %2277 = vpow2.f32 %v895_v28  ;;  %v3080_v28 = vsub.f32 %v2613_v7, %v2616_v9  ;;  %v3082_v7 = vsub.f32 %v2636_v18, %v2643_v21 }
 0x2c8   : > { %2167 = vmatmul.mubr.msk.bf16.vlgmr.msra.gmra.mrb[12].mxu1 %vm461_vm0, %v1299_v36  ;;  %2279 = vpow2.f32 %v893_v54 }
 0x2c9   : > { %2281 = vpow2.f32 %v899_v32  ;;  %v879_v42 = vmul.f32 1.442695, %v3080_v28  ;;  %v877_v32 = vmul.f32 1.442695, %v3081_v27  ;;  %v881_v9 = vmul.f32 1.442695, %v3082_v7 }
 0x2ca   : > { %1071 = vadd.xlane.f32.xlu0 %v1070_v57  ;;  %1074 = vadd.xlane.f32.xlu1 %v1073_v49  ;;  %2283 = vpow2.f32 %v897_v30  ;;  %v1170_v7 = vld [vmem:[#allocation4 + $0x30] sm:$0xff] }
 0x2cb   : > { %2285 = vpow2.f32 %v903_v4 }
 0x2cc   : > { %v2885_v58 = vpop.eup %2267  ;;  %2287 = vpow2.f32 %v901_v33 }
 0x2cd   : > { %v2270_v37 = vpop.eup %2269  ;;  %2289 = vpow2.f32 %v905_v44  ;;  %v1056_v30 = vmul.f32 %v2885_v58, %v1040_v17 }
 0x2ce   : > { %1077 = vadd.xlane.f32.xlu0 %v1076_v39  ;;  %v2272_v1 = vpop.eup %2271  ;;  %v1057_v2 = vmul.f32 %v2270_v37, %v1041_v0 }
 0x2cf   : > { %v2274_v5 = vpop.eup %2273  ;;  %v1055_v23 = vmul.f32 %v2272_v1, %v1039_v53 }
 0x2d0   : > { %v2276_v3 = vpop.eup %2275  ;;  %v1059_v57 = vmul.f32 %v2274_v5, %v1043_v63  ;;  %v1037_v63 = vld [vmem:[#allocation3 + $0x10] sm:$0xff] }
 0x2d1   : > { %v2278_v46 = vpop.eup %2277  ;;  %v1058_v41 = vmul.f32 %v2276_v3, %v1042_v31 }
 0x2d2   : > { %v2903_v6 = vpop.eup %2279  ;;  %v1061_v40 = vmul.f32 %v2278_v46, %v1045_v8 }
 0x2d3   : > { %v2906_v26 = vpop.eup %2281 }
 0x2d4   : > { %v2284_v29 = vpop.eup %2283 }
 0x2d5   : > { %v2909_v61 = vpop.eup %2285  ;;  %v1062_v16 = vmul.f32 %v2284_v29, %v1046_v38  ;;  %v1038_v38 = vld [vmem:[#allocation3 + $0x18] sm:$0xff] }
 0x2d6   : > { %v2911_v52 = vpop.eup %2287 }
 0x2d7   : > { %v2915_v12 = vpop.eup %2289 }
 0x2db   : > { %1182 = vperm.xlu1 %2225, %v2876_v48  }
 0x2df   : > { %1207 = vperm.xlu1 %2225, %v2885_v58   ;;  %v1060_v58 = vmul.f32 %v2903_v6, %v1044_v62 }
 0x2e3   : > { %1212 = vperm.xlu1 %2225, %v2270_v37  }
 0x2e4   : > { %1202 = vperm.xlu0 %2226, %v2272_v1   ;;  %v1047_v1 = vld [vmem:[#allocation3 + $0x60] sm:$0xff] }
 0x2e5   : > { %v1063_v15 = vmul.f32 %v2906_v26, %v1047_v1 }
 0x2e7   : > { %1222 = vperm.xlu1 %2225, %v2274_v5  }
 0x2e8   : > { %1217 = vperm.xlu0 %2226, %v2276_v3   ;;  %v1049_v3 = vld [vmem:[#allocation3 + $0x70] sm:$0xff] }
 0x2e9   : > { %v1065_v21 = vmul.f32 %v2909_v61, %v1049_v3 }
 0x2eb   : > { %1232 = vperm.xlu1 %2225, %v2278_v46  }
 0x2ec   : > { %1227 = vperm.xlu0 %2226, %v2903_v6  }
 0x2ef   : > { %1242 = vperm.xlu1 %2225, %v2906_v26   ;;  %v1064_v26 = vmul.f32 %v2911_v52, %v1048_v34 }
 0x2f0   : > { %1237 = vperm.xlu0 %2226, %v2284_v29  }
 0x2f3   : > { %1252 = vperm.xlu1 %2225, %v2909_v61  }
 0x2f4   : > { %1247 = vperm.xlu0 %2226, %v2911_v52  }
 0x2f8   : > { %1257 = vperm.xlu0 %2226, %v2915_v12  }
 0x314   : > { %v2918_v14 = vpop.f32.mrb[8].mxu0 }
 0x315   : > { %v2920_v55 = vpop.f32.mrb[9].mxu0 }
 0x316   : > { %v2922_v51 = vpop.f32.mrb[10].mxu0 }
 0x317   : > { %v2924_v43 = vpop.f32.mrb[11].mxu0 }
 0x32f   : > { %v1087_v47 = vpop.xlane.xlu0 %1086 }
 0x330   : > { %v1121_v50 = vadd.f32 %v1087_v47, %v1057_v2  ;;  %v1035_v2 = vld [vmem:[#allocation3] sm:$0xff]  ;;  %v1050_v47 = vld [vmem:[#allocation3 + $0x78] sm:$0xff] }
 0x331   : > { %v1051_v61 = vmul.f32 %v2876_v48, %v1035_v2  ;;  %v1066_v52 = vmul.f32 %v2915_v12, %v1050_v47 }
 0x332   : > { %1138 = vst.msk [vmem:[#allocation3 + $0x30] sm:$0xff] %vm428_vm1, %v1121_v50 }
 0x333   : > { %v1099_v20 = vpop.xlane.xlu1 %1098 }
 0x334   : > { %v1125_v45 = vadd.f32 %v1099_v20, %v1061_v40 }
 0x336   : > { %1142 = vst.msk [vmem:[#allocation3 + $0x50] sm:$0xff] %vm428_vm1, %v1125_v45 }
 0x337   : > { %v1081_v22 = vpop.xlane.xlu0 %1080 }
 0x338   : > { %v1119_v56 = vadd.f32 %v1081_v22, %v1055_v23 }
 0x339   : > { %v1610_v36 = vld [vmem:[#allocation3 + $0x30] sm:$0xff] }
 0x33a   : > { %1136 = vst.msk [vmem:[#allocation3 + $0x20] sm:$0xff] %vm428_vm1, %v1119_v56  ;;  %2291 = vrcp.f32 %v1610_v36  ;;  %v1036_v56 = vld [vmem:[#allocation3 + $0x8] sm:$0xff] }
 0x33b   : > { %v1093_v49 = vpop.xlane.xlu1 %1092 }
 0x33c   : > { %v1123_v39 = vadd.f32 %v1093_v49, %v1059_v57 }
 0x33d   : > { %v1614_v35 = vld [vmem:[#allocation3 + $0x50] sm:$0xff] }
 0x33e   : > { %1140 = vst.msk [vmem:[#allocation3 + $0x40] sm:$0xff] %vm428_vm1, %v1123_v39  ;;  %2293 = vrcp.f32 %v1614_v35 }
 0x33f   : > { %v1090_v24 = vpop.xlane.xlu0 %1089 }
 0x340   : > { %v1122_v59 = vadd.f32 %v1090_v24, %v1058_v41 }
 0x341   : > { %v1608_v11 = vld [vmem:[#allocation3 + $0x20] sm:$0xff] }
 0x342   : > { %1139 = vst.msk [vmem:[#allocation3 + $0x38] sm:$0xff] %vm428_vm1, %v1122_v59  ;;  %2295 = vrcp.f32 %v1608_v11 }
 0x343   : > { %v1102_v19 = vpop.xlane.xlu0 %1101 }
 0x344   : > { %v2292_v25 = vpop.eup %2291  ;;  %v1126_v54 = vadd.f32 %v1102_v19, %v1062_v16  ;;  %v1164_v19 = vld [vmem:[#allocation4] sm:$0xff] }
 0x345   : > { %1701 = vperm.xlu1 %2225, %v2292_v25   ;;  %v1612_v60 = vld [vmem:[#allocation3 + $0x40] sm:$0xff] }
 0x346   : > { %1143 = vst.msk [vmem:[#allocation3 + $0x58] sm:$0xff] %vm428_vm1, %v1126_v54  ;;  %2297 = vrcp.f32 %v1612_v60 }
 0x347   : > { %v1084_v37 = vpop.xlane.xlu1 %1083  ;;  %2299 = vpow2.f32 %v879_v42 }
 0x348   : > { %v2294_v4 = vpop.eup %2293  ;;  %v1120_v13 = vadd.f32 %v1084_v37, %v1056_v30  ;;  %2301 = vpow2.f32 %v877_v32  ;;  %v1169_v30 = vld [vmem:[#allocation4 + $0x28] sm:$0xff] }
 0x349   : > { %1758 = vperm.xlu1 %2225, %v2294_v4   ;;  %v1611_v10 = vld [vmem:[#allocation3 + $0x38] sm:$0xff] }
 0x34a   : > { %1137 = vst.msk [vmem:[#allocation3 + $0x28] sm:$0xff] %vm428_vm1, %v1120_v13  ;;  %2303 = vrcp.f32 %v1611_v10 }
 0x34b   : > { %v1105_v33 = vpop.xlane.xlu1 %1104  ;;  %v1096_v5 = vpop.xlane.xlu0 %1095  ;;  %2305 = vpow2.f32 %v881_v9  ;;  %v1168_v9 = vld [vmem:[#allocation4 + $0x20] sm:$0xff] }
 0x34c   : > { %v2296_v44 = vpop.eup %2295  ;;  %v1127_v46 = vadd.f32 %v1105_v33, %v1063_v15  ;;  %v1124_v29 = vadd.f32 %v1096_v5, %v1060_v58 }
 0x34d   : > { %1691 = vperm.xlu1 %2225, %v2296_v44   ;;  %v1615_v18 = vld [vmem:[#allocation3 + $0x58] sm:$0xff] }
 0x34e   : > { %1144 = vst.msk [vmem:[#allocation3 + $0x60] sm:$0xff] %vm428_vm1, %v1127_v46  ;;  %1141 = vst.msk [vmem:[#allocation3 + $0x48] sm:$0xff] %vm428_vm1, %v1124_v29  ;;  %2307 = vrcp.f32 %v1615_v18  ;;  %v1172_v29 = vld [vmem:[#allocation4 + $0x40] sm:$0xff]  ;;  %v1171_v18 = vld [vmem:[#allocation4 + $0x38] sm:$0xff] }
 0x34f   : > { %v1111_v6 = vpop.xlane.xlu1 %1110  ;;  %v1108_v0 = vpop.xlane.xlu0 %1107 }
 0x350   : > { %v2298_v8 = vpop.eup %2297  ;;  %v1129_v50 = vadd.f32 %v1111_v6, %v1065_v21  ;;  %v1128_v40 = vadd.f32 %v1108_v0, %v1064_v26 }
 0x351   : > { %1748 = vperm.xlu1 %2225, %v2298_v8   ;;  %v1609_v20 = vld [vmem:[#allocation3 + $0x28] sm:$0xff]  ;;  %v2949_v53 = vpop.eup %2299 }
 0x352   : > { %1146 = vst.msk [vmem:[#allocation3 + $0x70] sm:$0xff] %vm428_vm1, %v1129_v50  ;;  %1145 = vst.msk [vmem:[#allocation3 + $0x68] sm:$0xff] %vm428_vm1, %v1128_v40  ;;  %2309 = vrcp.f32 %v1609_v20  ;;  %v2955_v45 = vpop.eup %2301  ;;  %v1053_v48 = vmul.f32 %v2949_v53, %v1037_v63  ;;  %v1174_v40 = vld [vmem:[#allocation4 + $0x50] sm:$0xff]  ;;  %v1173_v20 = vld [vmem:[#allocation4 + $0x48] sm:$0xff] }
 0x353   : > { %v1069_v23 = vpop.xlane.xlu1 %1068  ;;  %v1114_v22 = vpop.xlane.xlu0 %1113  ;;  %v1052_v12 = vmul.f32 %v2955_v45, %v1036_v56  ;;  %v1175_v63 = vld [vmem:[#allocation4 + $0x58] sm:$0xff] }
 0x354   : > { %v2304_v36 = vpop.eup %2303  ;;  %v1115_v57 = vadd.f32 %v1069_v23, %v1051_v61  ;;  %v1130_v49 = vadd.f32 %v1114_v22, %v1066_v52  ;;  %v1176_v22 = vld [vmem:[#allocation4 + $0x60] sm:$0xff] }
 0x355   : > { %1706 = vperm.xlu0 %2226, %v2304_v36   ;;  %v1616_v31 = vld [vmem:[#allocation3 + $0x60] sm:$0xff]  ;;  %v1613_v39 = vld [vmem:[#allocation3 + $0x48] sm:$0xff]  ;;  %v2961_v35 = vpop.eup %2305 }
 0x356   : > { %1132 = vst.msk [vmem:[#allocation3] sm:$0xff] %vm428_vm1, %v1115_v57  ;;  %1147 = vst.msk [vmem:[#allocation3 + $0x78] sm:$0xff] %vm428_vm1, %v1130_v49  ;;  %2311 = vrcp.f32 %v1616_v31  ;;  %v1054_v28 = vmul.f32 %v2961_v35, %v1038_v38 }
 0x357   : > { %v1075_v41 = vpop.xlane.xlu1 %1074  ;;  %v1072_v24 = vpop.xlane.xlu0 %1071  ;;  %2313 = vrcp.f32 %v1613_v39  ;;  %v1178_v39 = vld [vmem:[#allocation4 + $0x70] sm:$0xff] }
 0x358   : > { %v2308_v59 = vpop.eup %2307  ;;  %v1117_v11 = vadd.f32 %v1075_v41, %v1053_v48  ;;  %v1116_v16 = vadd.f32 %v1072_v24, %v1052_v12  ;;  %v1177_v48 = vld [vmem:[#allocation4 + $0x68] sm:$0xff] }
 0x359   : > { %1763 = vperm.xlu0 %2226, %v2308_v59   ;;  %v1618_v17 = vld [vmem:[#allocation3 + $0x70] sm:$0xff]  ;;  %v1617_v25 = vld [vmem:[#allocation3 + $0x68] sm:$0xff]  ;;  %v1179_v59 = vld [vmem:[#allocation4 + $0x78] sm:$0xff] }
 0x35a   : > { %1134 = vst.msk [vmem:[#allocation3 + $0x10] sm:$0xff] %vm428_vm1, %v1117_v11  ;;  %1133 = vst.msk [vmem:[#allocation3 + $0x8] sm:$0xff] %vm428_vm1, %v1116_v16  ;;  %2315 = vrcp.f32 %v1618_v17 }
 0x35b   : > { %v1183_v42 = vpop.permute.xlu1 %1182  ;;  %v1078_v54 = vpop.xlane.xlu0 %1077  ;;  %2317 = vrcp.f32 %v1617_v25 }
 0x35c   : > { %v2310_v27 = vpop.eup %2309  ;;  %v1260_v32 = vmul.f32 %v1183_v42, %v1164_v19  ;;  %v1118_v60 = vadd.f32 %v1078_v54, %v1054_v28 }
 0x35d   : > { %1696 = vperm.xlu0 %2226, %v2310_v27   ;;  %v1619_v37 = vld [vmem:[#allocation3 + $0x78] sm:$0xff]  ;;  %v1604_v34 = vld [vmem:[#allocation3] sm:$0xff] }
 0x35e   : > { %1276 = vst.msk [vmem:[#allocation4] sm:$0xff] %vm461_vm0, %v1260_v32  ;;  %2319 = vrcp.f32 %v1619_v37 }
 0x35f   : > { %1135 = vst.msk [vmem:[#allocation3 + $0x18] sm:$0xff] %vm428_vm1, %v1118_v60  ;;  %v1208_v1 = vpop.permute.xlu1 %1207 }
 0x360   : > { %v2312_v62 = vpop.eup %2311  ;;  %v1265_v4 = vmul.f32 %v1208_v1, %v1169_v30 }
 0x361   : > { %v2314_v13 = vpop.eup %2313  ;;  %1805 = vperm.xlu1 %2225, %v2312_v62   ;;  %v1605_v10 = vld [vmem:[#allocation3 + $0x8] sm:$0xff]  ;;  %v1606_v50 = vld [vmem:[#allocation3 + $0x10] sm:$0xff] }
 0x362   : > { %1281 = vst.msk [vmem:[#allocation4 + $0x28] sm:$0xff] %vm461_vm0, %v1265_v4  ;;  %1753 = vperm.xlu0 %2226, %v2314_v13   ;;  %2321 = vrcp.f32 %v1605_v10 }
 0x363   : > { %v1213_v15 = vpop.permute.xlu1 %1212  ;;  %v1203_v58 = vpop.permute.xlu0 %1202  ;;  %2323 = vrcp.f32 %v1604_v34 }
 0x364   : > { %v2316_v33 = vpop.eup %2315  ;;  %v1266_v5 = vmul.f32 %v1213_v15, %v1170_v7  ;;  %v1264_v3 = vmul.f32 %v1203_v58, %v1168_v9 }
 0x365   : > { %v2318_v44 = vpop.eup %2317  ;;  %v1300_v46 = vld [vmem:[#allocation4] sm:$0xff]  ;;  %1815 = vperm.xlu1 %2225, %v2316_v33  }
 0x366   : > { %v1371_v21 = vadd.f32 %v2920_v55, %v1300_v46  ;;  %1282 = vst.msk [vmem:[#allocation4 + $0x30] sm:$0xff] %vm461_vm0, %v1266_v5  ;;  %1280 = vst.msk [vmem:[#allocation4 + $0x20] sm:$0xff] %vm461_vm0, %v1264_v3  ;;  %1810 = vperm.xlu0 %2226, %v2318_v44   ;;  %v1607_v26 = vld [vmem:[#allocation3 + $0x18] sm:$0xff] }
 0x367   : > { %v1223_v6 = vpop.permute.xlu1 %1222  ;;  %v1218_v0 = vpop.permute.xlu0 %1217  ;;  %2325 = vrcp.f32 %v1607_v26 }
 0x368   : > { %v2320_v2 = vpop.eup %2319  ;;  %1375 = vst.msk [vmem:[#allocation4] sm:$0xff] %vm461_vm0, %v1371_v21  ;;  %v1268_v47 = vmul.f32 %v1223_v6, %v1172_v29  ;;  %v1267_v8 = vmul.f32 %v1218_v0, %v1171_v18  ;;  %2327 = vrcp.f32 %v1606_v50 }
 0x369   : > { %1187 = vperm.xlu1 %2225, %v2955_v45   ;;  %v1381_v13 = vld [vmem:[#allocation4 + $0x28] sm:$0xff] }
 0x36a   : > { %1284 = vst.msk [vmem:[#allocation4 + $0x40] sm:$0xff] %vm461_vm0, %v1268_v47  ;;  %1283 = vst.msk [vmem:[#allocation4 + $0x38] sm:$0xff] %vm461_vm0, %v1267_v8  ;;  %1820 = vperm.xlu0 %2226, %v2320_v2  }
 0x36b   : > { %v1233_v55 = vpop.permute.xlu1 %1232  ;;  %v1228_v61 = vpop.permute.xlu0 %1227 }
 0x36c   : > { %v1270_v52 = vmul.f32 %v1233_v55, %v1174_v40  ;;  %v1269_v23 = vmul.f32 %v1228_v61, %v1173_v20  ;;  %v2322_v36 = vpop.eup %2321 }
 0x36d   : > { %1197 = vperm.xlu1 %2225, %v2961_v35   ;;  %v2324_v31 = vpop.eup %2323  ;;  %v1382_v19 = vld [vmem:[#allocation4 + $0x30] sm:$0xff]  ;;  %v1380_v28 = vld [vmem:[#allocation4 + $0x20] sm:$0xff] }
 0x36e   : > { %1286 = vst.msk [vmem:[#allocation4 + $0x50] sm:$0xff] %vm461_vm0, %v1270_v52  ;;  %1285 = vst.msk [vmem:[#allocation4 + $0x48] sm:$0xff] %vm461_vm0, %v1269_v23  ;;  %1192 = vperm.xlu0 %2226, %v2949_v53  }
 0x36f   : > { %v1243_v45 = vpop.permute.xlu1 %1242  ;;  %v1238_v56 = vpop.permute.xlu0 %1237 }
 0x370   : > { %v1272_v57 = vmul.f32 %v1243_v45, %v1176_v22  ;;  %v1271_v49 = vmul.f32 %v1238_v56, %v1175_v63 }
 0x371   : > { %1647 = vperm.xlu1 %2225, %v2322_v36   ;;  %v2326_v41 = vpop.eup %2325  ;;  %v1383_v60 = vld [vmem:[#allocation4 + $0x38] sm:$0xff]  ;;  %v1454_v1 = vld [vmem:[#allocation4 + $0x40] sm:$0xff] }
 0x372   : > { %1288 = vst.msk [vmem:[#allocation4 + $0x60] sm:$0xff] %vm461_vm0, %v1272_v57  ;;  %1287 = vst.msk [vmem:[#allocation4 + $0x58] sm:$0xff] %vm461_vm0, %v1271_v49  ;;  %1642 = vperm.xlu0 %2226, %v2324_v31   ;;  %v2328_v53 = vpop.eup %2327 }
 0x373   : > { %v1253_v12 = vpop.permute.xlu1 %1252  ;;  %v1248_v35 = vpop.permute.xlu0 %1247 }
 0x374   : > { %v1274_v24 = vmul.f32 %v1253_v12, %v1178_v39  ;;  %v1273_v38 = vmul.f32 %v1248_v35, %v1177_v48 }
 0x375   : > { %1657 = vperm.xlu1 %2225, %v2326_v41   ;;  %v1456_v54 = vld [vmem:[#allocation4 + $0x50] sm:$0xff]  ;;  %v1455_v5 = vld [vmem:[#allocation4 + $0x48] sm:$0xff] }
 0x376   : > { %1290 = vst.msk [vmem:[#allocation4 + $0x70] sm:$0xff] %vm461_vm0, %v1274_v24  ;;  %1289 = vst.msk [vmem:[#allocation4 + $0x68] sm:$0xff] %vm461_vm0, %v1273_v38  ;;  %1652 = vperm.xlu0 %2226, %v2328_v53  }
 0x377   : > { %v1258_v11 = vpop.permute.xlu0 %1257 }
 0x378   : > { %v1275_v16 = vmul.f32 %v1258_v11, %v1179_v59 }
 0x379   : > { %v1457_v10 = vld [vmem:[#allocation4 + $0x58] sm:$0xff]  ;;  %v1528_v18 = vld [vmem:[#allocation4 + $0x60] sm:$0xff] }
 0x37a   : > { %1291 = vst.msk [vmem:[#allocation4 + $0x78] sm:$0xff] %vm461_vm0, %v1275_v16 }
 0x37d   : > { %v1530_v44 = vld [vmem:[#allocation4 + $0x70] sm:$0xff]  ;;  %v1529_v47 = vld [vmem:[#allocation4 + $0x68] sm:$0xff] }
 0x381   : > { %v1531_v6 = vld [vmem:[#allocation4 + $0x78] sm:$0xff] }
 0x392   : > { %v2152_v17 = vpop.f32.mrb[8].mxu1 }
 0x393   : > { %v1447_v25 = vadd.f32 %v2152_v17, %v1382_v19  ;;  %v1430_v42 = vpop.f32.mrb[9].mxu1  ;;  %v2160_v27 = vpop.f32.mrb[12].mxu0 }
 0x394   : > { %v1445_v32 = vadd.f32 %v1430_v42, %v1380_v28  ;;  %v2153_v30 = vpop.f32.mrb[10].mxu1  ;;  %v1521_v37 = vadd.f32 %v2160_v27, %v1456_v54  ;;  %v1504_v62 = vpop.f32.mrb[13].mxu0 }
 0x395   : > { %1451 = vst.msk [vmem:[#allocation4 + $0x30] sm:$0xff] %vm461_vm0, %v1447_v25  ;;  %v1448_v4 = vadd.f32 %v2153_v30, %v1383_v60  ;;  %v1433_v7 = vpop.f32.mrb[11].mxu1  ;;  %v1519_v9 = vadd.f32 %v1504_v62, %v1454_v1  ;;  %v2161_v15 = vpop.f32.mrb[14].mxu0 }
 0x396   : > { %1449 = vst.msk [vmem:[#allocation4 + $0x20] sm:$0xff] %vm461_vm0, %v1445_v32  ;;  %1525 = vst.msk [vmem:[#allocation4 + $0x50] sm:$0xff] %vm461_vm0, %v1521_v37  ;;  %v1446_v58 = vadd.f32 %v1433_v7, %v1381_v13  ;;  %v1522_v33 = vadd.f32 %v2161_v15, %v1457_v10  ;;  %v1507_v3 = vpop.f32.mrb[15].mxu0  ;;  %v1165_v10 = vld [vmem:[#allocation4 + $0x8] sm:$0xff] }
 0x397   : > { %1452 = vst.msk [vmem:[#allocation4 + $0x38] sm:$0xff] %vm461_vm0, %v1448_v4  ;;  %1523 = vst.msk [vmem:[#allocation4 + $0x40] sm:$0xff] %vm461_vm0, %v1519_v9  ;;  %v1520_v34 = vadd.f32 %v1507_v3, %v1455_v5 }
 0x398   : > { %1450 = vst.msk [vmem:[#allocation4 + $0x28] sm:$0xff] %vm461_vm0, %v1446_v58  ;;  %1526 = vst.msk [vmem:[#allocation4 + $0x58] sm:$0xff] %vm461_vm0, %v1522_v33 }
 0x399   : > { %1524 = vst.msk [vmem:[#allocation4 + $0x48] sm:$0xff] %vm461_vm0, %v1520_v34 }
 0x39b   : > { %v2168_v46 = vpop.f32.mrb[12].mxu1 }
 0x39c   : > { %v1595_v29 = vadd.f32 %v2168_v46, %v1530_v44  ;;  %v1578_v21 = vpop.f32.mrb[13].mxu1  ;;  %v1687_v40 = vld [vmem:[#allocation4 + $0x30] sm:$0xff]  ;;  %v1167_v46 = vld [vmem:[#allocation4 + $0x18] sm:$0xff] }
 0x39d   : > { %v1593_v26 = vadd.f32 %v1578_v21, %v1528_v18  ;;  %v2169_v0 = vpop.f32.mrb[14].mxu1  ;;  %v1744_v52 = vld [vmem:[#allocation4 + $0x50] sm:$0xff]  ;;  %v1685_v56 = vld [vmem:[#allocation4 + $0x20] sm:$0xff] }
 0x39e   : > { %1599 = vst.msk [vmem:[#allocation4 + $0x70] sm:$0xff] %vm461_vm0, %v1595_v29  ;;  %v1596_v2 = vadd.f32 %v2169_v0, %v1531_v6  ;;  %v1581_v8 = vpop.f32.mrb[15].mxu1  ;;  %v1742_v49 = vld [vmem:[#allocation4 + $0x40] sm:$0xff]  ;;  %v1688_v12 = vld [vmem:[#allocation4 + $0x38] sm:$0xff]  ;;  %v1166_v29 = vld [vmem:[#allocation4 + $0x10] sm:$0xff] }
 0x39f   : > { %1597 = vst.msk [vmem:[#allocation4 + $0x60] sm:$0xff] %vm461_vm0, %v1593_v26  ;;  %v1594_v50 = vadd.f32 %v1581_v8, %v1529_v47  ;;  %v1745_v38 = vld [vmem:[#allocation4 + $0x58] sm:$0xff]  ;;  %v1686_v16 = vld [vmem:[#allocation4 + $0x28] sm:$0xff] }
 0x3a0   : > { %1600 = vst.msk [vmem:[#allocation4 + $0x78] sm:$0xff] %vm461_vm0, %v1596_v2  ;;  %v1743_v27 = vld [vmem:[#allocation4 + $0x48] sm:$0xff]  ;;  %v1636_v2 = vld [vmem:[#allocation4] sm:$0xff] }
 0x3a1   : > { %1598 = vst.msk [vmem:[#allocation4 + $0x68] sm:$0xff] %vm461_vm0, %v1594_v50 }
 0x3a5   : > { %v1801_v1 = vld [vmem:[#allocation4 + $0x70] sm:$0xff] }
 0x3a6   : > { %v1799_v28 = vld [vmem:[#allocation4 + $0x60] sm:$0xff] }
 0x3a7   : > { %v1802_v3 = vld [vmem:[#allocation4 + $0x78] sm:$0xff] }
 0x3a8   : > { %v1800_v13 = vld [vmem:[#allocation4 + $0x68] sm:$0xff] }
 0x3c4   : > { %v1702_v20 = vpop.permute.xlu1 %1701 }
 0x3c5   : > { %v1711_v55 = vmul.f32 %v1702_v20, %v1687_v40 }
 0x3c7   : > { %v2064_v61 = vpack.c.bf16 %v1711_v55, %v1711_v55 }
 0x3c8   : > { %v1759_v23 = vpop.permute.xlu1 %1758 }
 0x3c9   : > { %v1768_v22 = vmul.f32 %v1759_v23, %v1744_v52  ;;  %1729 = vrot.lane.b32.xlu0 %v2064_v61, %s2371_s12 }
 0x3cb   : > { %v2068_v63 = vpack.c.bf16 %v1768_v22, %v1768_v22 }
 0x3cc   : > { %v1692_v45 = vpop.permute.xlu1 %1691 }
 0x3cd   : > { %v1709_v36 = vmul.f32 %v1692_v45, %v1685_v56  ;;  %1786 = vrot.lane.b32.xlu0 %v2068_v63, %s2370_s27 }
 0x3cf   : > { %v2062_v57 = vpack.c.bf16 %v1709_v36, %v1709_v36 }
 0x3d0   : > { %v1749_v31 = vpop.permute.xlu1 %1748 }
 0x3d1   : > { %v1766_v39 = vmul.f32 %v1749_v31, %v1742_v49  ;;  %1725 = vrot.lane.b32.xlu0 %v2062_v57, %s2371_s12 }
 0x3d3   : > { %v2066_v48 = vpack.c.bf16 %v1766_v39, %v1766_v39 }
 0x3d4   : > { %v1707_v35 = vpop.permute.xlu0 %1706 }
 0x3d5   : > { %v1712_v41 = vmul.f32 %v1707_v35, %v1688_v12  ;;  %1782 = vrot.lane.b32.xlu0 %v2066_v48, %s2370_s27 }
 0x3d7   : > { %v2065_v24 = vpack.c.bf16 %v1712_v41, %v1712_v41 }
 0x3d8   : > { %v1764_v53 = vpop.permute.xlu0 %1763 }
 0x3d9   : > { %v1769_v59 = vmul.f32 %v1764_v53, %v1745_v38  ;;  %1731 = vrot.lane.b32.xlu1 %v2065_v24, %s2371_s12 }
 0x3db   : > { %v2069_v11 = vpack.c.bf16 %v1769_v59, %v1769_v59 }
 0x3dc   : > { %v1697_v19 = vpop.permute.xlu0 %1696 }
 0x3dd   : > { %v1710_v17 = vmul.f32 %v1697_v19, %v1686_v16  ;;  %1788 = vrot.lane.b32.xlu1 %v2069_v11, %s2370_s27 }
 0x3df   : > { %v2063_v25 = vpack.c.bf16 %v1710_v17, %v1710_v17 }
 0x3e0   : > { %v1806_v42 = vpop.permute.xlu1 %1805 }
 0x3e1   : > { %v1823_v54 = vmul.f32 %v1806_v42, %v1799_v28  ;;  %v1754_v32 = vpop.permute.xlu0 %1753  ;;  %1727 = vrot.lane.b32.xlu1 %v2063_v25, %s2371_s12 }
 0x3e2   : > { %v1767_v60 = vmul.f32 %v1754_v32, %v1743_v27 }
 0x3e3   : > { %v2070_v30 = vpack.c.bf16 %v1823_v54, %v1823_v54 }
 0x3e4   : > { %v2067_v37 = vpack.c.bf16 %v1767_v60, %v1767_v60  ;;  %v1816_v62 = vpop.permute.xlu1 %1815 }
 0x3e5   : > { %v1825_v4 = vmul.f32 %v1816_v62, %v1801_v1  ;;  %v1811_v7 = vpop.permute.xlu0 %1810  ;;  %1839 = vrot.lane.b32.xlu0 %v2070_v30, %s2369_s26 }
 0x3e6   : > { %v1824_v9 = vmul.f32 %v1811_v7, %v1800_v13  ;;  %1784 = vrot.lane.b32.xlu1 %v2067_v37, %s2370_s27 }
 0x3e7   : > { %v2072_v15 = vpack.c.bf16 %v1825_v4, %v1825_v4 }
 0x3e8   : > { %v2071_v58 = vpack.c.bf16 %v1824_v9, %v1824_v9  ;;  %v1188_v33 = vpop.permute.xlu1 %1187 }
 0x3e9   : > { %v1261_v5 = vmul.f32 %v1188_v33, %v1165_v10  ;;  %v1821_v34 = vpop.permute.xlu0 %1820  ;;  %1843 = vrot.lane.b32.xlu0 %v2072_v15, %s2369_s26 }
 0x3ea   : > { %v1826_v44 = vmul.f32 %v1821_v34, %v1802_v3  ;;  %1841 = vrot.lane.b32.xlu1 %v2071_v58, %s2369_s26 }
 0x3eb   : > { %1277 = vst.msk [vmem:[#allocation4 + $0x8] sm:$0xff] %vm461_vm0, %v1261_v5 }
 0x3ec   : > { %v2073_v18 = vpack.c.bf16 %v1826_v44, %v1826_v44  ;;  %v1198_v21 = vpop.permute.xlu1 %1197 }
 0x3ed   : > { %v1263_v26 = vmul.f32 %v1198_v21, %v1167_v46  ;;  %v1193_v6 = vpop.permute.xlu0 %1192 }
 0x3ee   : > { %v1262_v0 = vmul.f32 %v1193_v6, %v1166_v29  ;;  %1845 = vrot.lane.b32.xlu1 %v2073_v18, %s2369_s26 }
 0x3ef   : > { %1279 = vst.msk [vmem:[#allocation4 + $0x18] sm:$0xff] %vm461_vm0, %v1263_v26 }
 0x3f0   : > { %1278 = vst.msk [vmem:[#allocation4 + $0x10] sm:$0xff] %vm461_vm0, %v1262_v0 }
 0x3f1   : > { %v1643_v47 = vpop.permute.xlu0 %1642 }
 0x3f2   : > { %v1301_v8 = vld [vmem:[#allocation4 + $0x8] sm:$0xff]  ;;  %v1660_v50 = vmul.f32 %v1643_v47, %v1636_v2 }
 0x3f3   : > { %v1372_v40 = vadd.f32 %v2924_v43, %v1301_v8  ;;  %v1648_v43 = vpop.permute.xlu1 %1647 }
 0x3f4   : > { %v2058_v20 = vpack.c.bf16 %v1660_v50, %v1660_v50 }
 0x3f5   : > { %1376 = vst.msk [vmem:[#allocation4 + $0x8] sm:$0xff] %vm461_vm0, %v1372_v40 }
 0x3f6   : > { %v1303_v55 = vld [vmem:[#allocation4 + $0x18] sm:$0xff]  ;;  %1681 = vst.msk [vmem:[%s3018_s6] sm:$0xf] %vm1680_vm2, %v2058_v20 }
 0x3f7   : > { %v1374_v61 = vadd.f32 %v2922_v51, %v1303_v55  ;;  %v1302_v52 = vld [vmem:[#allocation4 + $0x10] sm:$0xff]  ;;  %v1658_v36 = vpop.permute.xlu1 %1657 }
 0x3f8   : > { %v1373_v23 = vadd.f32 %v2918_v14, %v1302_v52  ;;  %v1653_v14 = vpop.permute.xlu0 %1652 }
 0x3f9   : > { %1378 = vst.msk [vmem:[#allocation4 + $0x18] sm:$0xff] %vm461_vm0, %v1374_v61 }
 0x3fa   : > { %1377 = vst.msk [vmem:[#allocation4 + $0x10] sm:$0xff] %vm461_vm0, %v1373_v23 }
 0x3fc   : > { %v1637_v22 = vld [vmem:[#allocation4 + $0x8] sm:$0xff] }
 0x3fd   : > { %v1661_v63 = vmul.f32 %v1648_v43, %v1637_v22 }
 0x3ff   : > { %v2059_v45 = vpack.c.bf16 %v1661_v63, %v1661_v63 }
 0x400   : > { %v1639_v56 = vld [vmem:[#allocation4 + $0x18] sm:$0xff] }
 0x401   : > { %1682 = vst.msk [vmem:[%s3018_s6 + $0x4] sm:$0xf] %vm1680_vm2, %v2059_v45  ;;  %v1663_v51 = vmul.f32 %v1658_v36, %v1639_v56  ;;  %v1638_v57 = vld [vmem:[#allocation4 + $0x10] sm:$0xff] }
 0x402   : > { %v1662_v49 = vmul.f32 %v1653_v14, %v1638_v57 }
 0x403   : > { %v2061_v31 = vpack.c.bf16 %v1663_v51, %v1663_v51 }
 0x404   : > { %v2060_v39 = vpack.c.bf16 %v1662_v49, %v1662_v49 }
 0x405   : > { %1684 = vst.msk [vmem:[%s3018_s6 + $0xc] sm:$0xf] %vm1680_vm2, %v2061_v31 }
 0x406   : > { %1683 = vst.msk [vmem:[%s3018_s6 + $0x8] sm:$0xf] %vm1680_vm2, %v2060_v39 }
 0x43b   : > { %v1730_v48 = vpop.permute.xlu0 %1729 }
 0x43c   : > { %1740 = vst.msk [vmem:[%s3018_s6 + $0x8] sm:$0xf] %vm1737_vm3, %v1730_v48 }
 0x43f   : > { %v1787_v12 = vpop.permute.xlu0 %1786 }
 0x440   : > { %1797 = vst.msk [vmem:[%s3018_s6 + $0x8] sm:$0xf] %vm1794_vm4, %v1787_v12 }
 0x443   : > { %v1726_v35 = vpop.permute.xlu0 %1725 }
 0x444   : > { %1738 = vst.msk [vmem:[%s3018_s6] sm:$0xf] %vm1737_vm3, %v1726_v35 }
 0x447   : > { %v1783_v41 = vpop.permute.xlu0 %1782 }
 0x448   : > { %1795 = vst.msk [vmem:[%s3018_s6] sm:$0xf] %vm1794_vm4, %v1783_v41 }
 0x44b   : > { %v1732_v24 = vpop.permute.xlu1 %1731 }
 0x44c   : > { %1741 = vst.msk [vmem:[%s3018_s6 + $0xc] sm:$0xf] %vm1737_vm3, %v1732_v24 }
 0x44f   : > { %v1789_v38 = vpop.permute.xlu1 %1788 }
 0x450   : > { %1798 = vst.msk [vmem:[%s3018_s6 + $0xc] sm:$0xf] %vm1794_vm4, %v1789_v38 }
 0x453   : > { %v1728_v53 = vpop.permute.xlu1 %1727 }
 0x454   : > { %1739 = vst.msk [vmem:[%s3018_s6 + $0x4] sm:$0xf] %vm1737_vm3, %v1728_v53 }
 0x457   : > { %v1840_v59 = vpop.permute.xlu0 %1839 }
 0x458   : > { %v1785_v11 = vpop.permute.xlu1 %1784  ;;  %1852 = vst.msk [vmem:[%s3018_s6] sm:$0xf] %vm1851_vm5, %v1840_v59 }
 0x459   : > { %1796 = vst.msk [vmem:[%s3018_s6 + $0x4] sm:$0xf] %vm1794_vm4, %v1785_v11 }
 0x45b   : > { %v1844_v16 = vpop.permute.xlu0 %1843 }
 0x45c   : > { %v1842_v19 = vpop.permute.xlu1 %1841  ;;  %1854 = vst.msk [vmem:[%s3018_s6 + $0x8] sm:$0xf] %vm1851_vm5, %v1844_v16 }
 0x45d   : > { %1853 = vst.msk [vmem:[%s3018_s6 + $0x4] sm:$0xf] %vm1851_vm5, %v1842_v19 }
 0x460   : > { %v1846_v17 = vpop.permute.xlu1 %1845 }
 0x461   : > { %1855 = vst.msk [vmem:[%s3018_s6 + $0xc] sm:$0xf] %vm1851_vm5, %v1846_v17 }
 0x462 PF: > { %s13_s16 = sadd.s32 1, %s2367_s16   ;;  %s3083_s12 = smov %s2355_s13 }
 0x463   : > { %p10_p10 = scmp.ge.s32.totalorder %s13_s16, 4   ;;  %s3084_s13 = smov %s2434_s21 }
 0x464   : > { %s3085_s14 = smov %s2363_s15  ;;  %s3086_s15 = smov %s3088_s17 }
 0x465   :  { %12 = sbr.rel (!%p10_p10) target bundleno = 3 (0x3), region = 217 }

// kernel: audio_encoder_forward.17
= control target key start
LH: loop header
LB: loop body
LE: loop exit
PB: predicated region body
PF: predicated region fallthrough
CT: control target
= control target key end

     0   :  { %s458_s1 = inlined_call_operand.vmem [shape: bf16[128,128], index: 1, kind: input, shape index: {}]   ;;  %s459_s0 = inlined_call_operand.vmem [shape: bf16[64,128], index: 0, kind: input, shape index: {}]   ;;  %s460_s2 = inlined_call_operand.vmem [shape: f32[1,128], index: 2, kind: input, shape index: {}]   ;;  %s461_s3 = inlined_call_operand.vmem [shape: f32[64,128], index: 3, kind: input, shape index: {}]   ;;  %s462_s4 = inlined_call_operand.vmem [shape: f32[64,128], index: 4, kind: output, shape index: {}]  }
   0x1   :  { %v334_v0 = vld [vmem:[%s458_s1] sm:$0xff]   ;;  %v335_v1 = vld [vmem:[%s458_s1 + $0x8] sm:$0xff]   ;;  %v336_v2 = vld [vmem:[%s458_s1 + $0x10] sm:$0xff]  }
   0x2   :  { %294 = vmatprep.subr.bf16.mxu0 %v334_v0  ;;  %318 = vmatprep.subr.bf16.mxu1 %v334_v0  ;;  %v337_v3 = vld [vmem:[%s458_s1 + $0x18] sm:$0xff]   ;;  %v342_v4 = vld [vmem:[%s459_s0] sm:$0xff]   ;;  %v343_v5 = vld [vmem:[%s459_s0 + $0x10] sm:$0xff]  }
   0x3   :  { %295 = vmatpush3.bf16.msra.mxu0 %v334_v0  ;;  %326 = vmatpush3.bf16.msra.mxu1 %v334_v0  ;;  %v338_v6 = vld [vmem:[%s458_s1 + $0x20] sm:$0xff]   ;;  %v339_v7 = vld [vmem:[%s458_s1 + $0x28] sm:$0xff]   ;;  %v340_v8 = vld [vmem:[%s458_s1 + $0x30] sm:$0xff]  }
   0x4   :  { %296 = vmatprep.subr.bf16.mxu0 %v335_v1  ;;  %319 = vmatprep.subr.bf16.mxu1 %v335_v1  ;;  %v341_v9 = vld [vmem:[%s458_s1 + $0x38] sm:$0xff]   ;;  %v344_v10 = vld [vmem:[%s459_s0 + $0x8] sm:$0xff]   ;;  %v281_v12 = vld [vmem:[%s460_s2] ss:$0 sm:$0xff] }
   0x5   :  { %310 = vmatprep.mubr.bf16.mxu0 %v342_v4  ;;  %314 = vmatprep.mubr.bf16.mxu1 %v343_v5  ;;  %v345_v11 = vld [vmem:[%s459_s0 + $0x18] sm:$0xff]   ;;  %v243_v14 = vld [vmem:[%s461_s3 + $0x10] sm:$0xff]  ;;  %v241_v20 = vld [vmem:[%s461_s3] sm:$0xff] }
   0x6   :  { %v247_v16 = vld [vmem:[%s461_s3 + $0x30] sm:$0xff]  ;;  %v245_v22 = vld [vmem:[%s461_s3 + $0x20] sm:$0xff]  ;;  %v244_v26 = vld [vmem:[%s461_s3 + $0x18] sm:$0xff] }
   0x7   :  { %297 = vmatpush3.bf16.msra.mxu0 %v335_v1  ;;  %327 = vmatpush3.bf16.msra.mxu1 %v335_v1  ;;  %v248_v28 = vld [vmem:[%s461_s3 + $0x38] sm:$0xff]  ;;  %v242_v34 = vld [vmem:[%s461_s3 + $0x8] sm:$0xff] }
   0x8   :  { %298 = vmatprep.subr.bf16.mxu0 %v336_v2  ;;  %320 = vmatprep.subr.bf16.mxu1 %v336_v2  ;;  %v246_v36 = vld [vmem:[%s461_s3 + $0x28] sm:$0xff] }
   0xb   :  { %299 = vmatpush3.bf16.msra.mxu0 %v336_v2  ;;  %328 = vmatpush3.bf16.msra.mxu1 %v336_v2 }
   0xc   :  { %300 = vmatprep.subr.bf16.mxu0 %v337_v3  ;;  %321 = vmatprep.subr.bf16.mxu1 %v337_v3 }
   0xf   :  { %301 = vmatpush3.bf16.msra.mxu0 %v337_v3  ;;  %329 = vmatpush3.bf16.msra.mxu1 %v337_v3 }
  0x10   :  { %302 = vmatprep.subr.bf16.mxu0 %v338_v6  ;;  %322 = vmatprep.subr.bf16.mxu1 %v338_v6 }
  0x13   :  { %303 = vmatpush3.bf16.msra.mxu0 %v338_v6  ;;  %330 = vmatpush3.bf16.msra.mxu1 %v338_v6 }
  0x14   :  { %304 = vmatprep.subr.bf16.mxu0 %v339_v7  ;;  %323 = vmatprep.subr.bf16.mxu1 %v339_v7 }
  0x17   :  { %305 = vmatpush3.bf16.msra.mxu0 %v339_v7  ;;  %331 = vmatpush3.bf16.msra.mxu1 %v339_v7 }
  0x18   :  { %306 = vmatprep.subr.bf16.mxu0 %v340_v8  ;;  %324 = vmatprep.subr.bf16.mxu1 %v340_v8 }
  0x1b   :  { %307 = vmatpush3.bf16.msra.mxu0 %v340_v8  ;;  %332 = vmatpush3.bf16.msra.mxu1 %v340_v8 }
  0x1c   :  { %308 = vmatprep.subr.bf16.mxu0 %v341_v9  ;;  %325 = vmatprep.subr.bf16.mxu1 %v341_v9 }
  0x1f   :  { %309 = vmatpush3.bf16.msra.mxu0 %v341_v9  ;;  %333 = vmatpush3.bf16.msra.mxu1 %v341_v9 }
  0x22   :  { %311 = vmatmul.mubr.bf16.vlgmr.msra.gmra.mrb[0].mxu0 %v344_v10  ;;  %315 = vmatmul.mubr.bf16.vlgmr.msra.gmra.mrb[0].mxu1 %v345_v11 }
  0xf5   :  { %v312_v13 = vpop.f32.mrb[0].mxu0  ;;  %v316_v15 = vpop.f32.mrb[0].mxu1 }
  0xf6   :  { %v235_v17 = vadd.f32 %v312_v13, %v281_v12  ;;  %v239_v18 = vadd.f32 %v316_v15, %v281_v12  ;;  %v168_v19 = vpop.f32.mrb[1].mxu0  ;;  %v184_v21 = vpop.f32.mrb[1].mxu1 }
  0xf7   :  { %v233_v23 = vadd.f32 %v281_v12, %v168_v19  ;;  %v237_v24 = vadd.f32 %v281_v12, %v184_v21  ;;  %v313_v25 = vpop.f32.mrb[2].mxu0  ;;  %v317_v27 = vpop.f32.mrb[2].mxu1 }
  0xf8   :  { %v251_v29 = vadd.f32 %v243_v14, %v235_v17  ;;  %v255_v30 = vadd.f32 %v247_v16, %v239_v18  ;;  %v236_v31 = vadd.f32 %v313_v25, %v281_v12  ;;  %v240_v32 = vadd.f32 %v317_v27, %v281_v12  ;;  %v171_v33 = vpop.f32.mrb[3].mxu0  ;;  %v187_v35 = vpop.f32.mrb[3].mxu1 }
  0xf9   :  { %v249_v37 = vadd.f32 %v241_v20, %v233_v23  ;;  %v253_v38 = vadd.f32 %v245_v22, %v237_v24  ;;  %v234_v39 = vadd.f32 %v281_v12, %v171_v33  ;;  %v238_v40 = vadd.f32 %v281_v12, %v187_v35 }
  0xfa   :  { %259 = vst [vmem:[%s462_s4 + $0x10] sm:$0xff] %v251_v29  ;;  %263 = vst [vmem:[%s462_s4 + $0x30] sm:$0xff] %v255_v30  ;;  %v252_v41 = vadd.f32 %v244_v26, %v236_v31  ;;  %v256_v42 = vadd.f32 %v248_v28, %v240_v32 }
  0xfb   :  { %257 = vst [vmem:[%s462_s4] sm:$0xff] %v249_v37  ;;  %261 = vst [vmem:[%s462_s4 + $0x20] sm:$0xff] %v253_v38  ;;  %v250_v43 = vadd.f32 %v242_v34, %v234_v39  ;;  %v254_v44 = vadd.f32 %v246_v36, %v238_v40 }
  0xfc   :  { %260 = vst [vmem:[%s462_s4 + $0x18] sm:$0xff] %v252_v41  ;;  %264 = vst [vmem:[%s462_s4 + $0x38] sm:$0xff] %v256_v42 }
  0xfd   :  { %258 = vst [vmem:[%s462_s4 + $0x8] sm:$0xff] %v250_v43  ;;  %262 = vst [vmem:[%s462_s4 + $0x28] sm:$0xff] %v254_v44 }

// kernel: audio_encoder_forward.19
= control target key start
LH: loop header
LB: loop body
LE: loop exit
PB: predicated region body
PF: predicated region fallthrough
CT: control target
= control target key end

     0   :  { %s1005_s1 = inlined_call_operand.vmem [shape: bf16[512,128], index: 1, kind: input, shape index: {}]   ;;  %s1006_s0 = inlined_call_operand.vmem [shape: bf16[64,512], index: 0, kind: input, shape index: {}]   ;;  %s1007_s2 = inlined_call_operand.vmem [shape: f32[1,128], index: 2, kind: input, shape index: {}]   ;;  %s1008_s3 = inlined_call_operand.vmem [shape: f32[64,128], index: 3, kind: input, shape index: {}]   ;;  %s1009_s4 = inlined_call_operand.vmem [shape: f32[64,128], index: 4, kind: output, shape index: {}]  }
   0x1   :  { %v719_v0 = vld [vmem:[%s1005_s1 + $0x40] sm:$0xff]   ;;  %v723_v4 = vld [vmem:[%s1005_s1 + $0x48] sm:$0xff]   ;;  %v727_v8 = vld [vmem:[%s1005_s1 + $0x50] sm:$0xff]  }
   0x2   :  { %v720_v1 = vld [vmem:[%s1005_s1 + $0xc0] sm:$0xff]   ;;  %639 = vmatprep.subr.bf16.mxu0 %v719_v0  ;;  %v724_v5 = vld [vmem:[%s1005_s1 + $0xc8] sm:$0xff]   ;;  %v728_v9 = vld [vmem:[%s1005_s1 + $0xd0] sm:$0xff]  }
   0x3   :  { %v721_v2 = vld [vmem:[%s1005_s1] sm:$0xff]   ;;  %679 = vmatprep.subr.bf16.mxu1 %v720_v1  ;;  %v725_v6 = vld [vmem:[%s1005_s1 + $0x8] sm:$0xff]   ;;  %v729_v10 = vld [vmem:[%s1005_s1 + $0x10] sm:$0xff]  }
   0x4   :  { %v722_v3 = vld [vmem:[%s1005_s1 + $0x80] sm:$0xff]   ;;  %640 = vmatpush3.bf16.msra.mxu0 %v721_v2  ;;  %v726_v7 = vld [vmem:[%s1005_s1 + $0x88] sm:$0xff]   ;;  %v730_v11 = vld [vmem:[%s1005_s1 + $0x90] sm:$0xff]  }
   0x5   :  { %680 = vmatpush3.bf16.msra.mxu1 %v722_v3  ;;  %641 = vmatprep.subr.bf16.mxu0 %v723_v4  ;;  %v731_v12 = vld [vmem:[%s1005_s1 + $0x58] sm:$0xff]   ;;  %v735_v16 = vld [vmem:[%s1005_s1 + $0x60] sm:$0xff]   ;;  %v739_v20 = vld [vmem:[%s1005_s1 + $0x68] sm:$0xff]  }
   0x6   :  { %681 = vmatprep.subr.bf16.mxu1 %v724_v5  ;;  %v732_v13 = vld [vmem:[%s1005_s1 + $0xd8] sm:$0xff]   ;;  %v736_v17 = vld [vmem:[%s1005_s1 + $0xe0] sm:$0xff]   ;;  %v740_v21 = vld [vmem:[%s1005_s1 + $0xe8] sm:$0xff]  }
   0x7   :  { %v733_v14 = vld [vmem:[%s1005_s1 + $0x18] sm:$0xff]   ;;  %v737_v18 = vld [vmem:[%s1005_s1 + $0x20] sm:$0xff]   ;;  %v741_v22 = vld [vmem:[%s1005_s1 + $0x28] sm:$0xff]  }
   0x8   :  { %642 = vmatpush3.bf16.msra.mxu0 %v725_v6  ;;  %v734_v15 = vld [vmem:[%s1005_s1 + $0x98] sm:$0xff]   ;;  %v738_v19 = vld [vmem:[%s1005_s1 + $0xa0] sm:$0xff]   ;;  %v742_v23 = vld [vmem:[%s1005_s1 + $0xa8] sm:$0xff]  }
   0x9   :  { %682 = vmatpush3.bf16.msra.mxu1 %v726_v7  ;;  %643 = vmatprep.subr.bf16.mxu0 %v727_v8  ;;  %v743_v24 = vld [vmem:[%s1005_s1 + $0x70] sm:$0xff]   ;;  %v747_v28 = vld [vmem:[%s1005_s1 + $0x78] sm:$0xff]   ;;  %v947_v57 = vld [vmem:[%s1007_s2] ss:$0 sm:$0xff] }
   0xa   :  { %683 = vmatprep.subr.bf16.mxu1 %v728_v9  ;;  %v744_v25 = vld [vmem:[%s1005_s1 + $0xf0] sm:$0xff]   ;;  %v748_v29 = vld [vmem:[%s1005_s1 + $0xf8] sm:$0xff]   ;;  %v562_v62 = vld [vmem:[%s1008_s3] sm:$0xff] }
   0xb   :  { %v745_v26 = vld [vmem:[%s1005_s1 + $0x30] sm:$0xff]   ;;  %v749_v30 = vld [vmem:[%s1005_s1 + $0x38] sm:$0xff]   ;;  %v563_v1 = vld [vmem:[%s1008_s3 + $0x8] sm:$0xff] }
   0xc   :  { %644 = vmatpush3.bf16.msra.mxu0 %v729_v10  ;;  %v746_v27 = vld [vmem:[%s1005_s1 + $0xb0] sm:$0xff]   ;;  %v750_v31 = vld [vmem:[%s1005_s1 + $0xb8] sm:$0xff]  }
   0xd   :  { %684 = vmatpush3.bf16.msra.mxu1 %v730_v11  ;;  %645 = vmatprep.subr.bf16.mxu0 %v731_v12  ;;  %v751_v32 = vld [vmem:[%s1006_s0] ss:$16 sps:$4 sm:$0xff]   ;;  %v753_v33 = vld [vmem:[%s1006_s0 + $0x4] ss:$16 sps:$4 sm:$0xff]   ;;  %v754_v34 = vld [vmem:[%s1006_s0 + $0x8] ss:$16 sps:$4 sm:$0xff]  }
   0xe   :  { %685 = vmatprep.subr.bf16.mxu1 %v732_v13  ;;  %v756_v35 = vld [vmem:[%s1006_s0 + $0xc] ss:$16 sps:$4 sm:$0xff]   ;;  %422 = vmatprep.mubr.bf16.mxu0 %v753_v33  ;;  %v757_v36 = vld [vmem:[%s1006_s0 + $0x24] ss:$16 sps:$4 sm:$0xff]   ;;  %v761_v38 = vld [vmem:[%s1006_s0 + $0x20] ss:$16 sps:$4 sm:$0xff]  }
   0xf   :  { %487 = vmatprep.mubr.bf16.mxu1 %v756_v35  ;;  %v759_v37 = vld [vmem:[%s1006_s0 + $0x2c] ss:$16 sps:$4 sm:$0xff]   ;;  %v762_v39 = vld [vmem:[%s1006_s0 + $0x28] ss:$16 sps:$4 sm:$0xff]   ;;  %v763_v40 = vld [vmem:[%s1006_s0 + $0x44] ss:$16 sps:$4 sm:$0xff]  }
  0x10   :  { %646 = vmatpush3.bf16.msra.mxu0 %v733_v14  ;;  %v765_v41 = vld [vmem:[%s1006_s0 + $0x4c] ss:$16 sps:$4 sm:$0xff]   ;;  %v767_v42 = vld [vmem:[%s1006_s0 + $0x40] ss:$16 sps:$4 sm:$0xff]   ;;  %v768_v43 = vld [vmem:[%s1006_s0 + $0x48] ss:$16 sps:$4 sm:$0xff]  }
  0x11   :  { %686 = vmatpush3.bf16.msra.mxu1 %v734_v15  ;;  %647 = vmatprep.subr.bf16.mxu0 %v735_v16  ;;  %v769_v44 = vld [vmem:[%s1006_s0 + $0x64] ss:$16 sps:$4 sm:$0xff]   ;;  %v771_v45 = vld [vmem:[%s1006_s0 + $0x6c] ss:$16 sps:$4 sm:$0xff]   ;;  %v773_v46 = vld [vmem:[%s1006_s0 + $0x60] ss:$16 sps:$4 sm:$0xff]  }
  0x12   :  { %687 = vmatprep.subr.bf16.mxu1 %v736_v17  ;;  %v774_v47 = vld [vmem:[%s1006_s0 + $0x68] ss:$16 sps:$4 sm:$0xff]  }
  0x14   :  { %648 = vmatpush3.bf16.msra.mxu0 %v737_v18  ;;  %v564_v18 = vld [vmem:[%s1008_s3 + $0x10] sm:$0xff] }
  0x15   :  { %688 = vmatpush3.bf16.msra.mxu1 %v738_v19  ;;  %649 = vmatprep.subr.bf16.mxu0 %v739_v20 }
  0x16   :  { %689 = vmatprep.subr.bf16.mxu1 %v740_v21  ;;  %v565_v21 = vld [vmem:[%s1008_s3 + $0x18] sm:$0xff] }
  0x18   :  { %650 = vmatpush3.bf16.msra.mxu0 %v741_v22 }
  0x19   :  { %690 = vmatpush3.bf16.msra.mxu1 %v742_v23  ;;  %651 = vmatprep.subr.bf16.mxu0 %v743_v24 }
  0x1a   :  { %691 = vmatprep.subr.bf16.mxu1 %v744_v25 }
  0x1c   :  { %652 = vmatpush3.bf16.msra.mxu0 %v745_v26 }
  0x1d   :  { %692 = vmatpush3.bf16.msra.mxu1 %v746_v27  ;;  %653 = vmatprep.subr.bf16.mxu0 %v747_v28 }
  0x1e   :  { %693 = vmatprep.subr.bf16.mxu1 %v748_v29 }
  0x20   :  { %654 = vmatpush3.bf16.msra.mxu0 %v749_v30 }
  0x21   :  { %694 = vmatpush3.bf16.msra.mxu1 %v750_v31 }
  0x23   :  { %423 = vmatmul.mubr.bf16.vlgmr.msra.gmra.mrb[0].mxu0 %v751_v32 }
  0x24   :  { %488 = vmatmul.mubr.bf16.vlgmr.msra.gmra.mrb[0].mxu1 %v754_v34  ;;  %430 = vmatprep.mubr.bf16.mxu0 %v757_v36 }
  0x25   :  { %495 = vmatprep.mubr.bf16.mxu1 %v759_v37 }
  0x2b   :  { %431 = vmatmul.mubr.bf16.gmra.mrb[4].mxu0 %v761_v38  ;;  %v566_v38 = vld [vmem:[%s1008_s3 + $0x20] sm:$0xff] }
  0x2c   :  { %496 = vmatmul.mubr.bf16.gmra.mrb[4].mxu1 %v762_v39  ;;  %438 = vmatprep.mubr.bf16.mxu0 %v763_v40 }
  0x2d   :  { %503 = vmatprep.mubr.bf16.mxu1 %v765_v41  ;;  %v567_v41 = vld [vmem:[%s1008_s3 + $0x28] sm:$0xff] }
  0x33   :  { %439 = vmatmul.mubr.bf16.gmra.mrb[8].mxu0 %v767_v42 }
  0x34   :  { %504 = vmatmul.mubr.bf16.gmra.mrb[8].mxu1 %v768_v43  ;;  %446 = vmatprep.mubr.bf16.mxu0 %v769_v44 }
  0x35   :  { %511 = vmatprep.mubr.bf16.mxu1 %v771_v45 }
  0x3b   :  { %447 = vmatmul.mubr.bf16.gmra.mrb[12].mxu0 %v773_v46 }
  0x3c   :  { %512 = vmatmul.mubr.bf16.gmra.mrb[12].mxu1 %v774_v47 }
  0xf6   :  { %v655_v48 = vpop.f32.mrb[0].mxu0 }
  0xf7   :  { %v695_v49 = vpop.f32.mrb[0].mxu1  ;;  %v656_v50 = vpop.f32.mrb[1].mxu0 }
  0xf8   :  { %v657_v51 = vadd.f32 %v656_v50, %v655_v48  ;;  %v696_v52 = vpop.f32.mrb[1].mxu1  ;;  %v658_v53 = vpop.f32.mrb[2].mxu0 }
  0xf9   :  { %v697_v54 = vadd.f32 %v696_v52, %v695_v49  ;;  %v698_v55 = vpop.f32.mrb[2].mxu1  ;;  %v659_v56 = vpop.f32.mrb[3].mxu0 }
  0xfa   :  { %v660_v58 = vadd.f32 %v659_v56, %v658_v53  ;;  %v699_v59 = vpop.f32.mrb[3].mxu1 }
  0xfb   :  { %v490_v60 = vadd.f32 %v697_v54, %v657_v51  ;;  %v700_v61 = vadd.f32 %v699_v59, %v698_v55  ;;  %v568_v59 = vld [vmem:[%s1008_s3 + $0x30] sm:$0xff] }
  0xfd   :  { %v554_v63 = vadd.f32 %v947_v57, %v490_v60  ;;  %v493_v0 = vadd.f32 %v700_v61, %v660_v58 }
  0xfe   :  { %v661_v2 = vpop.f32.mrb[4].mxu0 }
  0xff   :  { %v570_v3 = vadd.f32 %v562_v62, %v554_v63  ;;  %v555_v4 = vadd.f32 %v947_v57, %v493_v0  ;;  %v701_v5 = vpop.f32.mrb[4].mxu1  ;;  %v662_v6 = vpop.f32.mrb[5].mxu0  ;;  %v569_v62 = vld [vmem:[%s1008_s3 + $0x38] sm:$0xff] }
 0x100   :  { %v663_v7 = vadd.f32 %v662_v6, %v661_v2  ;;  %v702_v8 = vpop.f32.mrb[5].mxu1  ;;  %v664_v9 = vpop.f32.mrb[6].mxu0 }
 0x101   :  { %578 = vst [vmem:[%s1009_s4] sm:$0xff] %v570_v3  ;;  %v571_v10 = vadd.f32 %v563_v1, %v555_v4  ;;  %v703_v11 = vadd.f32 %v702_v8, %v701_v5  ;;  %v704_v12 = vpop.f32.mrb[6].mxu1  ;;  %v665_v13 = vpop.f32.mrb[7].mxu0 }
 0x102   :  { %v666_v14 = vadd.f32 %v665_v13, %v664_v9  ;;  %v705_v15 = vpop.f32.mrb[7].mxu1 }
 0x103   :  { %579 = vst [vmem:[%s1009_s4 + $0x8] sm:$0xff] %v571_v10  ;;  %v498_v16 = vadd.f32 %v703_v11, %v663_v7  ;;  %v706_v17 = vadd.f32 %v705_v15, %v704_v12 }
 0x105   :  { %v556_v19 = vadd.f32 %v947_v57, %v498_v16  ;;  %v501_v20 = vadd.f32 %v706_v17, %v666_v14 }
 0x106   :  { %v667_v22 = vpop.f32.mrb[8].mxu0 }
 0x107   :  { %v572_v23 = vadd.f32 %v564_v18, %v556_v19  ;;  %v557_v24 = vadd.f32 %v947_v57, %v501_v20  ;;  %v707_v25 = vpop.f32.mrb[8].mxu1  ;;  %v668_v26 = vpop.f32.mrb[9].mxu0 }
 0x108   :  { %v669_v27 = vadd.f32 %v668_v26, %v667_v22  ;;  %v708_v28 = vpop.f32.mrb[9].mxu1  ;;  %v670_v29 = vpop.f32.mrb[10].mxu0 }
 0x109   :  { %580 = vst [vmem:[%s1009_s4 + $0x10] sm:$0xff] %v572_v23  ;;  %v573_v30 = vadd.f32 %v565_v21, %v557_v24  ;;  %v709_v31 = vadd.f32 %v708_v28, %v707_v25  ;;  %v710_v32 = vpop.f32.mrb[10].mxu1  ;;  %v671_v33 = vpop.f32.mrb[11].mxu0 }
 0x10a   :  { %v672_v34 = vadd.f32 %v671_v33, %v670_v29  ;;  %v711_v35 = vpop.f32.mrb[11].mxu1 }
 0x10b   :  { %581 = vst [vmem:[%s1009_s4 + $0x18] sm:$0xff] %v573_v30  ;;  %v506_v36 = vadd.f32 %v709_v31, %v669_v27  ;;  %v712_v37 = vadd.f32 %v711_v35, %v710_v32 }
 0x10d   :  { %v558_v39 = vadd.f32 %v947_v57, %v506_v36  ;;  %v509_v40 = vadd.f32 %v712_v37, %v672_v34 }
 0x10e   :  { %v673_v42 = vpop.f32.mrb[12].mxu0 }
 0x10f   :  { %v574_v43 = vadd.f32 %v566_v38, %v558_v39  ;;  %v559_v44 = vadd.f32 %v947_v57, %v509_v40  ;;  %v713_v45 = vpop.f32.mrb[12].mxu1  ;;  %v674_v46 = vpop.f32.mrb[13].mxu0 }
 0x110   :  { %v675_v47 = vadd.f32 %v674_v46, %v673_v42  ;;  %v714_v48 = vpop.f32.mrb[13].mxu1  ;;  %v676_v49 = vpop.f32.mrb[14].mxu0 }
 0x111   :  { %582 = vst [vmem:[%s1009_s4 + $0x20] sm:$0xff] %v574_v43  ;;  %v575_v50 = vadd.f32 %v567_v41, %v559_v44  ;;  %v715_v51 = vadd.f32 %v714_v48, %v713_v45  ;;  %v716_v52 = vpop.f32.mrb[14].mxu1  ;;  %v677_v53 = vpop.f32.mrb[15].mxu0 }
 0x112   :  { %v678_v54 = vadd.f32 %v677_v53, %v676_v49  ;;  %v717_v55 = vpop.f32.mrb[15].mxu1 }
 0x113   :  { %583 = vst [vmem:[%s1009_s4 + $0x28] sm:$0xff] %v575_v50  ;;  %v514_v56 = vadd.f32 %v715_v51, %v675_v47  ;;  %v718_v58 = vadd.f32 %v717_v55, %v716_v52 }
 0x115   :  { %v560_v60 = vadd.f32 %v947_v57, %v514_v56  ;;  %v517_v61 = vadd.f32 %v718_v58, %v678_v54 }
 0x117   :  { %v576_v63 = vadd.f32 %v568_v59, %v560_v60  ;;  %v561_v0 = vadd.f32 %v947_v57, %v517_v61 }
 0x119   :  { %584 = vst [vmem:[%s1009_s4 + $0x30] sm:$0xff] %v576_v63  ;;  %v577_v1 = vadd.f32 %v569_v62, %v561_v0 }
 0x11b   :  { %585 = vst [vmem:[%s1009_s4 + $0x38] sm:$0xff] %v577_v1 }

// kernel: audio_encoder_forward.18
= control target key start
LH: loop header
LB: loop body
LE: loop exit
PB: predicated region body
PF: predicated region fallthrough
CT: control target
= control target key end

     0   :  { %v1333_v48 = vmov 0   ;;  %s1957_s0 = inlined_call_operand.vmem [shape: f32[64,128], index: 0, kind: input, shape index: {}]   ;;  %s1958_s1 = inlined_call_operand.vmem [shape: bf16[128,512], index: 1, kind: input, shape index: {}]   ;;  %s1959_s2 = inlined_call_operand.vmem [shape: f32[1,128], index: 2, kind: input, shape index: {}]   ;;  %s1960_s3 = inlined_call_operand.vmem [shape: f32[1,128], index: 3, kind: input, shape index: {}]   ;;  %s1961_s4 = inlined_call_operand.vmem [shape: f32[1,512], index: 4, kind: input, shape index: {}]   ;;  %s1962_s5 = inlined_call_operand.vmem [shape: bf16[64,512], index: 5, kind: output, shape index: {}]  }
   0x1   :  { %v1367_v0 = vld [vmem:[%s1957_s0] sm:$0xff]  ;;  %v1372_v1 = vld [vmem:[%s1957_s0 + $0x8] sm:$0xff]  ;;  %v1383_v4 = vld [vmem:[%s1957_s0 + $0x10] sm:$0xff]  ;;  %467 = vmatprep.mubr.bf16.mxu0 %v1333_v48  ;;  %540 = vmatprep.mubr.bf16.mxu1 %v1333_v48 }
   0x2   :  { %65 = vadd.xlane.f32.xlu0 %v1367_v0  ;;  %v89_v2 = vmul.f32 %v1367_v0, %v1367_v0  ;;  %v90_v3 = vmul.f32 %v1372_v1, %v1372_v1  ;;  %v1388_v5 = vld [vmem:[%s1957_s0 + $0x18] sm:$0xff]  ;;  %v91_v6 = vmul.f32 %v1383_v4, %v1383_v4  ;;  %v1399_v8 = vld [vmem:[%s1957_s0 + $0x20] sm:$0xff]  ;;  %v1404_v9 = vld [vmem:[%s1957_s0 + $0x28] sm:$0xff] }
   0x3   :  { %v92_v7 = vmul.f32 %v1388_v5, %v1388_v5  ;;  %v1205_v10 = vld [vmem:[%s1958_s1 + $0x4] ss:$16 sps:$4 sm:$0xff]   ;;  %v1207_v11 = vld [vmem:[%s1958_s1 + $0xc] ss:$16 sps:$4 sm:$0xff]   ;;  %v1209_v12 = vld [vmem:[%s1958_s1] ss:$16 sps:$4 sm:$0xff]   ;;  %v93_v14 = vmul.f32 %v1399_v8, %v1399_v8  ;;  %v94_v17 = vmul.f32 %v1404_v9, %v1404_v9 }
   0x4   :  { %97 = vadd.xlane.f32.xlu1 %v89_v2  ;;  %435 = vmatprep.subr.bf16.mxu0 %v1205_v10  ;;  %v1210_v13 = vld [vmem:[%s1958_s1 + $0x8] ss:$16 sps:$4 sm:$0xff]   ;;  %v1211_v15 = vld [vmem:[%s1958_s1 + $0x24] ss:$16 sps:$4 sm:$0xff]   ;;  %v1213_v16 = vld [vmem:[%s1958_s1 + $0x2c] ss:$16 sps:$4 sm:$0xff]  }
   0x5   :  { %508 = vmatprep.subr.bf16.mxu1 %v1207_v11  ;;  %436 = vmatpush1.bf16.msra.mxu0 %v1209_v12  ;;  %v1215_v18 = vld [vmem:[%s1958_s1 + $0x20] ss:$16 sps:$4 sm:$0xff]   ;;  %v1216_v19 = vld [vmem:[%s1958_s1 + $0x28] ss:$16 sps:$4 sm:$0xff]   ;;  %v1217_v22 = vld [vmem:[%s1958_s1 + $0x44] ss:$16 sps:$4 sm:$0xff]  }
   0x6   :  { %67 = vadd.xlane.f32.xlu0 %v1372_v1  ;;  %509 = vmatpush1.bf16.msra.mxu1 %v1210_v13  ;;  %v1439_v20 = vld [vmem:[%s1957_s0 + $0x30] sm:$0xff]  ;;  %v1444_v21 = vld [vmem:[%s1957_s0 + $0x38] sm:$0xff] }
   0x7   :  { %437 = vmatprep.subr.bf16.mxu0 %v1211_v15  ;;  %510 = vmatprep.subr.bf16.mxu1 %v1213_v16  ;;  %v1219_v23 = vld [vmem:[%s1958_s1 + $0x4c] ss:$16 sps:$4 sm:$0xff]   ;;  %v1221_v24 = vld [vmem:[%s1958_s1 + $0x40] ss:$16 sps:$4 sm:$0xff]   ;;  %v1222_v25 = vld [vmem:[%s1958_s1 + $0x48] ss:$16 sps:$4 sm:$0xff]   ;;  %v95_v26 = vmul.f32 %v1439_v20, %v1439_v20  ;;  %v96_v27 = vmul.f32 %v1444_v21, %v1444_v21 }
   0x8   :  { %99 = vadd.xlane.f32.xlu1 %v90_v3  ;;  %v1223_v28 = vld [vmem:[%s1958_s1 + $0x64] ss:$16 sps:$4 sm:$0xff]   ;;  %v1225_v29 = vld [vmem:[%s1958_s1 + $0x6c] ss:$16 sps:$4 sm:$0xff]   ;;  %v1227_v30 = vld [vmem:[%s1958_s1 + $0x60] ss:$16 sps:$4 sm:$0xff]  }
   0x9   :  { %438 = vmatpush1.bf16.msra.mxu0 %v1215_v18  ;;  %v1228_v31 = vld [vmem:[%s1958_s1 + $0x68] ss:$16 sps:$4 sm:$0xff]   ;;  %v1229_v32 = vld [vmem:[%s1958_s1 + $0x84] ss:$16 sps:$4 sm:$0xff]   ;;  %v1231_v33 = vld [vmem:[%s1958_s1 + $0x8c] ss:$16 sps:$4 sm:$0xff]  }
   0xa   :  { %69 = vadd.xlane.f32.xlu0 %v1383_v4  ;;  %511 = vmatpush1.bf16.msra.mxu1 %v1216_v19  ;;  %v1233_v34 = vld [vmem:[%s1958_s1 + $0x80] ss:$16 sps:$4 sm:$0xff]   ;;  %v1234_v35 = vld [vmem:[%s1958_s1 + $0x88] ss:$16 sps:$4 sm:$0xff]   ;;  %v1235_v36 = vld [vmem:[%s1958_s1 + $0xa4] ss:$16 sps:$4 sm:$0xff]  }
   0xb   :  { %439 = vmatprep.subr.bf16.mxu0 %v1217_v22  ;;  %512 = vmatprep.subr.bf16.mxu1 %v1219_v23  ;;  %v1237_v37 = vld [vmem:[%s1958_s1 + $0xac] ss:$16 sps:$4 sm:$0xff]   ;;  %v1239_v38 = vld [vmem:[%s1958_s1 + $0xa0] ss:$16 sps:$4 sm:$0xff]   ;;  %v1240_v39 = vld [vmem:[%s1958_s1 + $0xa8] ss:$16 sps:$4 sm:$0xff]  }
   0xc   :  { %71 = vadd.xlane.f32.xlu1 %v1388_v5  ;;  %v1241_v40 = vld [vmem:[%s1958_s1 + $0xc4] ss:$16 sps:$4 sm:$0xff]   ;;  %v1243_v41 = vld [vmem:[%s1958_s1 + $0xcc] ss:$16 sps:$4 sm:$0xff]   ;;  %v1245_v42 = vld [vmem:[%s1958_s1 + $0xc0] ss:$16 sps:$4 sm:$0xff]  }
   0xd   :  { %440 = vmatpush1.bf16.msra.mxu0 %v1221_v24  ;;  %v1246_v43 = vld [vmem:[%s1958_s1 + $0xc8] ss:$16 sps:$4 sm:$0xff]   ;;  %v1247_v44 = vld [vmem:[%s1958_s1 + $0xe4] ss:$16 sps:$4 sm:$0xff]   ;;  %v1249_v45 = vld [vmem:[%s1958_s1 + $0xec] ss:$16 sps:$4 sm:$0xff]  }
   0xe   :  { %101 = vadd.xlane.f32.xlu0 %v91_v6  ;;  %513 = vmatpush1.bf16.msra.mxu1 %v1222_v25  ;;  %v1251_v46 = vld [vmem:[%s1958_s1 + $0xe0] ss:$16 sps:$4 sm:$0xff]   ;;  %v1252_v47 = vld [vmem:[%s1958_s1 + $0xe8] ss:$16 sps:$4 sm:$0xff]  }
   0xf   :  { %441 = vmatprep.subr.bf16.mxu0 %v1223_v28  ;;  %514 = vmatprep.subr.bf16.mxu1 %v1225_v29 }
  0x10   :  { %103 = vadd.xlane.f32.xlu1 %v92_v7 }
  0x11   :  { %442 = vmatpush1.bf16.msra.mxu0 %v1227_v30 }
  0x12   :  { %73 = vadd.xlane.f32.xlu0 %v1399_v8  ;;  %515 = vmatpush1.bf16.msra.mxu1 %v1228_v31 }
  0x13   :  { %443 = vmatprep.subr.bf16.mxu0 %v1229_v32  ;;  %516 = vmatprep.subr.bf16.mxu1 %v1231_v33 }
  0x14   :  { %75 = vadd.xlane.f32.xlu1 %v1404_v9 }
  0x15   :  { %444 = vmatpush1.bf16.msra.mxu0 %v1233_v34 }
  0x16   :  { %105 = vadd.xlane.f32.xlu0 %v93_v14  ;;  %517 = vmatpush1.bf16.msra.mxu1 %v1234_v35 }
  0x17   :  { %445 = vmatprep.subr.bf16.mxu0 %v1235_v36  ;;  %518 = vmatprep.subr.bf16.mxu1 %v1237_v37 }
  0x18   :  { %107 = vadd.xlane.f32.xlu1 %v94_v17 }
  0x19   :  { %446 = vmatpush1.bf16.msra.mxu0 %v1239_v38 }
  0x1a   :  { %77 = vadd.xlane.f32.xlu0 %v1439_v20  ;;  %519 = vmatpush1.bf16.msra.mxu1 %v1240_v39  ;;  %v1546_v39 = vld [vmem:[%s1959_s2] ss:$0 sm:$0xff] }
  0x1b   :  { %447 = vmatprep.subr.bf16.mxu0 %v1241_v40  ;;  %520 = vmatprep.subr.bf16.mxu1 %v1243_v41 }
  0x1c   :  { %79 = vadd.xlane.f32.xlu1 %v1444_v21 }
  0x1d   :  { %448 = vmatpush1.bf16.msra.mxu0 %v1245_v42 }
  0x1e   :  { %109 = vadd.xlane.f32.xlu0 %v95_v26  ;;  %521 = vmatpush1.bf16.msra.mxu1 %v1246_v43 }
  0x1f   :  { %449 = vmatprep.subr.bf16.mxu0 %v1247_v44  ;;  %522 = vmatprep.subr.bf16.mxu1 %v1249_v45 }
  0x20   :  { %111 = vadd.xlane.f32.xlu1 %v96_v27 }
  0x21   :  { %450 = vmatpush1.bf16.msra.mxu0 %v1251_v46 }
  0x22   :  { %523 = vmatpush1.bf16.msra.mxu1 %v1252_v47 }
  0x8f   :  { %v66_v49 = vpop.xlane.xlu0 %65 }
  0x90   :  { %v81_v50 = vmul.f32 0.0078125, %v66_v49 }
  0x91   :  { %v98_v51 = vpop.xlane.xlu1 %97 }
  0x92   :  { %v121_v52 = vmul.f32 %v81_v50, %v81_v50  ;;  %v113_v53 = vmul.f32 0.0078125, %v98_v51  ;;  %v145_v28 = vsub.f32 %v1367_v0, %v81_v50 }
  0x93   :  { %v68_v54 = vpop.xlane.xlu0 %67 }
  0x94   :  { %v129_v55 = vsub.f32 %v113_v53, %v121_v52  ;;  %v82_v56 = vmul.f32 0.0078125, %v68_v54  ;;  %v1557_v52 = vld [vmem:[%s1960_s3] ss:$0 sm:$0xff] }
  0x95   :  { %v100_v57 = vpop.xlane.xlu1 %99 }
  0x96   :  { %v137_v58 = vmax.f32 %v129_v55, 0.0  ;;  %v122_v59 = vmul.f32 %v82_v56, %v82_v56  ;;  %v114_v60 = vmul.f32 0.0078125, %v100_v57  ;;  %v146_v0 = vsub.f32 %v1372_v1, %v82_v56 }
  0x97   :  { %v70_v61 = vpop.xlane.xlu0 %69 }
  0x98   :  { %v153_v62 = vadd.f32 1e-05, %v137_v58  ;;  %v130_v63 = vsub.f32 %v114_v60, %v122_v59  ;;  %v1526_v2 = vmul.f32 0.0078125, %v70_v61 }
  0x99   :  { %v72_v3 = vpop.xlane.xlu1 %71 }
  0x9a   :  { %1253 = vrsqrt.f32 %v153_v62  ;;  %v138_v6 = vmax.f32 %v130_v63, 0.0  ;;  %v123_v7 = vmul.f32 %v1526_v2, %v1526_v2  ;;  %v1530_v10 = vmul.f32 0.0078125, %v72_v3 }
  0x9b   :  { %v102_v11 = vpop.xlane.xlu0 %101  ;;  %v147_v57 = vsub.f32 %v1383_v4, %v1526_v2 }
  0x9c   :  { %v154_v12 = vadd.f32 1e-05, %v138_v6  ;;  %v115_v13 = vmul.f32 0.0078125, %v102_v11  ;;  %v124_v15 = vmul.f32 %v1530_v10, %v1530_v10  ;;  %v148_v6 = vsub.f32 %v1388_v5, %v1530_v10 }
  0x9d   :  { %v104_v14 = vpop.xlane.xlu1 %103 }
  0x9e   :  { %1255 = vrsqrt.f32 %v154_v12  ;;  %v131_v16 = vsub.f32 %v115_v13, %v123_v7  ;;  %v116_v17 = vmul.f32 0.0078125, %v104_v14 }
  0x9f   :  { %v74_v18 = vpop.xlane.xlu0 %73 }
  0xa0   :  { %v139_v19 = vmax.f32 %v131_v16, 0.0  ;;  %v132_v22 = vsub.f32 %v116_v17, %v124_v15  ;;  %v1534_v23 = vmul.f32 0.0078125, %v74_v18 }
  0xa1   :  { %v76_v24 = vpop.xlane.xlu1 %75 }
  0xa2   :  { %v155_v25 = vadd.f32 1e-05, %v139_v19  ;;  %v140_v26 = vmax.f32 %v132_v22, 0.0  ;;  %v125_v27 = vmul.f32 %v1534_v23, %v1534_v23  ;;  %v1539_v29 = vmul.f32 0.0078125, %v76_v24 }
  0xa3   :  { %v106_v30 = vpop.xlane.xlu0 %105  ;;  %v149_v10 = vsub.f32 %v1399_v8, %v1534_v23 }
  0xa4   :  { %v1254_v31 = vpop.eup %1253  ;;  %1257 = vrsqrt.f32 %v155_v25  ;;  %v156_v32 = vadd.f32 1e-05, %v140_v26  ;;  %v117_v33 = vmul.f32 0.0078125, %v106_v30  ;;  %v126_v36 = vmul.f32 %v1539_v29, %v1539_v29 }
  0xa5   :  { %v108_v34 = vpop.xlane.xlu1 %107  ;;  %v169_v35 = vmul.f32 %v1254_v31, %v145_v28  ;;  %v150_v24 = vsub.f32 %v1404_v9, %v1539_v29 }
  0xa6   :  { %1259 = vrsqrt.f32 %v156_v32  ;;  %v133_v37 = vsub.f32 %v117_v33, %v125_v27  ;;  %v118_v38 = vmul.f32 0.0078125, %v108_v34 }
  0xa7   :  { %v78_v40 = vpop.xlane.xlu0 %77  ;;  %v184_v47 = vmul.f32 %v1546_v39, %v169_v35 }
  0xa8   :  { %v1256_v41 = vpop.eup %1255  ;;  %v141_v42 = vmax.f32 %v133_v37, 0.0  ;;  %v134_v43 = vsub.f32 %v118_v38, %v126_v36  ;;  %v1549_v44 = vmul.f32 0.0078125, %v78_v40 }
  0xa9   :  { %v80_v45 = vpop.xlane.xlu1 %79  ;;  %v170_v46 = vmul.f32 %v1256_v41, %v146_v0  ;;  %v199_v59 = vadd.f32 %v1557_v52, %v184_v47 }
  0xaa   :  { %v157_v49 = vadd.f32 1e-05, %v141_v42  ;;  %v142_v50 = vmax.f32 %v134_v43, 0.0  ;;  %v127_v51 = vmul.f32 %v1549_v44, %v1549_v44  ;;  %v88_v1 = vmul.f32 0.0078125, %v80_v45 }
  0xab   :  { %v110_v53 = vpop.xlane.xlu0 %109  ;;  %v185_v54 = vmul.f32 %v1546_v39, %v170_v46  ;;  %v151_v23 = vsub.f32 %v1439_v20, %v1549_v44  ;;  %v680_v44 = vld [vmem:[%s1961_s4] sm:$0xf] }
  0xac   :  { %1261 = vrsqrt.f32 %v157_v49  ;;  %v158_v55 = vadd.f32 1e-05, %v142_v50  ;;  %v119_v56 = vmul.f32 0.0078125, %v110_v53  ;;  %v128_v62 = vmul.f32 %v88_v1, %v88_v1 }
  0xad   :  { %v112_v58 = vpop.xlane.xlu1 %111  ;;  %v200_v60 = vadd.f32 %v1557_v52, %v185_v54  ;;  %v152_v32 = vsub.f32 %v1444_v21, %v88_v1  ;;  %v682_v21 = vlaneseq }
  0xae   :  { %v1258_v61 = vpop.eup %1257  ;;  %1263 = vrsqrt.f32 %v158_v55  ;;  %v135_v63 = vsub.f32 %v119_v56, %v127_v51  ;;  %v120_v3 = vmul.f32 0.0078125, %v112_v58 }
  0xaf   :  { %v207_v7 = vpack.c.bf16 %v200_v60, %v199_v59  ;;  %v171_v11 = vmul.f32 %v1258_v61, %v147_v57  ;;  %v683_v41 = vshrl.u32 %v682_v21, 7 }
  0xb0   :  { %v1260_v12 = vpop.eup %1259  ;;  %v143_v13 = vmax.f32 %v135_v63, 0.0  ;;  %v136_v14 = vsub.f32 %v120_v3, %v128_v62 }
  0xb1   :  { %468 = vmatmul.mubr.bf16.vlgmr.msra.gmra.mrb[0].mxu0 %v207_v7  ;;  %541 = vmatmul.mubr.bf16.vlgmr.msra.gmra.mrb[0].mxu1 %v207_v7  ;;  %v172_v4 = vmul.f32 %v1260_v12, %v148_v6  ;;  %v186_v2 = vmul.f32 %v1546_v39, %v171_v11  ;;  %v684_v42 = vsub.s32 0, %v683_v41  ;;  %v692_v43 = vsub.s32 2, %v683_v41 }
  0xb2   :  { %v159_v15 = vadd.f32 1e-05, %v143_v13  ;;  %v144_v16 = vmax.f32 %v136_v14, 0.0  ;;  %477 = vmatprep.mubr.bf16.mxu0 %v1333_v48  ;;  %550 = vmatprep.mubr.bf16.mxu1 %v1333_v48  ;;  %v688_v45 = vsub.s32 1, %v683_v41  ;;  %v696_v46 = vsub.s32 3, %v683_v41 }
  0xb3   :  { %v187_v17 = vmul.f32 %v1546_v39, %v172_v4  ;;  %v201_v18 = vadd.f32 %v1557_v52, %v186_v2 }
  0xb4   :  { %1265 = vrsqrt.f32 %v159_v15  ;;  %v160_v5 = vadd.f32 1e-05, %v144_v16  ;;  %v1598_v47 = vrot.slane %v680_v44, %v688_v45  ;;  %v1600_v49 = vrot.slane %v680_v44, %v696_v46 }
  0xb5   :  { %v202_v19 = vadd.f32 %v1557_v52, %v187_v17 }
  0xb6   :  { %v1262_v22 = vpop.eup %1261  ;;  %1267 = vrsqrt.f32 %v160_v5 }
  0xb7   :  { %v208_v25 = vpack.c.bf16 %v202_v19, %v201_v18  ;;  %v173_v26 = vmul.f32 %v1262_v22, %v149_v10 }
  0xb8   :  { %v1264_v27 = vpop.eup %1263 }
  0xb9   :  { %478 = vmatmul.mubr.bf16.gmra.mrb[4].mxu0 %v208_v25  ;;  %551 = vmatmul.mubr.bf16.gmra.mrb[4].mxu1 %v208_v25  ;;  %v174_v28 = vmul.f32 %v1264_v27, %v150_v24  ;;  %v188_v30 = vmul.f32 %v1546_v39, %v173_v26 }
  0xba   :  { %487 = vmatprep.mubr.bf16.mxu0 %v1333_v48  ;;  %560 = vmatprep.mubr.bf16.mxu1 %v1333_v48 }
  0xbb   :  { %v189_v8 = vmul.f32 %v1546_v39, %v174_v28  ;;  %v203_v31 = vadd.f32 %v1557_v52, %v188_v30 }
  0xbd   :  { %v204_v9 = vadd.f32 %v1557_v52, %v189_v8 }
  0xbe   :  { %v1266_v29 = vpop.eup %1265 }
  0xbf   :  { %v209_v33 = vpack.c.bf16 %v204_v9, %v203_v31  ;;  %v175_v34 = vmul.f32 %v1266_v29, %v151_v23 }
  0xc0   :  { %v1268_v35 = vpop.eup %1267 }
  0xc1   :  { %488 = vmatmul.mubr.bf16.gmra.mrb[8].mxu0 %v209_v33  ;;  %561 = vmatmul.mubr.bf16.gmra.mrb[8].mxu1 %v209_v33  ;;  %v176_v36 = vmul.f32 %v1268_v35, %v152_v32  ;;  %v190_v37 = vmul.f32 %v1546_v39, %v175_v34 }
  0xc2   :  { %497 = vmatprep.mubr.bf16.mxu0 %v1333_v48  ;;  %570 = vmatprep.mubr.bf16.mxu1 %v1333_v48  ;;  %v1594_v48 = vrot.slane %v680_v44, %v684_v42 }
  0xc3   :  { %v191_v20 = vmul.f32 %v1546_v39, %v176_v36  ;;  %v205_v38 = vadd.f32 %v1557_v52, %v190_v37  ;;  %v1596_v39 = vrot.slane %v680_v44, %v692_v43 }
  0xc5   :  { %v206_v0 = vadd.f32 %v1557_v52, %v191_v20 }
  0xc7   :  { %v210_v40 = vpack.c.bf16 %v206_v0, %v205_v38 }
  0xc9   :  { %498 = vmatmul.mubr.bf16.gmra.mrb[12].mxu0 %v210_v40  ;;  %571 = vmatmul.mubr.bf16.gmra.mrb[12].mxu1 %v210_v40 }
 0x184   :  { %v469_v50 = vpop.f32.mrb[0].mxu0  ;;  %v542_v51 = vpop.f32.mrb[0].mxu1 }
 0x185   :  { %v702_v52 = vadd.f32 %v1594_v48, %v469_v50  ;;  %v704_v1 = vadd.f32 %v1596_v39, %v542_v51  ;;  %v471_v53 = vpop.f32.mrb[1].mxu0  ;;  %v544_v54 = vpop.f32.mrb[1].mxu1 }
 0x186   :  { %v1605_v55 = vadd.f32 %v1598_v47, %v471_v53  ;;  %v1608_v56 = vadd.f32 %v1600_v49, %v544_v54  ;;  %v473_v57 = vpop.f32.mrb[2].mxu0  ;;  %v546_v58 = vpop.f32.mrb[2].mxu1 }
 0x187   :  { %v766_v59 = vmul.f32 0.044715, %v702_v52  ;;  %v768_v60 = vmul.f32 0.044715, %v704_v1  ;;  %v1613_v6 = vadd.f32 %v1594_v48, %v473_v57  ;;  %v1616_v7 = vadd.f32 %v1596_v39, %v546_v58  ;;  %v475_v11 = vpop.f32.mrb[3].mxu0  ;;  %v548_v12 = vpop.f32.mrb[3].mxu1 }
 0x188   :  { %v767_v61 = vmul.f32 0.044715, %v1605_v55  ;;  %v769_v62 = vmul.f32 0.044715, %v1608_v56  ;;  %v1621_v4 = vadd.f32 %v1598_v47, %v475_v11  ;;  %v1629_v26 = vadd.f32 %v1600_v49, %v548_v12 }
 0x189   :  { %v798_v63 = vmul.f32 %v766_v59, %v702_v52  ;;  %v800_v3 = vmul.f32 %v768_v60, %v704_v1  ;;  %v770_v16 = vmul.f32 0.044715, %v1613_v6  ;;  %v772_v10 = vmul.f32 0.044715, %v1616_v7 }
 0x18a   :  { %v799_v13 = vmul.f32 %v767_v61, %v1605_v55  ;;  %v801_v14 = vmul.f32 %v769_v62, %v1608_v56  ;;  %v771_v31 = vmul.f32 0.044715, %v1621_v4  ;;  %v1637_v32 = vmul.f32 0.5, %v702_v52 }
 0x18b   :  { %v830_v2 = vmul.f32 %v798_v63, %v702_v52  ;;  %v832_v15 = vmul.f32 %v800_v3, %v704_v1  ;;  %v802_v25 = vmul.f32 %v770_v16, %v1613_v6  ;;  %v804_v23 = vmul.f32 %v772_v10, %v1616_v7 }
 0x18c   :  { %v831_v17 = vmul.f32 %v799_v13, %v1605_v55  ;;  %v833_v5 = vmul.f32 %v801_v14, %v1608_v56  ;;  %v479_v18 = vpop.f32.mrb[4].mxu0  ;;  %v552_v19 = vpop.f32.mrb[4].mxu1  ;;  %v803_v0 = vmul.f32 %v771_v31, %v1621_v4  ;;  %v773_v41 = vmul.f32 0.044715, %v1629_v26 }
 0x18d   :  { %v862_v22 = vadd.f32 %v830_v2, %v702_v52  ;;  %v864_v24 = vadd.f32 %v832_v15, %v704_v1  ;;  %v481_v27 = vpop.f32.mrb[5].mxu0  ;;  %v554_v28 = vpop.f32.mrb[5].mxu1  ;;  %v834_v35 = vmul.f32 %v802_v25, %v1613_v6  ;;  %v836_v38 = vmul.f32 %v804_v23, %v1616_v7 }
 0x18e   :  { %v863_v30 = vadd.f32 %v831_v17, %v1605_v55  ;;  %v865_v8 = vadd.f32 %v833_v5, %v1608_v56  ;;  %v483_v9 = vpop.f32.mrb[6].mxu0  ;;  %v1635_v29 = vpop.f32.mrb[6].mxu1  ;;  %v1649_v42 = vadd.f32 %v1594_v48, %v479_v18  ;;  %v835_v44 = vmul.f32 %v803_v0, %v1621_v4 }
 0x18f   :  { %v894_v33 = vmul.f32 0.7978846, %v862_v22  ;;  %v896_v34 = vmul.f32 0.7978846, %v864_v24  ;;  %v1640_v36 = vpop.f32.mrb[7].mxu0  ;;  %v1644_v40 = vpop.f32.mrb[7].mxu1  ;;  %v866_v21 = vadd.f32 %v834_v35, %v1613_v6  ;;  %v868_v43 = vadd.f32 %v836_v38, %v1616_v7 }
 0x190   :  { %v895_v37 = vmul.f32 0.7978846, %v863_v30  ;;  %v897_v20 = vmul.f32 0.7978846, %v865_v8  ;;  %v1654_v45 = vadd.f32 %v1596_v39, %v552_v19  ;;  %v1656_v46 = vmul.f32 0.5, %v704_v1 }
 0x191   :  { %1269 = vtanh.f32 %v894_v33  ;;  %v898_v50 = vmul.f32 0.7978846, %v866_v21  ;;  %v805_v51 = vmul.f32 %v773_v41, %v1629_v26  ;;  %v900_v52 = vmul.f32 0.7978846, %v868_v43 }
 0x192   :  { %1271 = vtanh.f32 %v896_v34  ;;  %v867_v53 = vadd.f32 %v835_v44, %v1621_v4  ;;  %v774_v54 = vmul.f32 0.044715, %v1649_v42  ;;  %v1666_v59 = vmul.f32 0.5, %v1605_v55 }
 0x193   :  { %1273 = vtanh.f32 %v895_v37  ;;  %v837_v1 = vmul.f32 %v805_v51, %v1629_v26  ;;  %v776_v60 = vmul.f32 0.044715, %v1654_v45  ;;  %v1676_v11 = vadd.f32 %v1598_v47, %v481_v27 }
 0x194   :  { %1275 = vtanh.f32 %v897_v20  ;;  %v1661_v57 = vpop.f32.mrb[8].mxu0  ;;  %v1663_v58 = vpop.f32.mrb[8].mxu1  ;;  %v899_v63 = vmul.f32 0.7978846, %v867_v53  ;;  %v806_v3 = vmul.f32 %v774_v54, %v1649_v42  ;;  %v1685_v2 = vadd.f32 %v1600_v49, %v554_v28 }
 0x195   :  { %1277 = vtanh.f32 %v898_v50  ;;  %v1670_v61 = vpop.f32.mrb[9].mxu0  ;;  %v1672_v62 = vpop.f32.mrb[9].mxu1  ;;  %v869_v13 = vadd.f32 %v837_v1, %v1629_v26  ;;  %v808_v14 = vmul.f32 %v776_v60, %v1654_v45  ;;  %v1688_v15 = vadd.f32 %v1594_v48, %v483_v9 }
 0x196   :  { %1279 = vtanh.f32 %v900_v52  ;;  %v1678_v12 = vpop.f32.mrb[10].mxu0  ;;  %v1680_v55 = vpop.f32.mrb[10].mxu1  ;;  %v737_v5 = vmul.f32 0.5, %v1608_v56  ;;  %v838_v10 = vmul.f32 %v806_v3, %v1649_v42  ;;  %v775_v18 = vmul.f32 0.044715, %v1676_v11 }
 0x197   :  { %v1690_v16 = vpop.f32.mrb[11].mxu0  ;;  %v1692_v17 = vpop.f32.mrb[11].mxu1  ;;  %1281 = vtanh.f32 %v899_v63  ;;  %v738_v19 = vmul.f32 0.5, %v1613_v6  ;;  %v901_v22 = vmul.f32 0.7978846, %v869_v13  ;;  %v840_v24 = vmul.f32 %v808_v14, %v1654_v45 }
 0x198   :  { %v777_v25 = vmul.f32 0.044715, %v1685_v2  ;;  %v1701_v27 = vmul.f32 0.5, %v1616_v7  ;;  %v870_v28 = vadd.f32 %v838_v10, %v1649_v42  ;;  %v807_v30 = vmul.f32 %v775_v18, %v1676_v11 }
 0x199   :  { %v778_v56 = vmul.f32 0.044715, %v1688_v15  ;;  %v739_v23 = vmul.f32 0.5, %v1621_v4  ;;  %1283 = vtanh.f32 %v901_v22  ;;  %v872_v6 = vadd.f32 %v840_v24, %v1654_v45 }
 0x19a   :  { %v809_v31 = vmul.f32 %v777_v25, %v1685_v2  ;;  %v902_v34 = vmul.f32 0.7978846, %v870_v28  ;;  %v839_v7 = vmul.f32 %v807_v30, %v1676_v11  ;;  %v1718_v41 = vadd.f32 %v1596_v39, %v1635_v29 }
 0x19b   :  { %v1270_v8 = vpop.eup %1269  ;;  %v810_v35 = vmul.f32 %v778_v56, %v1688_v15  ;;  %v904_v21 = vmul.f32 0.7978846, %v872_v6  ;;  %v741_v28 = vmul.f32 0.5, %v1629_v26 }
 0x19c   :  { %v1272_v9 = vpop.eup %1271  ;;  %v958_v33 = vadd.f32 1.0, %v1270_v8  ;;  %v1711_v37 = vpop.f32.mrb[12].mxu0  ;;  %v841_v4 = vmul.f32 %v809_v31, %v1685_v2  ;;  %1285 = vtanh.f32 %v902_v34  ;;  %v871_v53 = vadd.f32 %v839_v7, %v1676_v11 }
 0x19d   :  { %v1713_v20 = vpop.f32.mrb[12].mxu1  ;;  %v1274_v38 = vpop.eup %1273  ;;  %v960_v0 = vadd.f32 1.0, %v1272_v9  ;;  %1287 = vtanh.f32 %v904_v21  ;;  %v842_v24 = vmul.f32 %v810_v35, %v1688_v15  ;;  %v1751_v7 = vadd.f32 %v1600_v49, %v1644_v40 }
 0x19e   :  { %v1720_v43 = vpop.f32.mrb[13].mxu0  ;;  %v1722_v44 = vpop.f32.mrb[13].mxu1  ;;  %v990_v51 = vmul.f32 %v958_v33, %v1637_v32  ;;  %v959_v52 = vadd.f32 1.0, %v1274_v38  ;;  %v873_v3 = vadd.f32 %v841_v4, %v1685_v2  ;;  %v903_v22 = vmul.f32 0.7978846, %v871_v53 }
 0x19f   :  { %v1276_v50 = vpop.eup %1275  ;;  %v1726_v54 = vpop.f32.mrb[14].mxu0  ;;  %v992_v63 = vmul.f32 %v960_v0, %v1656_v46  ;;  %v780_v46 = vmul.f32 0.044715, %v1718_v41  ;;  %v874_v31 = vadd.f32 %v842_v24, %v1688_v15  ;;  %v742_v38 = vmul.f32 0.5, %v1649_v42 }
 0x1a0   :  { %v1728_v1 = vpop.f32.mrb[14].mxu1  ;;  %v1278_v60 = vpop.eup %1277  ;;  %v961_v29 = vadd.f32 1.0, %v1276_v50  ;;  %v991_v10 = vmul.f32 %v959_v52, %v1666_v59  ;;  %v905_v30 = vmul.f32 0.7978846, %v873_v3  ;;  %1289 = vtanh.f32 %v903_v22 }
 0x1a1   :  { %v1732_v13 = vpop.f32.mrb[15].mxu0  ;;  %v1734_v14 = vpop.f32.mrb[15].mxu1  ;;  %v962_v18 = vadd.f32 1.0, %v1278_v60  ;;  %v906_v59 = vmul.f32 0.7978846, %v874_v31  ;;  %v812_v26 = vmul.f32 %v780_v46, %v1718_v41  ;;  %v744_v0 = vmul.f32 0.5, %v1654_v45 }
 0x1a2   :  { %v1280_v32 = vpop.eup %1279  ;;  %v993_v25 = vmul.f32 %v961_v29, %v737_v5  ;;  %v1188_v8 = vpack.c.bf16 %v991_v10, %v990_v51  ;;  %1291 = vtanh.f32 %v905_v30  ;;  %v1747_v5 = vadd.f32 %v1598_v47, %v1640_v36 }
 0x1a3   :  { %v1282_v56 = vpop.eup %1281  ;;  %v964_v6 = vadd.f32 1.0, %v1280_v32  ;;  %v994_v33 = vmul.f32 %v962_v18, %v738_v19  ;;  %v1760_v21 = vadd.f32 %v1594_v48, %v1661_v57  ;;  %v743_v40 = vmul.f32 0.5, %v1676_v11 }
 0x1a4   :  { %v1189_v9 = vpack.c.bf16 %v993_v25, %v992_v63  ;;  %v963_v34 = vadd.f32 1.0, %v1282_v56  ;;  %1118 = vst [vmem:[%s1962_s5] sm:$0xff] %v1188_v8  ;;  %v1284_v35 = vpop.eup %1283  ;;  %v844_v50 = vmul.f32 %v812_v26, %v1718_v41  ;;  %v779_v52 = vmul.f32 0.044715, %v1747_v5 }
 0x1a5   :  { %v996_v36 = vmul.f32 %v964_v6, %v1701_v27  ;;  %v965_v4 = vadd.f32 1.0, %v1284_v35  ;;  %v1769_v42 = vadd.f32 %v1596_v39, %v1663_v58  ;;  %1293 = vtanh.f32 %v906_v59 }
 0x1a6   :  { %1119 = vst [vmem:[%s1962_s5 + $0x8] sm:$0xff] %v1189_v9  ;;  %v995_v19 = vmul.f32 %v963_v34, %v739_v23  ;;  %v781_v23 = vmul.f32 0.044715, %v1751_v7  ;;  %v1286_v45 = vpop.eup %1285  ;;  %v876_v57 = vadd.f32 %v844_v50, %v1718_v41  ;;  %v782_v27 = vmul.f32 0.044715, %v1760_v21 }
 0x1a7   :  { %v997_v53 = vmul.f32 %v965_v4, %v741_v28  ;;  %v1288_v60 = vpop.eup %1287  ;;  %v966_v11 = vadd.f32 1.0, %v1286_v45  ;;  %v811_v63 = vmul.f32 %v779_v52, %v1747_v5  ;;  %v1780_v58 = vadd.f32 %v1598_v47, %v1670_v61 }
 0x1a8   :  { %v1190_v51 = vpack.c.bf16 %v995_v19, %v994_v33  ;;  %v813_v29 = vmul.f32 %v781_v23, %v1751_v7  ;;  %v968_v32 = vadd.f32 1.0, %v1288_v60  ;;  %v908_v10 = vmul.f32 0.7978846, %v876_v57 }
 0x1a9   :  { %v1191_v3 = vpack.c.bf16 %v997_v53, %v996_v36  ;;  %v814_v18 = vmul.f32 %v782_v27, %v1760_v21  ;;  %v745_v22 = vmul.f32 0.5, %v1685_v2  ;;  %v843_v24 = vmul.f32 %v811_v63, %v1747_v5 }
 0x1aa   :  { %1120 = vst [vmem:[%s1962_s5 + $0x10] sm:$0xff] %v1190_v51  ;;  %v845_v25 = vmul.f32 %v813_v29, %v1751_v7  ;;  %v784_v28 = vmul.f32 0.044715, %v1769_v42  ;;  %v1290_v30 = vpop.eup %1289  ;;  %v998_v61 = vmul.f32 %v966_v11, %v742_v38  ;;  %v1000_v46 = vmul.f32 %v968_v32, %v744_v0 }
 0x1ab   :  { %1121 = vst [vmem:[%s1962_s5 + $0x18] sm:$0xff] %v1191_v3  ;;  %1295 = vtanh.f32 %v908_v10  ;;  %v846_v56 = vmul.f32 %v814_v18, %v1760_v21  ;;  %v967_v6 = vadd.f32 1.0, %v1290_v30  ;;  %v875_v2 = vadd.f32 %v843_v24, %v1747_v5 }
 0x1ac   :  { %v1292_v8 = vpop.eup %1291  ;;  %v877_v31 = vadd.f32 %v845_v25, %v1751_v7  ;;  %v816_v9 = vmul.f32 %v784_v28, %v1769_v42  ;;  %v783_v59 = vmul.f32 0.044715, %v1780_v58  ;;  %v1798_v26 = vadd.f32 %v1600_v49, %v1672_v62 }
 0x1ad   :  { %v969_v33 = vadd.f32 1.0, %v1292_v8  ;;  %v878_v34 = vadd.f32 %v846_v56, %v1760_v21  ;;  %v999_v35 = vmul.f32 %v967_v6, %v743_v40  ;;  %v907_v19 = vmul.f32 0.7978846, %v875_v2 }
 0x1ae   :  { %v909_v38 = vmul.f32 0.7978846, %v877_v31  ;;  %v848_v0 = vmul.f32 %v816_v9, %v1769_v42  ;;  %v746_v4 = vmul.f32 0.5, %v1688_v15  ;;  %v815_v51 = vmul.f32 %v783_v59, %v1780_v58 }
 0x1af   :  { %v1001_v36 = vmul.f32 %v969_v33, %v745_v22  ;;  %v910_v50 = vmul.f32 0.7978846, %v878_v34  ;;  %v1192_v52 = vpack.c.bf16 %v999_v35, %v998_v61  ;;  %v748_v23 = vmul.f32 0.5, %v1718_v41  ;;  %v1294_v53 = vpop.eup %1293 }
 0x1b0   :  { %1297 = vtanh.f32 %v907_v19  ;;  %v880_v45 = vadd.f32 %v848_v0, %v1769_v42  ;;  %v847_v40 = vmul.f32 %v815_v51, %v1780_v58  ;;  %v785_v57 = vmul.f32 0.044715, %v1798_v26 }
 0x1b1   :  { %v1193_v62 = vpack.c.bf16 %v1001_v36, %v1000_v46  ;;  %1299 = vtanh.f32 %v909_v38  ;;  %1122 = vst [vmem:[%s1962_s5 + $0x20] sm:$0xff] %v1192_v52  ;;  %v747_v15 = vmul.f32 0.5, %v1747_v5  ;;  %v1813_v41 = vadd.f32 %v1594_v48, %v1678_v12 }
 0x1b2   :  { %1301 = vtanh.f32 %v910_v50  ;;  %v912_v27 = vmul.f32 0.7978846, %v880_v45  ;;  %v879_v60 = vadd.f32 %v847_v40, %v1780_v58  ;;  %v817_v11 = vmul.f32 %v785_v57, %v1798_v26 }
 0x1b3   :  { %1123 = vst [vmem:[%s1962_s5 + $0x28] sm:$0xff] %v1193_v62  ;;  %v1822_v63 = vadd.f32 %v1596_v39, %v1680_v55  ;;  %v1826_v5 = vadd.f32 %v1598_v47, %v1690_v16  ;;  %v970_v29 = vadd.f32 1.0, %v1294_v53  ;;  %v786_v12 = vmul.f32 0.044715, %v1813_v41 }
 0x1b4   :  { %1303 = vtanh.f32 %v912_v27  ;;  %v1831_v3 = vadd.f32 %v1600_v49, %v1692_v17  ;;  %v749_v10 = vmul.f32 0.5, %v1751_v7  ;;  %v911_v18 = vmul.f32 0.7978846, %v879_v60 }
 0x1b5   :  { %v1296_v32 = vpop.eup %1295  ;;  %v849_v22 = vmul.f32 %v817_v11, %v1798_v26  ;;  %v788_v55 = vmul.f32 0.044715, %v1822_v63  ;;  %v750_v16 = vmul.f32 0.5, %v1760_v21  ;;  %v818_v25 = vmul.f32 %v786_v12, %v1813_v41 }
 0x1b6   :  { %v972_v24 = vadd.f32 1.0, %v1296_v32  ;;  %v787_v28 = vmul.f32 0.044715, %v1826_v5  ;;  %v1840_v30 = vmul.f32 0.5, %v1769_v42  ;;  %1305 = vtanh.f32 %v911_v18 }
 0x1b7   :  { %v881_v17 = vadd.f32 %v849_v22, %v1798_v26  ;;  %v820_v7 = vmul.f32 %v788_v55, %v1822_v63  ;;  %v1002_v61 = vmul.f32 %v970_v29, %v746_v4  ;;  %v850_v46 = vmul.f32 %v818_v25, %v1813_v41 }
 0x1b8   :  { %v819_v56 = vmul.f32 %v787_v28, %v1826_v5  ;;  %v789_v8 = vmul.f32 0.044715, %v1831_v3  ;;  %v1004_v21 = vmul.f32 %v972_v24, %v748_v23  ;;  %v1850_v42 = vadd.f32 %v1594_v48, %v1711_v37 }
 0x1b9   :  { %v913_v6 = vmul.f32 0.7978846, %v881_v17  ;;  %v852_v2 = vmul.f32 %v820_v7, %v1822_v63  ;;  %v882_v9 = vadd.f32 %v850_v46, %v1813_v41  ;;  %v1857_v59 = vadd.f32 %v1596_v39, %v1713_v20 }
 0x1ba   :  { %v1298_v31 = vpop.eup %1297  ;;  %v851_v33 = vmul.f32 %v819_v56, %v1826_v5  ;;  %v821_v34 = vmul.f32 %v789_v8, %v1831_v3  ;;  %v1862_v37 = vadd.f32 %v1598_v47, %v1720_v43  ;;  %v790_v45 = vmul.f32 0.044715, %v1850_v42 }
 0x1bb   :  { %v1300_v35 = vpop.eup %1299  ;;  %v971_v19 = vadd.f32 1.0, %v1298_v31  ;;  %1307 = vtanh.f32 %v913_v6  ;;  %v884_v38 = vadd.f32 %v852_v2, %v1822_v63  ;;  %v914_v4 = vmul.f32 0.7978846, %v882_v9 }
 0x1bc   :  { %v1302_v0 = vpop.eup %1301  ;;  %v973_v36 = vadd.f32 1.0, %v1300_v35  ;;  %v883_v50 = vadd.f32 %v851_v33, %v1826_v5  ;;  %v853_v51 = vmul.f32 %v821_v34, %v1831_v3  ;;  %v751_v27 = vmul.f32 0.5, %v1780_v58 }
 0x1bd   :  { %v1003_v52 = vmul.f32 %v971_v19, %v747_v15  ;;  %v974_v23 = vadd.f32 1.0, %v1302_v0  ;;  %v916_v20 = vmul.f32 0.7978846, %v884_v38  ;;  %1309 = vtanh.f32 %v914_v4 }
 0x1be   :  { %v1304_v53 = vpop.eup %1303  ;;  %v1005_v62 = vmul.f32 %v973_v36, %v749_v10  ;;  %v915_v40 = vmul.f32 0.7978846, %v883_v50  ;;  %v885_v57 = vadd.f32 %v853_v51, %v1831_v3  ;;  %v753_v60 = vmul.f32 0.5, %v1798_v26 }
 0x1bf   :  { %v1194_v43 = vpack.c.bf16 %v1003_v52, %v1002_v61  ;;  %1311 = vtanh.f32 %v916_v20  ;;  %v822_v15 = vmul.f32 %v790_v45, %v1850_v42  ;;  %v1006_v32 = vmul.f32 %v974_v23, %v750_v16 }
 0x1c0   :  { %v1195_v11 = vpack.c.bf16 %v1005_v62, %v1004_v21  ;;  %1313 = vtanh.f32 %v915_v40  ;;  %v917_v29 = vmul.f32 0.7978846, %v885_v57  ;;  %v1306_v12 = vpop.eup %1305  ;;  %v976_v10 = vadd.f32 1.0, %v1304_v53 }
 0x1c1   :  { %1124 = vst [vmem:[%s1962_s5 + $0x30] sm:$0xff] %v1194_v43  ;;  %v754_v18 = vmul.f32 0.5, %v1813_v41  ;;  %v792_v22 = vmul.f32 0.044715, %v1857_v59  ;;  %v975_v58 = vadd.f32 1.0, %v1306_v12  ;;  %v854_v26 = vmul.f32 %v822_v15, %v1850_v42 }
 0x1c2   :  { %1125 = vst [vmem:[%s1962_s5 + $0x38] sm:$0xff] %v1195_v11  ;;  %1315 = vtanh.f32 %v917_v29  ;;  %v791_v55 = vmul.f32 0.044715, %v1862_v37  ;;  %v1884_v16 = vadd.f32 %v1600_v49, %v1722_v44  ;;  %v1888_v41 = vadd.f32 %v1594_v48, %v1726_v54 }
 0x1c3   :  { %v824_v24 = vmul.f32 %v792_v22, %v1857_v59  ;;  %v1892_v25 = vadd.f32 %v1596_v39, %v1728_v1  ;;  %v1007_v28 = vmul.f32 %v975_v58, %v751_v27  ;;  %v886_v17 = vadd.f32 %v854_v26, %v1850_v42 }
 0x1c4   :  { %v823_v7 = vmul.f32 %v791_v55, %v1862_v37  ;;  %v1898_v61 = vadd.f32 %v1598_v47, %v1732_v13  ;;  %v1008_v44 = vmul.f32 %v976_v10, %v1840_v30  ;;  %v756_v56 = vmul.f32 0.5, %v1822_v63 }
 0x1c5   :  { %v1308_v46 = vpop.eup %1307  ;;  %v856_v48 = vmul.f32 %v824_v24, %v1857_v59  ;;  %v793_v54 = vmul.f32 0.044715, %v1884_v16  ;;  %v1196_v39 = vpack.c.bf16 %v1007_v28, %v1006_v32  ;;  %v918_v8 = vmul.f32 0.7978846, %v886_v17 }
 0x1c6   :  { %v977_v1 = vadd.f32 1.0, %v1308_v46  ;;  %v855_v21 = vmul.f32 %v823_v7, %v1862_v37  ;;  %v755_v6 = vmul.f32 0.5, %v1826_v5  ;;  %v794_v13 = vmul.f32 0.044715, %v1888_v41 }
 0x1c7   :  { %v888_v2 = vadd.f32 %v856_v48, %v1857_v59  ;;  %v825_v47 = vmul.f32 %v793_v54, %v1884_v16  ;;  %v1310_v30 = vpop.eup %1309  ;;  %1126 = vst [vmem:[%s1962_s5 + $0x40] sm:$0xff] %v1196_v39  ;;  %1317 = vtanh.f32 %v918_v8  ;;  %v796_v9 = vmul.f32 0.044715, %v1892_v25 }
 0x1c8   :  { %v1009_v63 = vmul.f32 %v977_v1, %v753_v60  ;;  %v887_v31 = vadd.f32 %v855_v21, %v1862_v37  ;;  %v978_v34 = vadd.f32 1.0, %v1310_v30  ;;  %v826_v19 = vmul.f32 %v794_v13, %v1888_v41 }
 0x1c9   :  { %v1312_v33 = vpop.eup %1311  ;;  %v920_v5 = vmul.f32 0.7978846, %v888_v2  ;;  %v857_v35 = vmul.f32 %v825_v47, %v1884_v16  ;;  %v828_v50 = vmul.f32 %v796_v9, %v1892_v25  ;;  %v757_v45 = vmul.f32 0.5, %v1831_v3 }
 0x1ca   :  { %v1314_v38 = vpop.eup %1313  ;;  %v1197_v0 = vpack.c.bf16 %v1009_v63, %v1008_v44  ;;  %v980_v36 = vadd.f32 1.0, %v1312_v33  ;;  %v919_v4 = vmul.f32 0.7978846, %v887_v31  ;;  %v1010_v51 = vmul.f32 %v978_v34, %v754_v18 }
 0x1cb   :  { %v979_v52 = vadd.f32 1.0, %v1314_v38  ;;  %1319 = vtanh.f32 %v920_v5  ;;  %v889_v23 = vadd.f32 %v857_v35, %v1884_v16  ;;  %v858_v53 = vmul.f32 %v826_v19, %v1888_v41 }
 0x1cc   :  { %v1316_v20 = vpop.eup %1315  ;;  %1127 = vst [vmem:[%s1962_s5 + $0x48] sm:$0xff] %v1197_v0  ;;  %1321 = vtanh.f32 %v919_v4  ;;  %v860_v62 = vmul.f32 %v828_v50, %v1892_v25  ;;  %v1012_v40 = vmul.f32 %v980_v36, %v756_v56  ;;  %v795_v29 = vmul.f32 0.044715, %v1898_v61 }
 0x1cd   :  { %v1011_v57 = vmul.f32 %v979_v52, %v755_v6  ;;  %v981_v43 = vadd.f32 1.0, %v1316_v20  ;;  %v921_v27 = vmul.f32 0.7978846, %v889_v23  ;;  %v890_v60 = vadd.f32 %v858_v53, %v1888_v41 }
 0x1ce   :  { %v892_v11 = vadd.f32 %v860_v62, %v1892_v25  ;;  %v733_v15 = vadd.f32 %v1600_v49, %v1734_v14  ;;  %v827_v10 = vmul.f32 %v795_v29, %v1898_v61  ;;  %v758_v17 = vmul.f32 0.5, %v1850_v42 }
 0x1cf   :  { %v1198_v12 = vpack.c.bf16 %v1011_v57, %v1010_v51  ;;  %v1013_v3 = vmul.f32 %v981_v43, %v757_v45  ;;  %1323 = vtanh.f32 %v921_v27  ;;  %v922_v32 = vmul.f32 0.7978846, %v890_v60 }
 0x1d0   :  { %v924_v22 = vmul.f32 0.7978846, %v892_v11  ;;  %v797_v58 = vmul.f32 0.044715, %v733_v15  ;;  %v859_v55 = vmul.f32 %v827_v10, %v1898_v61  ;;  %v759_v54 = vmul.f32 0.5, %v1862_v37 }
 0x1d1   :  { %1128 = vst [vmem:[%s1962_s5 + $0x50] sm:$0xff] %v1198_v12  ;;  %v1199_v18 = vpack.c.bf16 %v1013_v3, %v1012_v40  ;;  %v1318_v26 = vpop.eup %1317  ;;  %1325 = vtanh.f32 %v922_v32  ;;  %v760_v8 = vmul.f32 0.5, %v1857_v59  ;;  %v761_v13 = vmul.f32 0.5, %v1884_v16 }
 0x1d2   :  { %v982_v49 = vadd.f32 1.0, %v1318_v26  ;;  %v829_v14 = vmul.f32 %v797_v58, %v733_v15  ;;  %v891_v24 = vadd.f32 %v859_v55, %v1898_v61  ;;  %1327 = vtanh.f32 %v924_v22 }
 0x1d3   :  { %1129 = vst [vmem:[%s1962_s5 + $0x58] sm:$0xff] %v1199_v18  ;;  %v762_v59 = vmul.f32 0.5, %v1888_v41  ;;  %v763_v35 = vmul.f32 0.5, %v1898_v61  ;;  %v764_v38 = vmul.f32 0.5, %v1892_v25  ;;  %v765_v50 = vmul.f32 0.5, %v733_v15 }
 0x1d4   :  { %v861_v7 = vmul.f32 %v829_v14, %v733_v15  ;;  %v923_v56 = vmul.f32 0.7978846, %v891_v24  ;;  %v1014_v48 = vmul.f32 %v982_v49, %v758_v17 }
 0x1d5   :  { %v1320_v28 = vpop.eup %1319 }
 0x1d6   :  { %v1322_v46 = vpop.eup %1321  ;;  %v984_v44 = vadd.f32 1.0, %v1320_v28  ;;  %v893_v1 = vadd.f32 %v861_v7, %v733_v15  ;;  %1329 = vtanh.f32 %v923_v56 }
 0x1d7   :  { %v983_v39 = vadd.f32 1.0, %v1322_v46 }
 0x1d8   :  { %v925_v2 = vmul.f32 0.7978846, %v893_v1  ;;  %v1016_v47 = vmul.f32 %v984_v44, %v760_v8 }
 0x1d9   :  { %v1324_v21 = vpop.eup %1323  ;;  %v1015_v6 = vmul.f32 %v983_v39, %v759_v54 }
 0x1da   :  { %v985_v42 = vadd.f32 1.0, %v1324_v21  ;;  %1331 = vtanh.f32 %v925_v2 }
 0x1db   :  { %v1200_v30 = vpack.c.bf16 %v1015_v6, %v1014_v48  ;;  %v1326_v63 = vpop.eup %1325 }
 0x1dc   :  { %v1017_v31 = vmul.f32 %v985_v42, %v761_v13  ;;  %v1328_v9 = vpop.eup %1327  ;;  %v986_v33 = vadd.f32 1.0, %v1326_v63 }
 0x1dd   :  { %1130 = vst [vmem:[%s1962_s5 + $0x60] sm:$0xff] %v1200_v30  ;;  %v988_v16 = vadd.f32 1.0, %v1328_v9 }
 0x1de   :  { %v1201_v37 = vpack.c.bf16 %v1017_v31, %v1016_v47  ;;  %v1018_v5 = vmul.f32 %v986_v33, %v762_v59 }
 0x1df   :  { %v1020_v4 = vmul.f32 %v988_v16, %v764_v38 }
 0x1e0   :  { %1131 = vst [vmem:[%s1962_s5 + $0x68] sm:$0xff] %v1201_v37  ;;  %v1330_v34 = vpop.eup %1329 }
 0x1e1   :  { %v987_v19 = vadd.f32 1.0, %v1330_v34 }
 0x1e3   :  { %v1019_v36 = vmul.f32 %v987_v19, %v763_v35 }
 0x1e4   :  { %v1332_v0 = vpop.eup %1331 }
 0x1e5   :  { %v989_v51 = vadd.f32 1.0, %v1332_v0  ;;  %v1202_v52 = vpack.c.bf16 %v1019_v36, %v1018_v5 }
 0x1e7   :  { %v1021_v23 = vmul.f32 %v989_v51, %v765_v50  ;;  %1132 = vst [vmem:[%s1962_s5 + $0x70] sm:$0xff] %v1202_v52 }
 0x1e9   :  { %v1203_v41 = vpack.c.bf16 %v1021_v23, %v1020_v4 }
 0x1eb   :  { %1133 = vst [vmem:[%s1962_s5 + $0x78] sm:$0xff] %v1203_v41 }

// kernel: audio_encoder_forward.25
= control target key start
LH: loop header
LB: loop body
LE: loop exit
PB: predicated region body
PF: predicated region fallthrough
CT: control target
= control target key end

     0   :  { %s316_s0 = inlined_call_operand.vmem [shape: f32[64,128], index: 0, kind: input, shape index: {}]   ;;  %s317_s1 = inlined_call_operand.vmem [shape: f32[1,128], index: 1, kind: input, shape index: {}]   ;;  %s318_s2 = inlined_call_operand.vmem [shape: f32[1,128], index: 2, kind: input, shape index: {}]   ;;  %s319_s3 = inlined_call_operand.hbm [shape: f32[64,128], index: 3, kind: output, shape index: {}]  }
   0x1   :  { %v15_v0 = vld [vmem:[%s316_s0] sm:$0xff]  ;;  %v17_v1 = vld [vmem:[%s316_s0 + $0x10] sm:$0xff]  ;;  %v16_v2 = vld [vmem:[%s316_s0 + $0x8] sm:$0xff] }
   0x2   :  { %23 = vadd.xlane.f32.xlu0 %v15_v0  ;;  %27 = vadd.xlane.f32.xlu1 %v17_v1  ;;  %v18_v3 = vld [vmem:[%s316_s0 + $0x18] sm:$0xff] }
   0x3   :  { %8 = vsyncpa [#allocation3], 0  ;;  %v19_v4 = vld [vmem:[%s316_s0 + $0x20] sm:$0xff]  ;;  %v20_v5 = vld [vmem:[%s316_s0 + $0x28] sm:$0xff] }
   0x4   :  { %v21_v6 = vld [vmem:[%s316_s0 + $0x30] sm:$0xff]  ;;  %v22_v7 = vld [vmem:[%s316_s0 + $0x38] sm:$0xff]  ;;  %v166_v60 = vld [vmem:[%s317_s1] ss:$0 sm:$0xff]  ;;  %s211_s1 = smov [#allocation2]  }
   0x6   :  { %25 = vadd.xlane.f32.xlu0 %v16_v2  ;;  %29 = vadd.xlane.f32.xlu1 %v18_v3 }
   0xa   :  { %31 = vadd.xlane.f32.xlu0 %v19_v4  ;;  %33 = vadd.xlane.f32.xlu1 %v20_v5 }
   0xe   :  { %35 = vadd.xlane.f32.xlu0 %v21_v6  ;;  %37 = vadd.xlane.f32.xlu1 %v22_v7 }
  0x8f   :  { %v24_v8 = vpop.xlane.xlu0 %23  ;;  %v28_v9 = vpop.xlane.xlu1 %27 }
  0x90   :  { %v40_v10 = vmul.f32 0.0078125, %v24_v8  ;;  %v42_v11 = vmul.f32 0.0078125, %v28_v9 }
  0x92   :  { %v258_v12 = vsub.f32 %v15_v0, %v40_v10  ;;  %v260_v13 = vsub.f32 %v17_v1, %v42_v11  ;;  %v167_v1 = vld [vmem:[%s318_s2] ss:$0 sm:$0xff]  ;;  %s155_s2 = sshll.u32 %s211_s1, 4  ;;  %s156_s2 = int_to_ptr.vmem [resolvable:$true] %s155_s2 }
  0x93   :  { %v26_v14 = vpop.xlane.xlu0 %25  ;;  %v30_v15 = vpop.xlane.xlu1 %29  ;;  %s187_s4 = scalar_lea.vmem %s156_s2, 1024  ;;  %p192_p1 = scmp.lt.s32.totalorder %s156_s2, %s156_s2 }
  0x94   :  { %v41_v16 = vmul.f32 0.0078125, %v26_v14  ;;  %v56_v17 = vmul.f32 %v258_v12, %v258_v12  ;;  %v43_v18 = vmul.f32 0.0078125, %v30_v15  ;;  %v58_v21 = vmul.f32 %v260_v13, %v260_v13  ;;  %p188_p0 = scmp.ne.s32.totalorder %s156_s2, %s187_s4  ;;  %p193_p2 = scmp.lt.s32.totalorder %s187_s4, %s187_s4 }
  0x96   :  { %v264_v19 = vsub.f32 %v16_v2, %v41_v16  ;;  %64 = vadd.xlane.f32.xlu0 %v56_v17  ;;  %v266_v20 = vsub.f32 %v18_v3, %v43_v18  ;;  %p194_p3 = por %p193_p2, %p192_p1 }
  0x97   :  { %v32_v22 = vpop.xlane.xlu0 %31  ;;  %v34_v23 = vpop.xlane.xlu1 %33 }
  0x98   :  { %v44_v24 = vmul.f32 0.0078125, %v32_v22  ;;  %v57_v25 = vmul.f32 %v264_v19, %v264_v19  ;;  %v45_v26 = vmul.f32 0.0078125, %v34_v23  ;;  %v59_v29 = vmul.f32 %v266_v20, %v266_v20  ;;  %p195_p4 = pnand %p194_p3, %p188_p0 }
  0x9a   :  { %v272_v27 = vsub.f32 %v19_v4, %v44_v24  ;;  %68 = vadd.xlane.f32.xlu0 %v58_v21  ;;  %66 = vadd.xlane.f32.xlu1 %v57_v25  ;;  %v274_v28 = vsub.f32 %v20_v5, %v45_v26 }
  0x9b   :  { %v36_v30 = vpop.xlane.xlu0 %35  ;;  %v38_v31 = vpop.xlane.xlu1 %37 }
  0x9c   :  { %v46_v32 = vmul.f32 0.0078125, %v36_v30  ;;  %v60_v33 = vmul.f32 %v272_v27, %v272_v27  ;;  %v47_v34 = vmul.f32 0.0078125, %v38_v31  ;;  %v61_v37 = vmul.f32 %v274_v28, %v274_v28 }
  0x9e   :  { %v280_v35 = vsub.f32 %v21_v6, %v46_v32  ;;  %70 = vadd.xlane.f32.xlu1 %v59_v29  ;;  %72 = vadd.xlane.f32.xlu0 %v60_v33  ;;  %v282_v36 = vsub.f32 %v22_v7, %v47_v34 }
  0xa0   :  { %v62_v38 = vmul.f32 %v280_v35, %v280_v35  ;;  %v63_v39 = vmul.f32 %v282_v36, %v282_v36 }
  0xa2   :  { %74 = vadd.xlane.f32.xlu1 %v61_v37  ;;  %76 = vadd.xlane.f32.xlu0 %v62_v38 }
  0xa6   :  { %78 = vadd.xlane.f32.xlu1 %v63_v39 }
 0x123   :  { %v65_v40 = vpop.xlane.xlu0 %64 }
 0x124   :  { %v80_v41 = vmul.f32 0.0078125, %v65_v40 }
 0x126   :  { %v88_v42 = vadd.f32 1e-05, %v80_v41 }
 0x127   :  { %v67_v43 = vpop.xlane.xlu1 %66  ;;  %v69_v44 = vpop.xlane.xlu0 %68 }
 0x128   :  { %171 = vrsqrt.f32 %v88_v42  ;;  %v81_v45 = vmul.f32 0.0078125, %v67_v43  ;;  %v82_v46 = vmul.f32 0.0078125, %v69_v44 }
 0x12a   :  { %v89_v47 = vadd.f32 1e-05, %v81_v45  ;;  %v90_v48 = vadd.f32 1e-05, %v82_v46 }
 0x12b   :  { %v71_v49 = vpop.xlane.xlu1 %70  ;;  %v73_v50 = vpop.xlane.xlu0 %72 }
 0x12c   :  { %173 = vrsqrt.f32 %v89_v47  ;;  %v83_v51 = vmul.f32 0.0078125, %v71_v49  ;;  %v84_v52 = vmul.f32 0.0078125, %v73_v50 }
 0x12d   :  { %175 = vrsqrt.f32 %v90_v48 }
 0x12e   :  { %v91_v53 = vadd.f32 1e-05, %v83_v51  ;;  %v92_v54 = vadd.f32 1e-05, %v84_v52 }
 0x12f   :  { %v75_v55 = vpop.xlane.xlu1 %74  ;;  %v77_v56 = vpop.xlane.xlu0 %76 }
 0x130   :  { %177 = vrsqrt.f32 %v91_v53  ;;  %v85_v57 = vmul.f32 0.0078125, %v75_v55  ;;  %v86_v58 = vmul.f32 0.0078125, %v77_v56 }
 0x131   :  { %179 = vrsqrt.f32 %v92_v54 }
 0x132   :  { %v172_v59 = vpop.eup %171  ;;  %v93_v61 = vadd.f32 1e-05, %v85_v57  ;;  %v94_v62 = vadd.f32 1e-05, %v86_v58 }
 0x133   :  { %v104_v63 = vmul.f32 %v172_v59, %v258_v12  ;;  %v79_v0 = vpop.xlane.xlu1 %78 }
 0x134   :  { %181 = vrsqrt.f32 %v93_v61  ;;  %v87_v2 = vmul.f32 0.0078125, %v79_v0 }
 0x135   :  { %v119_v3 = vmul.f32 %v166_v60, %v104_v63  ;;  %183 = vrsqrt.f32 %v94_v62 }
 0x136   :  { %v174_v4 = vpop.eup %173  ;;  %v95_v5 = vadd.f32 1e-05, %v87_v2 }
 0x137   :  { %v176_v6 = vpop.eup %175  ;;  %v134_v7 = vadd.f32 %v167_v1, %v119_v3  ;;  %v105_v8 = vmul.f32 %v174_v4, %v264_v19 }
 0x138   :  { %v106_v9 = vmul.f32 %v176_v6, %v260_v13  ;;  %185 = vrsqrt.f32 %v95_v5 }
 0x139   :  { %142 = vst [vmem:[#allocation2] sm:$0xff] %v134_v7  ;;  %v120_v10 = vmul.f32 %v166_v60, %v105_v8 }
 0x13a   :  { %v178_v11 = vpop.eup %177  ;;  %v121_v12 = vmul.f32 %v166_v60, %v106_v9 }
 0x13b   :  { %v180_v14 = vpop.eup %179  ;;  %v135_v15 = vadd.f32 %v167_v1, %v120_v10  ;;  %v107_v16 = vmul.f32 %v178_v11, %v266_v20 }
 0x13c   :  { %v136_v17 = vadd.f32 %v167_v1, %v121_v12  ;;  %v108_v18 = vmul.f32 %v180_v14, %v272_v27 }
 0x13d   :  { %143 = vst [vmem:[#allocation2 + $0x8] sm:$0xff] %v135_v15  ;;  %v122_v21 = vmul.f32 %v166_v60, %v107_v16 }
 0x13e   :  { %v182_v22 = vpop.eup %181  ;;  %144 = vst [vmem:[#allocation2 + $0x10] sm:$0xff] %v136_v17  ;;  %v123_v23 = vmul.f32 %v166_v60, %v108_v18 }
 0x13f   :  { %v184_v19 = vpop.eup %183  ;;  %v137_v24 = vadd.f32 %v167_v1, %v122_v21  ;;  %v109_v13 = vmul.f32 %v182_v22, %v274_v28 }
 0x140   :  { %v138_v25 = vadd.f32 %v167_v1, %v123_v23  ;;  %v110_v26 = vmul.f32 %v184_v19, %v280_v35 }
 0x141   :  { %145 = vst [vmem:[#allocation2 + $0x18] sm:$0xff] %v137_v24  ;;  %v124_v29 = vmul.f32 %v166_v60, %v109_v13 }
 0x142   :  { %v186_v30 = vpop.eup %185  ;;  %146 = vst [vmem:[#allocation2 + $0x20] sm:$0xff] %v138_v25  ;;  %v125_v20 = vmul.f32 %v166_v60, %v110_v26 }
 0x143   :  { %v139_v31 = vadd.f32 %v167_v1, %v124_v29  ;;  %v111_v27 = vmul.f32 %v186_v30, %v282_v36 }
 0x144   :  { %v140_v32 = vadd.f32 %v167_v1, %v125_v20 }
 0x145   :  { %147 = vst [vmem:[#allocation2 + $0x28] sm:$0xff] %v139_v31  ;;  %v126_v33 = vmul.f32 %v166_v60, %v111_v27 }
 0x146   :  { %148 = vst [vmem:[#allocation2 + $0x30] sm:$0xff] %v140_v32 }
 0x147   :  { %v141_v34 = vadd.f32 %v167_v1, %v126_v33 }
 0x149   :  { %149 = vst [vmem:[#allocation2 + $0x38] sm:$0xff] %v141_v34 }
 0x14a   :  { %198 = shalt.err (!%p195_p4)
}
 0x14b   :  { %s199_s7 = scalar_lea.hbm %s319_s3, 1024 }
 0x14c   :  { %p200_p5 = scmp.ne.s32.totalorder %s319_s3, %s199_s7  ;;  %p203_p6 = scmp.lt.u32.totalorder %s199_s7, %s319_s3 }
 0x14e   :  { %p205_p7 = pnand %p203_p6, %p200_p5 }
 0x150   :  { %208 = shalt.err (!%p205_p7)
}
 0x151   :  { %s212_s12 = smov 128   ;;  %s213_s13 = smov 8  }
 0x152   :  { %161 = dma.vmem_to_hbm [thread:$0]  %s156_s2, 1024, %s319_s3, [#allocation3], %s212_s12, %s212_s12, %s213_s13  }
 0x153   :  { %209 = dma.done.wait [#allocation3], 1024  }
 0x154   :  { %210 = vsyncadd [#allocation3], 4294966272 }
 0x155   :  { %165 = vsyncpa [#allocation3], 1 }

</bundles_post_ra>
